<compile_context>
chip_gen: v6e
topology: v6e:2x2x1
jax: 0.10.0
libtpu: 0.0.40
codegen_flags: <defaults>
</compile_context>

<pallas_src>
import functools

import jax
import jax.numpy as jnp
from jax.experimental import pallas as pl
from jax.experimental.pallas import tpu as pltpu


def _round_up(x, m):
    return (x + m - 1) // m * m


# --------------------------------------------------------------------------
# Kernel: one MXU matmul performs avg-pool + cls head + bbox head.
# --------------------------------------------------------------------------
def _predictor_kernel(x_ref, w_ref, b_ref, out_ref):
    # x_ref:   (tile_n, C*HW)    bf16/f32 activations (flat NCHW rows)
    # w_ref:   (C*HW, OUT_PAD)   fused (cls|bbox) weights, 1/HW folded, 49x-repeated
    # b_ref:   (1, OUT_PAD)      f32 fused biases (zero in padded columns)
    # out_ref: (tile_n, OUT_PAD) f32 fused logits, lane-dense
    acc = jnp.dot(x_ref[...], w_ref[...], preferred_element_type=jnp.float32)
    out_ref[...] = (acc + b_ref[...]).astype(out_ref.dtype)


# --------------------------------------------------------------------------
# One-time parameter preparation (hoist out of the per-call path).
# --------------------------------------------------------------------------
def prepare_fused_params(cls_w, cls_b, bbox_w, bbox_b, *, hw=49,
                         compute_dtype=jnp.bfloat16):
    """cls_w: (num_classes, C), bbox_w: (num_bbox, C). Returns fused params."""
    num_classes, _ = cls_w.shape
    num_bbox = bbox_w.shape[0]
    n_out = num_classes + num_bbox
    out_pad = _round_up(max(n_out, 128), 128)          # lane-dense output width

    # Fuse heads, fold the 1/HW avg-pool scale (in f32, before any bf16 cast),
    # zero-pad the output dim to a multiple of 128.
    w = jnp.concatenate([cls_w.T, bbox_w.T], axis=1).astype(jnp.float32) / hw
    w = jnp.pad(w, ((0, 0), (0, out_pad - n_out)))     # (C, out_pad)
    # Repeat each channel's row HW times so a single matmul against the flat
    # (N, C*HW) NCHW view performs pooling + both linear heads.
    w_rep = jnp.repeat(w, hw, axis=0).astype(compute_dtype)   # (C*HW, out_pad)

    b = jnp.concatenate([cls_b, bbox_b]).astype(jnp.float32)
    b = jnp.pad(b, (0, out_pad - n_out)).reshape(1, out_pad)  # (1, out_pad)
    return w_rep, b, num_classes, num_bbox


def _choose_tile_n(n, tile_n):
    tile_n = max(8, min(tile_n, _round_up(n, 8)))
    # v7x has 2 TensorCores: make sure medium batches produce >= 2 "parallel"
    # grid steps so both cores get rows.
    if n > 16 and pl.cdiv(n, tile_n) < 2:
        tile_n = _round_up(-(-n // 2), 8)
    return tile_n


# --------------------------------------------------------------------------
# Jitted forward (shapes / tile size are static).
# --------------------------------------------------------------------------
@functools.partial(jax.jit, static_argnames=("num_classes", "num_bbox", "tile_n"))
def _predictor_forward(x_nchw, w_rep, b_fused, *, num_classes, num_bbox, tile_n):
    N, C, H, W = x_nchw.shape
    K, out_pad = w_rep.shape
    assert C * H * W == K, "activation channels*spatial must match fused weight"

    # Free, layout-preserving view of NCHW as (N, C*HW); no HBM transpose.
    x_flat = x_nchw.reshape(N, K)
    if x_flat.dtype != w_rep.dtype:
        # TODO(synk): ideally the upstream ROI-feature producer emits bf16
        # directly so this cast does not add an extra HBM pass.
        x_flat = x_flat.astype(w_rep.dtype)

    grid = (pl.cdiv(N, tile_n),)      # ragged last block handled by Pallas

    cost = pl.CostEstimate(
        flops=2 * N * K * out_pad,
        transcendentals=0,
        bytes_accessed=(N * K * x_flat.dtype.itemsize
                        + K * out_pad * w_rep.dtype.itemsize
                        + out_pad * 4
                        + N * out_pad * 4),
    )

    fused = pl.pallas_call(
        _predictor_kernel,
        out_shape=jax.ShapeDtypeStruct((N, out_pad), jnp.float32),
        grid=grid,
        in_specs=[
            pl.BlockSpec((tile_n, K), lambda i: (i, 0)),     # streamed x tiles
            pl.BlockSpec((K, out_pad), lambda i: (0, 0)),    # weights resident
            pl.BlockSpec((1, out_pad), lambda i: (0, 0)),    # bias resident
        ],
        out_specs=pl.BlockSpec((tile_n, out_pad), lambda i: (i, 0)),
        compiler_params=pltpu.CompilerParams(
            dimension_semantics=("parallel",),
            vmem_limit_bytes=48 * 1024 * 1024,
        ),
        cost_estimate=cost,
    )(x_flat, w_rep, b_fused)

    cls_logit = fused[:, :num_classes]
    bbox_pred = fused[:, num_classes:num_classes + num_bbox]
    return cls_logit, bbox_pred


def fast_rcnn_predictor(x_nchw, fused_params, *, tile_n=256):
    """x_nchw: (N, C, 7, 7); fused_params from prepare_fused_params()."""
    w_rep, b_fused, num_classes, num_bbox = fused_params
    N, _, H, W = x_nchw.shape
    # Global spatial mean == AvgPool2d(7, 7) only for 7x7 ROI features.
    assert H == 7 and W == 7, "FastRCNNPredictor expects 7x7 pooled ROI features"
    tile = _choose_tile_n(N, tile_n)
    return _predictor_forward(x_nchw, w_rep, b_fused,
                              num_classes=num_classes, num_bbox=num_bbox,
                              tile_n=tile)


if __name__ == "__main__":
    # Config-consistent shapes:
    #   res2_out_channels = 32 -> num_inputs = 32 * 2**3 = 256
    #   num_classes = 8, CLS_AGNOSTIC_BBOX_REG = False -> bbox out = 32
    N = 4
    num_inputs = 256
    num_classes = 8
    num_bbox = num_classes * 4
    H = W = 7

    key = jax.random.PRNGKey(0)
    kx, kc, kb = jax.random.split(key, 3)

    x = jax.random.normal(kx, (N, num_inputs, H, W), dtype=jnp.float32)

    # Parameter init mirroring the module's __init__:
    #   cls_score.weight ~ N(0, 0.01), bias = 0
    #   bbox_pred.weight ~ N(0, 0.001), bias = 0
    cls_w = 0.01 * jax.random.normal(kc, (num_classes, num_inputs), dtype=jnp.float32)
    cls_b = jnp.zeros((num_classes,), dtype=jnp.float32)
    bbox_w = 0.001 * jax.random.normal(kb, (num_bbox, num_inputs), dtype=jnp.float32)
    bbox_b = jnp.zeros((num_bbox,), dtype=jnp.float32)

    # One-time fused parameter prep (cached/reused across calls).
    fused_params = prepare_fused_params(cls_w, cls_b, bbox_w, bbox_b,
                                        hw=H * W, compute_dtype=jnp.bfloat16)
    jax.block_until_ready(fused_params[:2])

    cls_logit, bbox_pred = fast_rcnn_predictor(x, fused_params)
    jax.block_until_ready((cls_logit, bbox_pred))

    assert cls_logit.shape == (N, num_classes)
    assert bbox_pred.shape == (N, num_bbox)

    # Reference 1: same bf16-quantized inputs, f32 accumulation (tight check).
    w_rep, b_fused, _, _ = fused_params
    x_q = x.reshape(N, -1).astype(jnp.bfloat16).astype(jnp.float32)
    ref_fused = jnp.dot(x_q, w_rep.astype(jnp.float32),
                        precision=jax.lax.Precision.HIGHEST) + b_fused
    cls_ref_q = ref_fused[:, :num_classes]
    bbox_ref_q = ref_fused[:, num_classes:num_classes + num_bbox]
    assert jnp.allclose(cls_logit, cls_ref_q, atol=1e-4, rtol=1e-4), "cls mismatch (quantized ref)"
    assert jnp.allclose(bbox_pred, bbox_ref_q, atol=1e-4, rtol=1e-4), "bbox mismatch (quantized ref)"

    # Reference 2: full-f32 PyTorch semantics (loose check, bf16 input path).
    pooled_ref = jnp.mean(x.reshape(N, num_inputs, H * W), axis=-1)
    cls_ref = pooled_ref @ cls_w.T + cls_b
    bbox_ref = pooled_ref @ bbox_w.T + bbox_b
    assert jnp.allclose(cls_logit, cls_ref, atol=3e-3, rtol=3e-2), "cls mismatch (f32 ref)"
    assert jnp.allclose(bbox_pred, bbox_ref, atol=3e-3, rtol=3e-2), "bbox mismatch (f32 ref)"

    print("KERNEL_OK")
</pallas_src>

<mosaic_0001>
module attributes {stable_mosaic.version = 11 : i64} {
  func.func @_predictor_kernel(%arg0: i32, %arg1: memref<8x12544xbf16, #tpu.memory_space<vmem>>, %arg2: memref<12544x128xbf16, #tpu.memory_space<vmem>>, %arg3: memref<1x128xf32, #tpu.memory_space<vmem>>, %arg4: memref<8x128xf32, #tpu.memory_space<vmem>>) attributes {dimension_semantics = [#tpu.dimension_semantics<parallel>], iteration_bounds = array<i64: 1>, scalar_prefetch = 0 : i64, scratch_operands = 0 : i64, tpu.core_type = #tpu.core_type<tc>, window_params = [{transform_indices = @transform_0, window_bounds = array<i64: 8, 12544>}, {pipeline_mode = #tpu.pipeline_mode<synchronous>, transform_indices = @transform_1, window_bounds = array<i64: 12544, 128>}, {pipeline_mode = #tpu.pipeline_mode<synchronous>, transform_indices = @transform_2, window_bounds = array<i64: 1, 128>}, {transform_indices = @transform_3, window_bounds = array<i64: 8, 128>}]} {
    %c0 = arith.constant 0 : index
    %c0_0 = arith.constant 0 : index
    %0 = vector.load %arg1[%c0, %c0_0] : memref<8x12544xbf16, #tpu.memory_space<vmem>>, vector<8x12544xbf16>
    %c0_1 = arith.constant 0 : index
    %c0_2 = arith.constant 0 : index
    %1 = vector.load %arg2[%c0_1, %c0_2] : memref<12544x128xbf16, #tpu.memory_space<vmem>>, vector<12544x128xbf16>
    %cst = arith.constant dense<0.000000e+00> : vector<8x128xf32>
    %2 = tpu.matmul %0, %1, %cst {dimension_numbers = #tpu.dot_dimension_numbers<[1], [0], [0], [1], [0, 0, 1, 1], [], []>} : vector<8x12544xbf16>, vector<12544x128xbf16>, vector<8x128xf32> -> vector<8x128xf32>
    %c0_3 = arith.constant 0 : index
    %c0_4 = arith.constant 0 : index
    %3 = vector.load %arg3[%c0_3, %c0_4] : memref<1x128xf32, #tpu.memory_space<vmem>>, vector<1x128xf32>
    %4 = vector.broadcast %3 : vector<1x128xf32> to vector<8x128xf32>
    %5 = arith.addf %2, %4 : vector<8x128xf32>
    %c0_5 = arith.constant 0 : index
    %c0_6 = arith.constant 0 : index
    %6 = vector.load %arg4[%c0_5, %c0_6] : memref<8x128xf32, #tpu.memory_space<vmem>>, vector<8x128xf32>
    tpu.vector_store %arg4[%c0_5, %c0_6], %5 {strides = array<i32>} : memref<8x128xf32, #tpu.memory_space<vmem>>, vector<8x128xf32>,
    return
  }
  func.func @transform_0(%arg0: i32) -> (i32, i32) {
    %c0_i32 = arith.constant 0 : i32
    %c0_i32_0 = arith.constant 0 : i32
    return %arg0, %c0_i32 : i32, i32
  }
  func.func @transform_1(%arg0: i32) -> (i32, i32) {
    %c0_i32 = arith.constant 0 : i32
    %c0_i32_0 = arith.constant 0 : i32
    %c0_i32_1 = arith.constant 0 : i32
    return %c0_i32, %c0_i32_0 : i32, i32
  }
  func.func @transform_2(%arg0: i32) -> (i32, i32) {
    %c0_i32 = arith.constant 0 : i32
    %c0_i32_0 = arith.constant 0 : i32
    %c0_i32_1 = arith.constant 0 : i32
    return %c0_i32, %c0_i32_0 : i32, i32
  }
  func.func @transform_3(%arg0: i32) -> (i32, i32) {
    %c0_i32 = arith.constant 0 : i32
    %c0_i32_0 = arith.constant 0 : i32
    return %arg0, %c0_i32 : i32, i32
  }
}

</mosaic_0001>

<bundles_post_ra>
// kernel: _predictor_forward.1
= control target key start
LH: loop header
LB: loop body
LE: loop exit
PB: predicated region body
PF: predicated region fallthrough
CT: control target
= control target key end

     0   :  { %v1695_v29 = vlaneseq  ;;  %v11656_v33 = vmov 1983009808   ;;  %s14284_s0 = inlined_call_operand.vmem [shape: bf16[4,12544], index: 0, kind: input, shape index: {}]   ;;  %s14285_s1 = inlined_call_operand.vmem [shape: bf16[12544,128], index: 1, kind: input, shape index: {}]   ;;  %s14286_s2 = inlined_call_operand.vmem [shape: f32[1,128], index: 2, kind: input, shape index: {}]   ;;  %s14287_s3 = inlined_call_operand.vmem [shape: f32[4,128], index: 3, kind: output, shape index: {}]  }
   0x1   :  { %v10799_v0 = vld [vmem:[%s14285_s1 + $0x78] sm:$0xff]   ;;  %v10803_v4 = vld [vmem:[%s14285_s1 + $0x70] sm:$0xff]   ;;  %v10807_v8 = vld [vmem:[%s14285_s1 + $0x68] sm:$0xff]   ;;  %v1693_v34 = vunpack.c.l.s4 %v11656_v33 }
   0x2   :  { %v10800_v1 = vld [vmem:[%s14285_s1 + $0x38] sm:$0xff]   ;;  %9720 = vmatprep.subr.bf16.mxu0 %v10799_v0  ;;  %v10804_v5 = vld [vmem:[%s14285_s1 + $0x30] sm:$0xff]   ;;  %v10808_v9 = vld [vmem:[%s14285_s1 + $0x28] sm:$0xff]   ;;  %v1696_v35 = vshrl.u32 %v1695_v29, 7 }
   0x3   :  { %v10801_v2 = vld [vmem:[%s14285_s1 + $0xf8] sm:$0xff]   ;;  %9721 = vmatpush3.bf16.msra.mxu0 %v10800_v1  ;;  %v10805_v6 = vld [vmem:[%s14285_s1 + $0xf0] sm:$0xff]   ;;  %v10809_v10 = vld [vmem:[%s14285_s1 + $0xe8] sm:$0xff]   ;;  %v1694_v38 = vunpack.c.0.s8 %v1693_v34 }
   0x4   :  { %v10802_v3 = vld [vmem:[%s14285_s1 + $0xb8] sm:$0xff]   ;;  %9742 = vmatprep.subr.bf16.mxu1 %v10801_v2  ;;  %9722 = vmatprep.subr.bf16.mxu0 %v10803_v4  ;;  %v10806_v7 = vld [vmem:[%s14285_s1 + $0xb0] sm:$0xff]   ;;  %v10810_v11 = vld [vmem:[%s14285_s1 + $0xa8] sm:$0xff]  }
   0x5   :  { %9743 = vmatpush3.bf16.msra.mxu1 %v10802_v3  ;;  %v10811_v12 = vld [vmem:[%s14285_s1 + $0x60] sm:$0xff]   ;;  %v10815_v16 = vld [vmem:[%s14285_s1 + $0x58] sm:$0xff]   ;;  %v10819_v20 = vld [vmem:[%s14285_s1 + $0x50] sm:$0xff]   ;;  %v11782_v40 = vsub.s32 %v1694_v38, %v1696_v35 }
   0x6   :  { %9744 = vmatprep.subr.bf16.mxu1 %v10805_v6  ;;  %v10812_v13 = vld [vmem:[%s14285_s1 + $0x20] sm:$0xff]   ;;  %v10816_v17 = vld [vmem:[%s14285_s1 + $0x18] sm:$0xff]   ;;  %v10820_v21 = vld [vmem:[%s14285_s1 + $0x10] sm:$0xff]  }
   0x7   :  { %9723 = vmatpush3.bf16.msra.mxu0 %v10804_v5  ;;  %v10813_v14 = vld [vmem:[%s14285_s1 + $0xe0] sm:$0xff]   ;;  %v10817_v18 = vld [vmem:[%s14285_s1 + $0xd8] sm:$0xff]   ;;  %v10821_v22 = vld [vmem:[%s14285_s1 + $0xd0] sm:$0xff]  }
   0x8   :  { %9724 = vmatprep.subr.bf16.mxu0 %v10807_v8  ;;  %v10814_v15 = vld [vmem:[%s14285_s1 + $0xa0] sm:$0xff]   ;;  %v10818_v19 = vld [vmem:[%s14285_s1 + $0x98] sm:$0xff]   ;;  %v10822_v23 = vld [vmem:[%s14285_s1 + $0x90] sm:$0xff]  }
   0x9   :  { %9745 = vmatpush3.bf16.msra.mxu1 %v10806_v7  ;;  %v10823_v24 = vld [vmem:[%s14285_s1 + $0x48] sm:$0xff]   ;;  %v10827_v28 = vld [vmem:[%s14285_s1 + $0x40] sm:$0xff]   ;;  %v10833_v37 = vld [vmem:[%s14285_s1 + $0x178] sm:$0xff]  }
   0xa   :  { %9746 = vmatprep.subr.bf16.mxu1 %v10809_v10  ;;  %v10824_v25 = vld [vmem:[%s14285_s1 + $0x8] sm:$0xff]   ;;  %v10828_v30 = vld [vmem:[%s14285_s1] sm:$0xff]   ;;  %v10836_v41 = vld [vmem:[%s14285_s1 + $0x1f8] sm:$0xff]  }
   0xb   :  { %9725 = vmatpush3.bf16.msra.mxu0 %v10808_v9  ;;  %v10825_v26 = vld [vmem:[%s14285_s1 + $0xc8] sm:$0xff]   ;;  %v10829_v31 = vld [vmem:[%s14285_s1 + $0xc0] sm:$0xff]   ;;  %v10835_v44 = vld [vmem:[%s14285_s1 + $0x138] sm:$0xff]  }
   0xc   :  { %9726 = vmatprep.subr.bf16.mxu0 %v10811_v12  ;;  %v10826_v27 = vld [vmem:[%s14285_s1 + $0x88] sm:$0xff]   ;;  %v10830_v32 = vld [vmem:[%s14284_s0] ss:$196 sps:$4 sm:$0xff]   ;;  %v10837_v45 = vld [vmem:[%s14285_s1 + $0x1b8] sm:$0xff]  }
   0xd   :  { %9747 = vmatpush3.bf16.msra.mxu1 %v10810_v11  ;;  %v10832_v36 = vld [vmem:[%s14285_s1 + $0x80] sm:$0xff]   ;;  %v1698_v42 = vrot.slane %v10830_v32, %v11782_v40  ;;  %v10838_v48 = vld [vmem:[%s14285_s1 + $0x170] sm:$0xff]   ;;  %v10842_v52 = vld [vmem:[%s14285_s1 + $0x168] sm:$0xff]  }
   0xe   :  { %9748 = vmatprep.subr.bf16.mxu1 %v10813_v14  ;;  %v10834_v39 = vld [vmem:[%s14284_s0 + $0x4] ss:$196 sps:$4 sm:$0xff]   ;;  %v10840_v49 = vld [vmem:[%s14285_s1 + $0x1f0] sm:$0xff]   ;;  %v10850_v60 = vld [vmem:[%s14285_s1 + $0x158] sm:$0xff]  }
   0xf   :  { %9727 = vmatpush3.bf16.msra.mxu0 %v10812_v13  ;;  %v1705_v43 = vrot.slane %v10834_v39, %v11782_v40  ;;  %v1706_v46 = vcombine.high %v1698_v42, %v1698_v42  ;;  %v10839_v50 = vld [vmem:[%s14285_s1 + $0x130] sm:$0xff]   ;;  %v10844_v53 = vld [vmem:[%s14285_s1 + $0x1e8] sm:$0xff]   ;;  %v10846_v56 = vld [vmem:[%s14285_s1 + $0x160] sm:$0xff]  }
  0x10   :  { %9728 = vmatprep.subr.bf16.mxu0 %v10815_v16  ;;  %v10841_v51 = vld [vmem:[%s14285_s1 + $0x1b0] sm:$0xff]   ;;  %v10843_v54 = vld [vmem:[%s14285_s1 + $0x128] sm:$0xff]   ;;  %v10848_v57 = vld [vmem:[%s14285_s1 + $0x1e0] sm:$0xff]  }
  0x11   :  { %9749 = vmatpush3.bf16.msra.mxu1 %v10814_v15  ;;  %v1707_v47 = vcombine.high %v1705_v43, %v1705_v43  ;;  %6965 = vmatprep.mubr.bf16.mxu0 %v1706_v46  ;;  %v10845_v55 = vld [vmem:[%s14285_s1 + $0x1a8] sm:$0xff]   ;;  %v10847_v58 = vld [vmem:[%s14285_s1 + $0x120] sm:$0xff]   ;;  %v10852_v61 = vld [vmem:[%s14285_s1 + $0x1d8] sm:$0xff]  }
  0x12   :  { %9750 = vmatprep.subr.bf16.mxu1 %v10817_v18  ;;  %v10849_v59 = vld [vmem:[%s14285_s1 + $0x1a0] sm:$0xff]   ;;  %v10851_v62 = vld [vmem:[%s14285_s1 + $0x118] sm:$0xff]   ;;  %v10854_v0 = vld [vmem:[%s14285_s1 + $0x150] sm:$0xff]  }
  0x13   :  { %9729 = vmatpush3.bf16.msra.mxu0 %v10816_v17  ;;  %7005 = vmatprep.mubr.bf16.mxu1 %v1707_v47  ;;  %v10853_v63 = vld [vmem:[%s14285_s1 + $0x198] sm:$0xff]   ;;  %v10856_v1 = vld [vmem:[%s14285_s1 + $0x1d0] sm:$0xff]   ;;  %v10858_v4 = vld [vmem:[%s14285_s1 + $0x148] sm:$0xff]  }
  0x14   :  { %9730 = vmatprep.subr.bf16.mxu0 %v10819_v20  ;;  %v10855_v2 = vld [vmem:[%s14285_s1 + $0x110] sm:$0xff]   ;;  %v10860_v5 = vld [vmem:[%s14285_s1 + $0x1c8] sm:$0xff]   ;;  %v10862_v8 = vld [vmem:[%s14285_s1 + $0x140] sm:$0xff]  }
  0x15   :  { %9751 = vmatpush3.bf16.msra.mxu1 %v10818_v19  ;;  %v10857_v3 = vld [vmem:[%s14285_s1 + $0x190] sm:$0xff]   ;;  %v10859_v6 = vld [vmem:[%s14285_s1 + $0x108] sm:$0xff]   ;;  %v10864_v9 = vld [vmem:[%s14285_s1 + $0x1c0] sm:$0xff]  }
  0x16   :  { %9752 = vmatprep.subr.bf16.mxu1 %v10821_v22  ;;  %v10861_v7 = vld [vmem:[%s14285_s1 + $0x188] sm:$0xff]   ;;  %v10863_v11 = vld [vmem:[%s14285_s1 + $0x100] sm:$0xff]   ;;  %v10868_v16 = vld [vmem:[%s14285_s1 + $0x278] sm:$0xff]  }
  0x17   :  { %9731 = vmatpush3.bf16.msra.mxu0 %v10820_v21  ;;  %v10865_v10 = vld [vmem:[%s14284_s0 + $0x8] ss:$196 sps:$4 sm:$0xff]   ;;  %v10867_v14 = vld [vmem:[%s14285_s1 + $0x180] sm:$0xff]   ;;  %v10870_v18 = vld [vmem:[%s14285_s1 + $0x238] sm:$0xff]  }
  0x18   :  { %9732 = vmatprep.subr.bf16.mxu0 %v10823_v24  ;;  %v1716_v12 = vrot.slane %v10865_v10, %v11782_v40  ;;  %v10869_v13 = vld [vmem:[%s14284_s0 + $0xc] ss:$196 sps:$4 sm:$0xff]   ;;  %v10871_v19 = vld [vmem:[%s14285_s1 + $0x2f8] sm:$0xff]   ;;  %v10882_v32 = vld [vmem:[%s14285_s1 + $0x220] sm:$0xff]  }
  0x19   :  { %9753 = vmatpush3.bf16.msra.mxu1 %v10822_v23  ;;  %v1723_v17 = vrot.slane %v10869_v13, %v11782_v40  ;;  %v10872_v21 = vld [vmem:[%s14285_s1 + $0x2b8] sm:$0xff]   ;;  %v10873_v22 = vld [vmem:[%s14285_s1 + $0x270] sm:$0xff]   ;;  %v10880_v29 = vld [vmem:[%s14285_s1 + $0x2a8] sm:$0xff]  }
  0x1a   :  { %9754 = vmatprep.subr.bf16.mxu1 %v10825_v26  ;;  %v1724_v15 = vcombine.high %v1716_v12, %v1716_v12  ;;  %v10875_v23 = vld [vmem:[%s14285_s1 + $0x2f0] sm:$0xff]   ;;  %v10877_v26 = vld [vmem:[%s14285_s1 + $0x268] sm:$0xff]   ;;  %v10884_v33 = vld [vmem:[%s14285_s1 + $0x2a0] sm:$0xff]  }
  0x1b   :  { %9733 = vmatpush3.bf16.msra.mxu0 %v10824_v25  ;;  %v1725_v20 = vcombine.high %v1723_v17, %v1723_v17  ;;  %v10874_v24 = vld [vmem:[%s14285_s1 + $0x230] sm:$0xff]   ;;  %v10885_v34 = vld [vmem:[%s14285_s1 + $0x258] sm:$0xff]   ;;  %v10896_v46 = vld [vmem:[%s14285_s1 + $0x288] sm:$0xff]  }
  0x1c   :  { %9734 = vmatprep.subr.bf16.mxu0 %v10827_v28  ;;  %v10876_v25 = vld [vmem:[%s14285_s1 + $0x2b0] sm:$0xff]   ;;  %v10878_v28 = vld [vmem:[%s14285_s1 + $0x228] sm:$0xff]   ;;  %v10887_v35 = vld [vmem:[%s14285_s1 + $0x2d8] sm:$0xff]  }
  0x1d   :  { %9755 = vmatpush3.bf16.msra.mxu1 %v10826_v27  ;;  %v10879_v27 = vld [vmem:[%s14285_s1 + $0x2e8] sm:$0xff]   ;;  %v10889_v38 = vld [vmem:[%s14285_s1 + $0x250] sm:$0xff]   ;;  %v10897_v47 = vld [vmem:[%s14285_s1 + $0x240] sm:$0xff]  }
  0x1e   :  { %9756 = vmatprep.subr.bf16.mxu1 %v10829_v31  ;;  %v10883_v31 = vld [vmem:[%s14285_s1 + $0x2e0] sm:$0xff]   ;;  %v10891_v39 = vld [vmem:[%s14285_s1 + $0x2d0] sm:$0xff]   ;;  %v10922_v10 = vld [vmem:[%s14285_s1 + $0x3d8] sm:$0xff]  }
  0x1f   :  { %9735 = vmatpush3.bf16.msra.mxu0 %v10828_v30  ;;  %v10881_v30 = vld [vmem:[%s14285_s1 + $0x260] sm:$0xff]   ;;  %v10924_v13 = vld [vmem:[%s14285_s1 + $0x350] sm:$0xff]  }
  0x20   :  { %9764 = vmatprep.subr.bf16.mxu0 %v10833_v37  ;;  %v10888_v37 = vld [vmem:[%s14285_s1 + $0x298] sm:$0xff]  }
  0x21   :  { %9757 = vmatpush3.bf16.msra.mxu1 %v10832_v36  ;;  %v10886_v36 = vld [vmem:[%s14285_s1 + $0x218] sm:$0xff]  }
  0x22   :  { %9786 = vmatprep.subr.bf16.mxu1 %v10836_v41  ;;  %6966 = vmatmul.mubr.bf16.vlgmr.msra.gmra.mxu0 %v1698_v42  ;;  %v10890_v41 = vld [vmem:[%s14285_s1 + $0x210] sm:$0xff]  }
  0x23   :  { %9765 = vmatpush3.bf16.msra.mxu0 %v10835_v44  ;;  %7045 = vmatprep.mubr.bf16.mxu0 %v1724_v15  ;;  %v10892_v42 = vld [vmem:[%s14285_s1 + $0x290] sm:$0xff]   ;;  %v10895_v44 = vld [vmem:[%s14285_s1 + $0x2c8] sm:$0xff]  }
  0x24   :  { %7006 = vmatmul.mubr.bf16.vlgmr.msra.gmra.mxu1 %v1705_v43  ;;  %9766 = vmatprep.subr.bf16.mxu0 %v10838_v48  ;;  %v10893_v43 = vld [vmem:[%s14285_s1 + $0x248] sm:$0xff]   ;;  %v10899_v48 = vld [vmem:[%s14285_s1 + $0x2c0] sm:$0xff]   ;;  %v10925_v15 = vld [vmem:[%s14285_s1 + $0x310] sm:$0xff]  }
  0x25   :  { %9787 = vmatpush3.bf16.msra.mxu1 %v10837_v45  ;;  %7085 = vmatprep.mubr.bf16.mxu1 %v1725_v20  ;;  %v10894_v45 = vld [vmem:[%s14285_s1 + $0x208] sm:$0xff]  }
  0x26   :  { %9788 = vmatprep.subr.bf16.mxu1 %v10840_v49  ;;  %v10900_v49 = vld [vmem:[%s14284_s0 + $0x10] ss:$196 sps:$4 sm:$0xff]   ;;  %v10931_v20 = vld [vmem:[%s14285_s1 + $0x388] sm:$0xff]  }
  0x27   :  { %9767 = vmatpush3.bf16.msra.mxu0 %v10839_v50  ;;  %v10898_v50 = vld [vmem:[%s14285_s1 + $0x200] sm:$0xff]  }
  0x28   :  { %9768 = vmatprep.subr.bf16.mxu0 %v10842_v52  ;;  %v10902_v52 = vld [vmem:[%s14285_s1 + $0x280] sm:$0xff]  }
  0x29   :  { %9789 = vmatpush3.bf16.msra.mxu1 %v10841_v51  ;;  %v1734_v51 = vrot.slane %v10900_v49, %v11782_v40  ;;  %v10956_v49 = vld [vmem:[%s14285_s1 + $0x418] sm:$0xff]  }
  0x2a   :  { %9790 = vmatprep.subr.bf16.mxu1 %v10844_v53  ;;  %v10904_v53 = vld [vmem:[%s14284_s0 + $0x14] ss:$196 sps:$4 sm:$0xff]  }
  0x2b   :  { %9769 = vmatpush3.bf16.msra.mxu0 %v10843_v54  ;;  %v10903_v54 = vld [vmem:[%s14285_s1 + $0x378] sm:$0xff]  }
  0x2c   :  { %9770 = vmatprep.subr.bf16.mxu0 %v10846_v56  ;;  %v1741_v56 = vrot.slane %v10904_v53, %v11782_v40  ;;  %v10960_v53 = vld [vmem:[%s14285_s1 + $0x410] sm:$0xff]  }
  0x2d   :  { %9791 = vmatpush3.bf16.msra.mxu1 %v10845_v55  ;;  %v1742_v55 = vcombine.high %v1734_v51, %v1734_v51 }
  0x2e   :  { %9792 = vmatprep.subr.bf16.mxu1 %v10848_v57  ;;  %v10906_v57 = vld [vmem:[%s14285_s1 + $0x3f8] sm:$0xff]  }
  0x2f   :  { %9771 = vmatpush3.bf16.msra.mxu0 %v10847_v58  ;;  %v10905_v58 = vld [vmem:[%s14285_s1 + $0x338] sm:$0xff]  }
  0x30   :  { %9772 = vmatprep.subr.bf16.mxu0 %v10850_v60  ;;  %v10907_v60 = vld [vmem:[%s14285_s1 + $0x3b8] sm:$0xff]  }
  0x31   :  { %9793 = vmatpush3.bf16.msra.mxu1 %v10849_v59  ;;  %v1743_v59 = vcombine.high %v1741_v56, %v1741_v56 }
  0x32   :  { %9794 = vmatprep.subr.bf16.mxu1 %v10852_v61  ;;  %v10908_v61 = vld [vmem:[%s14285_s1 + $0x370] sm:$0xff]  }
  0x33   :  { %9773 = vmatpush3.bf16.msra.mxu0 %v10851_v62  ;;  %v10910_v62 = vld [vmem:[%s14285_s1 + $0x3f0] sm:$0xff]  }
  0x34   :  { %9774 = vmatprep.subr.bf16.mxu0 %v10854_v0  ;;  %v10911_v0 = vld [vmem:[%s14285_s1 + $0x3b0] sm:$0xff]  }
  0x35   :  { %9795 = vmatpush3.bf16.msra.mxu1 %v10853_v63  ;;  %v10909_v63 = vld [vmem:[%s14285_s1 + $0x330] sm:$0xff]  }
  0x36   :  { %9796 = vmatprep.subr.bf16.mxu1 %v10856_v1  ;;  %v10912_v1 = vld [vmem:[%s14285_s1 + $0x368] sm:$0xff]  }
  0x37   :  { %9775 = vmatpush3.bf16.msra.mxu0 %v10855_v2  ;;  %v10914_v2 = vld [vmem:[%s14285_s1 + $0x3e8] sm:$0xff]  }
  0x38   :  { %9776 = vmatprep.subr.bf16.mxu0 %v10858_v4  ;;  %v10915_v4 = vld [vmem:[%s14285_s1 + $0x3a8] sm:$0xff]  }
  0x39   :  { %9797 = vmatpush3.bf16.msra.mxu1 %v10857_v3  ;;  %v10913_v3 = vld [vmem:[%s14285_s1 + $0x328] sm:$0xff]  }
  0x3a   :  { %9798 = vmatprep.subr.bf16.mxu1 %v10860_v5  ;;  %v10916_v5 = vld [vmem:[%s14285_s1 + $0x360] sm:$0xff]  }
  0x3b   :  { %9777 = vmatpush3.bf16.msra.mxu0 %v10859_v6  ;;  %v10918_v6 = vld [vmem:[%s14285_s1 + $0x3e0] sm:$0xff]  }
  0x3c   :  { %9778 = vmatprep.subr.bf16.mxu0 %v10862_v8  ;;  %v10919_v8 = vld [vmem:[%s14285_s1 + $0x3a0] sm:$0xff]  }
  0x3d   :  { %9799 = vmatpush3.bf16.msra.mxu1 %v10861_v7  ;;  %v10917_v7 = vld [vmem:[%s14285_s1 + $0x320] sm:$0xff]  }
  0x3e   :  { %9800 = vmatprep.subr.bf16.mxu1 %v10864_v9  ;;  %v10920_v9 = vld [vmem:[%s14285_s1 + $0x358] sm:$0xff]  }
  0x3f   :  { %9779 = vmatpush3.bf16.msra.mxu0 %v10863_v11  ;;  %v10921_v11 = vld [vmem:[%s14285_s1 + $0x318] sm:$0xff]  }
  0x40   :  { %9808 = vmatprep.subr.bf16.mxu0 %v10868_v16  ;;  %v10927_v16 = vld [vmem:[%s14285_s1 + $0x390] sm:$0xff]  }
  0x41   :  { %9801 = vmatpush3.bf16.msra.mxu1 %v10867_v14  ;;  %v10926_v14 = vld [vmem:[%s14285_s1 + $0x3d0] sm:$0xff]  }
  0x42   :  { %9830 = vmatprep.subr.bf16.mxu1 %v10871_v19  ;;  %7046 = vmatmul.mubr.bf16.vlgmr.msra.gmra.mxu0 %v1716_v12  ;;  %v10923_v12 = vld [vmem:[%s14285_s1 + $0x398] sm:$0xff]   ;;  %v10929_v19 = vld [vmem:[%s14285_s1 + $0x308] sm:$0xff]  }
  0x43   :  { %9809 = vmatpush3.bf16.msra.mxu0 %v10870_v18  ;;  %7125 = vmatprep.mubr.bf16.mxu0 %v1742_v55  ;;  %v10930_v18 = vld [vmem:[%s14285_s1 + $0x3c8] sm:$0xff]   ;;  %v10962_v55 = vld [vmem:[%s14285_s1 + $0x490] sm:$0xff]  }
  0x44   :  { %7086 = vmatmul.mubr.bf16.vlgmr.msra.gmra.mxu1 %v1723_v17  ;;  %9810 = vmatprep.subr.bf16.mxu0 %v10873_v22  ;;  %v10928_v17 = vld [vmem:[%s14285_s1 + $0x348] sm:$0xff]   ;;  %v10933_v22 = vld [vmem:[%s14285_s1 + $0x300] sm:$0xff]  }
  0x45   :  { %9831 = vmatpush3.bf16.msra.mxu1 %v10872_v21  ;;  %7165 = vmatprep.mubr.bf16.mxu1 %v1743_v59  ;;  %v10932_v21 = vld [vmem:[%s14285_s1 + $0x340] sm:$0xff]   ;;  %v10966_v59 = vld [vmem:[%s14285_s1 + $0x488] sm:$0xff]  }
  0x46   :  { %9832 = vmatprep.subr.bf16.mxu1 %v10875_v23  ;;  %v10934_v23 = vld [vmem:[%s14285_s1 + $0x3c0] sm:$0xff]  }
  0x47   :  { %9811 = vmatpush3.bf16.msra.mxu0 %v10874_v24  ;;  %v10935_v24 = vld [vmem:[%s14284_s0 + $0x18] ss:$196 sps:$4 sm:$0xff]  }
  0x48   :  { %9812 = vmatprep.subr.bf16.mxu0 %v10877_v26  ;;  %v1752_v26 = vrot.slane %v10935_v24, %v11782_v40  ;;  %v10992_v24 = vld [vmem:[%s14285_s1 + $0x5d8] sm:$0xff]  }
  0x49   :  { %9833 = vmatpush3.bf16.msra.mxu1 %v10876_v25  ;;  %v10937_v25 = vld [vmem:[%s14285_s1 + $0x380] sm:$0xff]  }
  0x4a   :  { %9834 = vmatprep.subr.bf16.mxu1 %v10879_v27  ;;  %v10938_v27 = vld [vmem:[%s14285_s1 + $0x478] sm:$0xff]  }
  0x4b   :  { %9813 = vmatpush3.bf16.msra.mxu0 %v10878_v28  ;;  %v10939_v28 = vld [vmem:[%s14284_s0 + $0x1c] ss:$196 sps:$4 sm:$0xff]  }
  0x4c   :  { %9814 = vmatprep.subr.bf16.mxu0 %v10881_v30  ;;  %v10940_v30 = vld [vmem:[%s14285_s1 + $0x438] sm:$0xff]  }
  0x4d   :  { %9835 = vmatpush3.bf16.msra.mxu1 %v10880_v29  ;;  %v1760_v29 = vcombine.high %v1752_v26, %v1752_v26 }
  0x4e   :  { %9836 = vmatprep.subr.bf16.mxu1 %v10883_v31  ;;  %v1759_v31 = vrot.slane %v10939_v28, %v11782_v40  ;;  %v10996_v28 = vld [vmem:[%s14285_s1 + $0x5d0] sm:$0xff]  }
  0x4f   :  { %9815 = vmatpush3.bf16.msra.mxu0 %v10882_v32  ;;  %v10941_v32 = vld [vmem:[%s14285_s1 + $0x4f8] sm:$0xff]  }
  0x50   :  { %9816 = vmatprep.subr.bf16.mxu0 %v10885_v34  ;;  %v1761_v34 = vcombine.high %v1759_v31, %v1759_v31 }
  0x51   :  { %9837 = vmatpush3.bf16.msra.mxu1 %v10884_v33  ;;  %v10942_v33 = vld [vmem:[%s14285_s1 + $0x4b8] sm:$0xff]  }
  0x52   :  { %9838 = vmatprep.subr.bf16.mxu1 %v10887_v35  ;;  %v10943_v35 = vld [vmem:[%s14285_s1 + $0x470] sm:$0xff]  }
  0x53   :  { %9817 = vmatpush3.bf16.msra.mxu0 %v10886_v36  ;;  %v10944_v36 = vld [vmem:[%s14285_s1 + $0x430] sm:$0xff]  }
  0x54   :  { %9818 = vmatprep.subr.bf16.mxu0 %v10889_v38  ;;  %v10946_v38 = vld [vmem:[%s14285_s1 + $0x4b0] sm:$0xff]  }
  0x55   :  { %9839 = vmatpush3.bf16.msra.mxu1 %v10888_v37  ;;  %v10945_v37 = vld [vmem:[%s14285_s1 + $0x4f0] sm:$0xff]  }
  0x56   :  { %9840 = vmatprep.subr.bf16.mxu1 %v10891_v39  ;;  %v10947_v39 = vld [vmem:[%s14285_s1 + $0x468] sm:$0xff]  }
  0x57   :  { %9819 = vmatpush3.bf16.msra.mxu0 %v10890_v41  ;;  %v10948_v41 = vld [vmem:[%s14285_s1 + $0x428] sm:$0xff]  }
  0x58   :  { %9820 = vmatprep.subr.bf16.mxu0 %v10893_v43  ;;  %v10950_v43 = vld [vmem:[%s14285_s1 + $0x4a8] sm:$0xff]  }
  0x59   :  { %9841 = vmatpush3.bf16.msra.mxu1 %v10892_v42  ;;  %v10949_v42 = vld [vmem:[%s14285_s1 + $0x4e8] sm:$0xff]  }
  0x5a   :  { %9842 = vmatprep.subr.bf16.mxu1 %v10895_v44  ;;  %v10951_v44 = vld [vmem:[%s14285_s1 + $0x460] sm:$0xff]  }
  0x5b   :  { %9821 = vmatpush3.bf16.msra.mxu0 %v10894_v45  ;;  %v10952_v45 = vld [vmem:[%s14285_s1 + $0x420] sm:$0xff]  }
  0x5c   :  { %9822 = vmatprep.subr.bf16.mxu0 %v10897_v47  ;;  %v10954_v47 = vld [vmem:[%s14285_s1 + $0x4a0] sm:$0xff]  }
  0x5d   :  { %9843 = vmatpush3.bf16.msra.mxu1 %v10896_v46  ;;  %v10953_v46 = vld [vmem:[%s14285_s1 + $0x4e0] sm:$0xff]  }
  0x5e   :  { %9844 = vmatprep.subr.bf16.mxu1 %v10899_v48  ;;  %v10955_v48 = vld [vmem:[%s14285_s1 + $0x458] sm:$0xff]  }
  0x5f   :  { %9823 = vmatpush3.bf16.msra.mxu0 %v10898_v50  ;;  %v10957_v50 = vld [vmem:[%s14285_s1 + $0x4d8] sm:$0xff]  }
  0x60   :  { %9852 = vmatprep.subr.bf16.mxu0 %v10903_v54  ;;  %v10961_v54 = vld [vmem:[%s14285_s1 + $0x4d0] sm:$0xff]  }
  0x61   :  { %9845 = vmatpush3.bf16.msra.mxu1 %v10902_v52  ;;  %v10959_v52 = vld [vmem:[%s14285_s1 + $0x450] sm:$0xff]  }
  0x62   :  { %9874 = vmatprep.subr.bf16.mxu1 %v10906_v57  ;;  %7126 = vmatmul.mubr.bf16.vlgmr.msra.gmra.mxu0 %v1734_v51  ;;  %v10958_v51 = vld [vmem:[%s14285_s1 + $0x498] sm:$0xff]   ;;  %v10964_v57 = vld [vmem:[%s14285_s1 + $0x408] sm:$0xff]  }
  0x63   :  { %9853 = vmatpush3.bf16.msra.mxu0 %v10905_v58  ;;  %7205 = vmatprep.mubr.bf16.mxu0 %v1760_v29  ;;  %v10965_v58 = vld [vmem:[%s14285_s1 + $0x4c8] sm:$0xff]   ;;  %v10997_v29 = vld [vmem:[%s14285_s1 + $0x590] sm:$0xff]  }
  0x64   :  { %7166 = vmatmul.mubr.bf16.vlgmr.msra.gmra.mxu1 %v1741_v56  ;;  %9854 = vmatprep.subr.bf16.mxu0 %v10908_v61  ;;  %v10963_v56 = vld [vmem:[%s14285_s1 + $0x448] sm:$0xff]   ;;  %v10968_v61 = vld [vmem:[%s14285_s1 + $0x400] sm:$0xff]  }
  0x65   :  { %9875 = vmatpush3.bf16.msra.mxu1 %v10907_v60  ;;  %7245 = vmatprep.mubr.bf16.mxu1 %v1761_v34  ;;  %v10967_v60 = vld [vmem:[%s14285_s1 + $0x440] sm:$0xff]  }
  0x66   :  { %9876 = vmatprep.subr.bf16.mxu1 %v10910_v62  ;;  %v10969_v62 = vld [vmem:[%s14285_s1 + $0x4c0] sm:$0xff]  }
  0x67   :  { %9855 = vmatpush3.bf16.msra.mxu0 %v10909_v63  ;;  %v10970_v63 = vld [vmem:[%s14284_s0 + $0x20] ss:$196 sps:$4 sm:$0xff]  }
  0x68   :  { %9856 = vmatprep.subr.bf16.mxu0 %v10912_v1  ;;  %v1770_v1 = vrot.slane %v10970_v63, %v11782_v40  ;;  %v11002_v34 = vld [vmem:[%s14285_s1 + $0x540] sm:$0xff]   ;;  %v11027_v63 = vld [vmem:[%s14285_s1 + $0x6d8] sm:$0xff]  }
  0x69   :  { %9877 = vmatpush3.bf16.msra.mxu1 %v10911_v0  ;;  %v10972_v0 = vld [vmem:[%s14285_s1 + $0x480] sm:$0xff]  }
  0x6a   :  { %9878 = vmatprep.subr.bf16.mxu1 %v10914_v2  ;;  %v10973_v2 = vld [vmem:[%s14285_s1 + $0x578] sm:$0xff]  }
  0x6b   :  { %9857 = vmatpush3.bf16.msra.mxu0 %v10913_v3  ;;  %v10974_v3 = vld [vmem:[%s14284_s0 + $0x24] ss:$196 sps:$4 sm:$0xff]  }
  0x6c   :  { %9858 = vmatprep.subr.bf16.mxu0 %v10916_v5  ;;  %v1778_v5 = vcombine.high %v1770_v1, %v1770_v1 }
  0x6d   :  { %9879 = vmatpush3.bf16.msra.mxu1 %v10915_v4  ;;  %v10975_v4 = vld [vmem:[%s14285_s1 + $0x538] sm:$0xff]  }
  0x6e   :  { %9880 = vmatprep.subr.bf16.mxu1 %v10918_v6  ;;  %v1777_v6 = vrot.slane %v10974_v3, %v11782_v40  ;;  %v11031_v3 = vld [vmem:[%s14285_s1 + $0x6d0] sm:$0xff]  }
  0x6f   :  { %9859 = vmatpush3.bf16.msra.mxu0 %v10917_v7  ;;  %v10976_v7 = vld [vmem:[%s14285_s1 + $0x5f8] sm:$0xff]  }
  0x70   :  { %9860 = vmatprep.subr.bf16.mxu0 %v10920_v9  ;;  %v1779_v9 = vcombine.high %v1777_v6, %v1777_v6 }
  0x71   :  { %9881 = vmatpush3.bf16.msra.mxu1 %v10919_v8  ;;  %v10977_v8 = vld [vmem:[%s14285_s1 + $0x5b8] sm:$0xff]  }
  0x72   :  { %9882 = vmatprep.subr.bf16.mxu1 %v10922_v10  ;;  %v10978_v10 = vld [vmem:[%s14285_s1 + $0x570] sm:$0xff]  }
  0x73   :  { %9861 = vmatpush3.bf16.msra.mxu0 %v10921_v11  ;;  %v10979_v11 = vld [vmem:[%s14285_s1 + $0x530] sm:$0xff]  }
  0x74   :  { %9862 = vmatprep.subr.bf16.mxu0 %v10924_v13  ;;  %v10981_v13 = vld [vmem:[%s14285_s1 + $0x5b0] sm:$0xff]  }
  0x75   :  { %9883 = vmatpush3.bf16.msra.mxu1 %v10923_v12  ;;  %v10980_v12 = vld [vmem:[%s14285_s1 + $0x5f0] sm:$0xff]  }
  0x76   :  { %9884 = vmatprep.subr.bf16.mxu1 %v10926_v14  ;;  %v10982_v14 = vld [vmem:[%s14285_s1 + $0x568] sm:$0xff]  }
  0x77   :  { %9863 = vmatpush3.bf16.msra.mxu0 %v10925_v15  ;;  %v10983_v15 = vld [vmem:[%s14285_s1 + $0x528] sm:$0xff]  }
  0x78   :  { %9864 = vmatprep.subr.bf16.mxu0 %v10928_v17  ;;  %v10985_v17 = vld [vmem:[%s14285_s1 + $0x5a8] sm:$0xff]  }
  0x79   :  { %9885 = vmatpush3.bf16.msra.mxu1 %v10927_v16  ;;  %v10984_v16 = vld [vmem:[%s14285_s1 + $0x5e8] sm:$0xff]  }
  0x7a   :  { %9886 = vmatprep.subr.bf16.mxu1 %v10930_v18  ;;  %v10986_v18 = vld [vmem:[%s14285_s1 + $0x560] sm:$0xff]  }
  0x7b   :  { %9865 = vmatpush3.bf16.msra.mxu0 %v10929_v19  ;;  %v10987_v19 = vld [vmem:[%s14285_s1 + $0x520] sm:$0xff]  }
  0x7c   :  { %9866 = vmatprep.subr.bf16.mxu0 %v10932_v21  ;;  %v10989_v21 = vld [vmem:[%s14285_s1 + $0x5a0] sm:$0xff]  }
  0x7d   :  { %9887 = vmatpush3.bf16.msra.mxu1 %v10931_v20  ;;  %v10988_v20 = vld [vmem:[%s14285_s1 + $0x5e0] sm:$0xff]  }
  0x7e   :  { %9888 = vmatprep.subr.bf16.mxu1 %v10934_v23  ;;  %v10991_v23 = vld [vmem:[%s14285_s1 + $0x518] sm:$0xff]  }
  0x7f   :  { %9867 = vmatpush3.bf16.msra.mxu0 %v10933_v22  ;;  %v10990_v22 = vld [vmem:[%s14285_s1 + $0x558] sm:$0xff]  }
  0x80   :  { %9896 = vmatprep.subr.bf16.mxu0 %v10938_v27  ;;  %v10995_v27 = vld [vmem:[%s14285_s1 + $0x510] sm:$0xff]  }
  0x81   :  { %9889 = vmatpush3.bf16.msra.mxu1 %v10937_v25  ;;  %v10993_v25 = vld [vmem:[%s14285_s1 + $0x598] sm:$0xff]  }
  0x82   :  { %9918 = vmatprep.subr.bf16.mxu1 %v10941_v32  ;;  %7206 = vmatmul.mubr.bf16.vlgmr.msra.gmra.mxu0 %v1752_v26  ;;  %v10994_v26 = vld [vmem:[%s14285_s1 + $0x550] sm:$0xff]   ;;  %v11000_v32 = vld [vmem:[%s14285_s1 + $0x5c8] sm:$0xff]  }
  0x83   :  { %9897 = vmatpush3.bf16.msra.mxu0 %v10940_v30  ;;  %7285 = vmatprep.mubr.bf16.mxu0 %v1778_v5  ;;  %v10998_v30 = vld [vmem:[%s14285_s1 + $0x548] sm:$0xff]  }
  0x84   :  { %7246 = vmatmul.mubr.bf16.vlgmr.msra.gmra.mxu1 %v1759_v31  ;;  %9898 = vmatprep.subr.bf16.mxu0 %v10943_v35  ;;  %v10999_v31 = vld [vmem:[%s14285_s1 + $0x508] sm:$0xff]   ;;  %v11003_v35 = vld [vmem:[%s14285_s1 + $0x500] sm:$0xff]  }
  0x85   :  { %9919 = vmatpush3.bf16.msra.mxu1 %v10942_v33  ;;  %7325 = vmatprep.mubr.bf16.mxu1 %v1779_v9  ;;  %v11001_v33 = vld [vmem:[%s14285_s1 + $0x588] sm:$0xff]   ;;  %v11037_v9 = vld [vmem:[%s14285_s1 + $0x640] sm:$0xff]  }
  0x86   :  { %9920 = vmatprep.subr.bf16.mxu1 %v10945_v37  ;;  %v11005_v37 = vld [vmem:[%s14284_s0 + $0x28] ss:$196 sps:$4 sm:$0xff]  }
  0x87   :  { %9899 = vmatpush3.bf16.msra.mxu0 %v10944_v36  ;;  %v11004_v36 = vld [vmem:[%s14285_s1 + $0x5c0] sm:$0xff]   ;;  %v11033_v5 = vld [vmem:[%s14285_s1 + $0x648] sm:$0xff]  }
  0x88   :  { %9900 = vmatprep.subr.bf16.mxu0 %v10947_v39  ;;  %v1788_v39 = vrot.slane %v11005_v37, %v11782_v40  ;;  %v11051_v37 = vld [vmem:[%s14285_s1 + $0x7b0] sm:$0xff]  }
  0x89   :  { %9921 = vmatpush3.bf16.msra.mxu1 %v10946_v38  ;;  %v11007_v38 = vld [vmem:[%s14285_s1 + $0x580] sm:$0xff]  }
  0x8a   :  { %9922 = vmatprep.subr.bf16.mxu1 %v10949_v42  ;;  %v11009_v42 = vld [vmem:[%s14284_s0 + $0x2c] ss:$196 sps:$4 sm:$0xff]  }
  0x8b   :  { %9901 = vmatpush3.bf16.msra.mxu0 %v10948_v41  ;;  %v11008_v41 = vld [vmem:[%s14285_s1 + $0x678] sm:$0xff]  }
  0x8c   :  { %9902 = vmatprep.subr.bf16.mxu0 %v10951_v44  ;;  %v1796_v44 = vcombine.high %v1788_v39, %v1788_v39 }
  0x8d   :  { %9923 = vmatpush3.bf16.msra.mxu1 %v10950_v43  ;;  %v11010_v43 = vld [vmem:[%s14285_s1 + $0x638] sm:$0xff]  }
  0x8e   :  { %9924 = vmatprep.subr.bf16.mxu1 %v10953_v46  ;;  %v11011_v46 = vld [vmem:[%s14285_s1 + $0x6f8] sm:$0xff]  }
  0x8f   :  { %9903 = vmatpush3.bf16.msra.mxu0 %v10952_v45  ;;  %v1795_v45 = vrot.slane %v11009_v42, %v11782_v40  ;;  %v11053_v42 = vld [vmem:[%s14285_s1 + $0x728] sm:$0xff]  }
  0x90   :  { %9904 = vmatprep.subr.bf16.mxu0 %v10955_v48 }
  0x91   :  { %9925 = vmatpush3.bf16.msra.mxu1 %v10954_v47  ;;  %v11012_v47 = vld [vmem:[%s14285_s1 + $0x6b8] sm:$0xff]   ;;  %v1797_v48 = vcombine.high %v1795_v45, %v1795_v45 }
  0x92   :  { %9926 = vmatprep.subr.bf16.mxu1 %v10957_v50  ;;  %v11014_v50 = vld [vmem:[%s14285_s1 + $0x630] sm:$0xff]  }
  0x93   :  { %9905 = vmatpush3.bf16.msra.mxu0 %v10956_v49  ;;  %v11013_v49 = vld [vmem:[%s14285_s1 + $0x670] sm:$0xff]  }
  0x94   :  { %9906 = vmatprep.subr.bf16.mxu0 %v10959_v52  ;;  %v11016_v52 = vld [vmem:[%s14285_s1 + $0x6b0] sm:$0xff]  }
  0x95   :  { %9927 = vmatpush3.bf16.msra.mxu1 %v10958_v51  ;;  %v11015_v51 = vld [vmem:[%s14285_s1 + $0x6f0] sm:$0xff]  }
  0x96   :  { %9928 = vmatprep.subr.bf16.mxu1 %v10961_v54  ;;  %v11018_v54 = vld [vmem:[%s14285_s1 + $0x628] sm:$0xff]  }
  0x97   :  { %9907 = vmatpush3.bf16.msra.mxu0 %v10960_v53  ;;  %v11017_v53 = vld [vmem:[%s14285_s1 + $0x668] sm:$0xff]  }
  0x98   :  { %9908 = vmatprep.subr.bf16.mxu0 %v10963_v56  ;;  %v11020_v56 = vld [vmem:[%s14285_s1 + $0x6a8] sm:$0xff]  }
  0x99   :  { %9929 = vmatpush3.bf16.msra.mxu1 %v10962_v55  ;;  %v11019_v55 = vld [vmem:[%s14285_s1 + $0x6e8] sm:$0xff]  }
  0x9a   :  { %9930 = vmatprep.subr.bf16.mxu1 %v10965_v58  ;;  %v11022_v58 = vld [vmem:[%s14285_s1 + $0x620] sm:$0xff]  }
  0x9b   :  { %9909 = vmatpush3.bf16.msra.mxu0 %v10964_v57  ;;  %v11021_v57 = vld [vmem:[%s14285_s1 + $0x660] sm:$0xff]  }
  0x9c   :  { %9910 = vmatprep.subr.bf16.mxu0 %v10967_v60  ;;  %v11024_v60 = vld [vmem:[%s14285_s1 + $0x6a0] sm:$0xff]  }
  0x9d   :  { %9931 = vmatpush3.bf16.msra.mxu1 %v10966_v59  ;;  %v11023_v59 = vld [vmem:[%s14285_s1 + $0x6e0] sm:$0xff]  }
  0x9e   :  { %9932 = vmatprep.subr.bf16.mxu1 %v10969_v62  ;;  %v11026_v62 = vld [vmem:[%s14285_s1 + $0x618] sm:$0xff]  }
  0x9f   :  { %9911 = vmatpush3.bf16.msra.mxu0 %v10968_v61  ;;  %v11025_v61 = vld [vmem:[%s14285_s1 + $0x658] sm:$0xff]  }
  0xa0   :  { %9940 = vmatprep.subr.bf16.mxu0 %v10973_v2  ;;  %v11030_v2 = vld [vmem:[%s14285_s1 + $0x610] sm:$0xff]  }
  0xa1   :  { %9933 = vmatpush3.bf16.msra.mxu1 %v10972_v0  ;;  %v11028_v0 = vld [vmem:[%s14285_s1 + $0x698] sm:$0xff]  }
  0xa2   :  { %9962 = vmatprep.subr.bf16.mxu1 %v10976_v7  ;;  %7286 = vmatmul.mubr.bf16.vlgmr.msra.gmra.mxu0 %v1770_v1  ;;  %v11029_v1 = vld [vmem:[%s14285_s1 + $0x650] sm:$0xff]   ;;  %v11035_v7 = vld [vmem:[%s14285_s1 + $0x6c8] sm:$0xff]  }
  0xa3   :  { %9941 = vmatpush3.bf16.msra.mxu0 %v10975_v4  ;;  %7365 = vmatprep.mubr.bf16.mxu0 %v1796_v44  ;;  %v11032_v4 = vld [vmem:[%s14285_s1 + $0x690] sm:$0xff]   ;;  %v11055_v44 = vld [vmem:[%s14285_s1 + $0x7a8] sm:$0xff]  }
  0xa4   :  { %7326 = vmatmul.mubr.bf16.vlgmr.msra.gmra.mxu1 %v1777_v6  ;;  %9942 = vmatprep.subr.bf16.mxu0 %v10978_v10  ;;  %v11034_v6 = vld [vmem:[%s14285_s1 + $0x608] sm:$0xff]   ;;  %v11038_v10 = vld [vmem:[%s14285_s1 + $0x600] sm:$0xff]  }
  0xa5   :  { %9963 = vmatpush3.bf16.msra.mxu1 %v10977_v8  ;;  %7405 = vmatprep.mubr.bf16.mxu1 %v1797_v48  ;;  %v11036_v8 = vld [vmem:[%s14285_s1 + $0x688] sm:$0xff]   ;;  %v11059_v48 = vld [vmem:[%s14285_s1 + $0x7a0] sm:$0xff]  }
  0xa6   :  { %9964 = vmatprep.subr.bf16.mxu1 %v10980_v12  ;;  %v11040_v12 = vld [vmem:[%s14284_s0 + $0x30] ss:$196 sps:$4 sm:$0xff]  }
  0xa7   :  { %9943 = vmatpush3.bf16.msra.mxu0 %v10979_v11  ;;  %v11039_v11 = vld [vmem:[%s14285_s1 + $0x6c0] sm:$0xff]  }
  0xa8   :  { %9944 = vmatprep.subr.bf16.mxu0 %v10982_v14  ;;  %v1806_v14 = vrot.slane %v11040_v12, %v11782_v40 }
  0xa9   :  { %9965 = vmatpush3.bf16.msra.mxu1 %v10981_v13  ;;  %v11042_v13 = vld [vmem:[%s14285_s1 + $0x680] sm:$0xff]  }
  0xaa   :  { %9966 = vmatprep.subr.bf16.mxu1 %v10984_v16  ;;  %v11044_v16 = vld [vmem:[%s14284_s0 + $0x34] ss:$196 sps:$4 sm:$0xff]  }
  0xab   :  { %9945 = vmatpush3.bf16.msra.mxu0 %v10983_v15  ;;  %v11043_v15 = vld [vmem:[%s14285_s1 + $0x778] sm:$0xff]  }
  0xac   :  { %9946 = vmatprep.subr.bf16.mxu0 %v10986_v18 }
  0xad   :  { %9967 = vmatpush3.bf16.msra.mxu1 %v10985_v17  ;;  %v1814_v17 = vcombine.high %v1806_v14, %v1806_v14 }
  0xae   :  { %9968 = vmatprep.subr.bf16.mxu1 %v10988_v20  ;;  %v8935_v20 = vld [vmem:[%s14286_s2] ss:$0 sm:$0xff] }
  0xaf   :  { %9947 = vmatpush3.bf16.msra.mxu0 %v10987_v19  ;;  %v11045_v19 = vld [vmem:[%s14285_s1 + $0x738] sm:$0xff]  }
  0xb0   :  { %9948 = vmatprep.subr.bf16.mxu0 %v10990_v22  ;;  %v1813_v22 = vrot.slane %v11044_v16, %v11782_v40 }
  0xb1   :  { %9969 = vmatpush3.bf16.msra.mxu1 %v10989_v21 }
  0xb2   :  { %9970 = vmatprep.subr.bf16.mxu1 %v10992_v24 }
  0xb3   :  { %9949 = vmatpush3.bf16.msra.mxu0 %v10991_v23  ;;  %v11046_v23 = vld [vmem:[%s14285_s1 + $0x7f8] sm:$0xff]  }
  0xb4   :  { %9950 = vmatprep.subr.bf16.mxu0 %v10994_v26 }
  0xb5   :  { %9971 = vmatpush3.bf16.msra.mxu1 %v10993_v25  ;;  %v11047_v25 = vld [vmem:[%s14285_s1 + $0x7b8] sm:$0xff]  }
  0xb6   :  { %9972 = vmatprep.subr.bf16.mxu1 %v10996_v28 }
  0xb7   :  { %9951 = vmatpush3.bf16.msra.mxu0 %v10995_v27  ;;  %v1815_v27 = vcombine.high %v1813_v22, %v1813_v22 }
  0xb8   :  { %9952 = vmatprep.subr.bf16.mxu0 %v10998_v30  ;;  %v11048_v30 = vld [vmem:[%s14285_s1 + $0x770] sm:$0xff]  }
  0xb9   :  { %9973 = vmatpush3.bf16.msra.mxu1 %v10997_v29 }
  0xba   :  { %9974 = vmatprep.subr.bf16.mxu1 %v11000_v32  ;;  %v11049_v32 = vld [vmem:[%s14285_s1 + $0x730] sm:$0xff]  }
  0xbb   :  { %9953 = vmatpush3.bf16.msra.mxu0 %v10999_v31 }
  0xbc   :  { %9954 = vmatprep.subr.bf16.mxu0 %v11002_v34 }
  0xbd   :  { %9975 = vmatpush3.bf16.msra.mxu1 %v11001_v33 }
  0xbe   :  { %9976 = vmatprep.subr.bf16.mxu1 %v11004_v36 }
  0xbf   :  { %9955 = vmatpush3.bf16.msra.mxu0 %v11003_v35  ;;  %v11050_v35 = vld [vmem:[%s14285_s1 + $0x7f0] sm:$0xff]  }
  0xc0   :  { %9984 = vmatprep.subr.bf16.mxu0 %v11008_v41  ;;  %v11052_v41 = vld [vmem:[%s14285_s1 + $0x768] sm:$0xff]  }
  0xc1   :  { %9977 = vmatpush3.bf16.msra.mxu1 %v11007_v38 }
  0xc2   :  { %10006 = vmatprep.subr.bf16.mxu1 %v11011_v46  ;;  %7366 = vmatmul.mubr.bf16.vlgmr.msra.gmra.mxu0 %v1788_v39  ;;  %v11057_v46 = vld [vmem:[%s14285_s1 + $0x720] sm:$0xff]  }
  0xc3   :  { %9985 = vmatpush3.bf16.msra.mxu0 %v11010_v43  ;;  %7445 = vmatprep.mubr.bf16.mxu0 %v1814_v17  ;;  %v11054_v43 = vld [vmem:[%s14285_s1 + $0x7e8] sm:$0xff]  }
  0xc4   :  { %7406 = vmatmul.mubr.bf16.vlgmr.msra.gmra.mxu1 %v1795_v45  ;;  %9986 = vmatprep.subr.bf16.mxu0 %v11013_v49  ;;  %v11056_v45 = vld [vmem:[%s14285_s1 + $0x760] sm:$0xff]   ;;  %v11060_v49 = vld [vmem:[%s14285_s1 + $0x758] sm:$0xff]  }
  0xc5   :  { %10007 = vmatpush3.bf16.msra.mxu1 %v11012_v47  ;;  %7485 = vmatprep.mubr.bf16.mxu1 %v1815_v27  ;;  %v11058_v47 = vld [vmem:[%s14285_s1 + $0x7e0] sm:$0xff]   ;;  %v11087_v27 = vld [vmem:[%s14285_s1 + $0x868] sm:$0xff]  }
  0xc6   :  { %10008 = vmatprep.subr.bf16.mxu1 %v11015_v51  ;;  %v11062_v51 = vld [vmem:[%s14285_s1 + $0x7d8] sm:$0xff]  }
  0xc7   :  { %9987 = vmatpush3.bf16.msra.mxu0 %v11014_v50  ;;  %v11061_v50 = vld [vmem:[%s14285_s1 + $0x718] sm:$0xff]  }
  0xc8   :  { %9988 = vmatprep.subr.bf16.mxu0 %v11017_v53  ;;  %v11064_v53 = vld [vmem:[%s14285_s1 + $0x750] sm:$0xff]  }
  0xc9   :  { %10009 = vmatpush3.bf16.msra.mxu1 %v11016_v52  ;;  %v11063_v52 = vld [vmem:[%s14285_s1 + $0x798] sm:$0xff]  }
  0xca   :  { %10010 = vmatprep.subr.bf16.mxu1 %v11019_v55  ;;  %v11066_v55 = vld [vmem:[%s14285_s1 + $0x7d0] sm:$0xff]  }
  0xcb   :  { %9989 = vmatpush3.bf16.msra.mxu0 %v11018_v54  ;;  %v11065_v54 = vld [vmem:[%s14285_s1 + $0x710] sm:$0xff]  }
  0xcc   :  { %9990 = vmatprep.subr.bf16.mxu0 %v11021_v57  ;;  %v11068_v57 = vld [vmem:[%s14285_s1 + $0x748] sm:$0xff]  }
  0xcd   :  { %10011 = vmatpush3.bf16.msra.mxu1 %v11020_v56  ;;  %v11067_v56 = vld [vmem:[%s14285_s1 + $0x790] sm:$0xff]  }
  0xce   :  { %10012 = vmatprep.subr.bf16.mxu1 %v11023_v59  ;;  %v11070_v59 = vld [vmem:[%s14285_s1 + $0x7c8] sm:$0xff]  }
  0xcf   :  { %9991 = vmatpush3.bf16.msra.mxu0 %v11022_v58  ;;  %v11069_v58 = vld [vmem:[%s14285_s1 + $0x708] sm:$0xff]  }
  0xd0   :  { %9992 = vmatprep.subr.bf16.mxu0 %v11025_v61  ;;  %v11072_v61 = vld [vmem:[%s14285_s1 + $0x740] sm:$0xff]  }
  0xd1   :  { %10013 = vmatpush3.bf16.msra.mxu1 %v11024_v60  ;;  %v11071_v60 = vld [vmem:[%s14285_s1 + $0x788] sm:$0xff]  }
  0xd2   :  { %10014 = vmatprep.subr.bf16.mxu1 %v11027_v63  ;;  %v11074_v63 = vld [vmem:[%s14285_s1 + $0x7c0] sm:$0xff]  }
  0xd3   :  { %9993 = vmatpush3.bf16.msra.mxu0 %v11026_v62  ;;  %v11073_v62 = vld [vmem:[%s14285_s1 + $0x700] sm:$0xff]  }
  0xd4   :  { %9994 = vmatprep.subr.bf16.mxu0 %v11029_v1  ;;  %v11077_v1 = vld [vmem:[%s14285_s1 + $0x780] sm:$0xff]  }
  0xd5   :  { %10015 = vmatpush3.bf16.msra.mxu1 %v11028_v0  ;;  %v11075_v0 = vld [vmem:[%s14284_s0 + $0x38] ss:$196 sps:$4 sm:$0xff]  }
  0xd6   :  { %10016 = vmatprep.subr.bf16.mxu1 %v11031_v3 }
  0xd7   :  { %9995 = vmatpush3.bf16.msra.mxu0 %v11030_v2  ;;  %v1824_v2 = vrot.slane %v11075_v0, %v11782_v40  ;;  %v11116_v0 = vld [vmem:[%s14285_s1 + $0x9f8] sm:$0xff]  }
  0xd8   :  { %9996 = vmatprep.subr.bf16.mxu0 %v11033_v5  ;;  %v11079_v5 = vld [vmem:[%s14284_s0 + $0x3c] ss:$196 sps:$4 sm:$0xff]  }
  0xd9   :  { %10017 = vmatpush3.bf16.msra.mxu1 %v11032_v4  ;;  %v11078_v4 = vld [vmem:[%s14285_s1 + $0x878] sm:$0xff]  }
  0xda   :  { %10018 = vmatprep.subr.bf16.mxu1 %v11035_v7  ;;  %v11080_v7 = vld [vmem:[%s14285_s1 + $0x838] sm:$0xff]  }
  0xdb   :  { %9997 = vmatpush3.bf16.msra.mxu0 %v11034_v6 }
  0xdc   :  { %9998 = vmatprep.subr.bf16.mxu0 %v11037_v9  ;;  %v1831_v9 = vrot.slane %v11079_v5, %v11782_v40 }
  0xdd   :  { %10019 = vmatpush3.bf16.msra.mxu1 %v11036_v8  ;;  %v1832_v8 = vcombine.high %v1824_v2, %v1824_v2 }
  0xde   :  { %10020 = vmatprep.subr.bf16.mxu1 %v11039_v11  ;;  %v11081_v11 = vld [vmem:[%s14285_s1 + $0x8f8] sm:$0xff]   ;;  %v1833_v16 = vcombine.high %v1831_v9, %v1831_v9 }
  0xdf   :  { %9999 = vmatpush3.bf16.msra.mxu0 %v11038_v10 }
  0xe0   :  { %10028 = vmatprep.subr.bf16.mxu0 %v11043_v15 }
  0xe1   :  { %10021 = vmatpush3.bf16.msra.mxu1 %v11042_v13 }
  0xe2   :  { %v9736_v18 = vpop.f32.mrf.mxu0  ;;  %7446 = vmatmul.mubr.bf16.vlgmr.msra.gmra.mxu0 %v1806_v14  ;;  %10050 = vmatprep.subr.bf16.mxu1 %v11046_v23  ;;  %v11082_v14 = vld [vmem:[%s14285_s1 + $0x8b8] sm:$0xff]   ;;  %v11085_v23 = vld [vmem:[%s14285_s1 + $0x8f0] sm:$0xff]  }
  0xe3   :  { %10029 = vmatpush3.bf16.msra.mxu0 %v11045_v19  ;;  %7525 = vmatprep.mubr.bf16.mxu0 %v1832_v8 }
  0xe4   :  { %v9758_v21 = vpop.f32.mrf.mxu1  ;;  %v9737_v24 = vpop.f32.mrf.mxu0  ;;  %10030 = vmatprep.subr.bf16.mxu0 %v11048_v30  ;;  %7486 = vmatmul.mubr.bf16.vlgmr.msra.gmra.mxu1 %v1813_v22  ;;  %v11090_v30 = vld [vmem:[%s14285_s1 + $0x8a8] sm:$0xff]  }
  0xe5   :  { %v9738_v28 = vadd.f32 %v9737_v24, %v9736_v18  ;;  %10051 = vmatpush3.bf16.msra.mxu1 %v11047_v25  ;;  %v11083_v18 = vld [vmem:[%s14285_s1 + $0x870] sm:$0xff]   ;;  %7565 = vmatprep.mubr.bf16.mxu1 %v1833_v16  ;;  %v11124_v16 = vld [vmem:[%s14285_s1 + $0x9e8] sm:$0xff]  }
  0xe6   :  { %v9759_v26 = vpop.f32.mrf.mxu1  ;;  %v9739_v31 = vpop.f32.mrf.mxu0  ;;  %10052 = vmatprep.subr.bf16.mxu1 %v11050_v35  ;;  %v11095_v35 = vld [vmem:[%s14285_s1 + $0x858] sm:$0xff]  }
  0xe7   :  { %v9760_v29 = vadd.f32 %v9759_v26, %v9758_v21  ;;  %v6968_v34 = vadd.f32 %v9738_v28, %v8935_v20  ;;  %10031 = vmatpush3.bf16.msra.mxu0 %v11049_v32  ;;  %v11084_v21 = vld [vmem:[%s14285_s1 + $0x830] sm:$0xff]   ;;  %v11088_v28 = vld [vmem:[%s14285_s1 + $0x828] sm:$0xff]   ;;  %v11091_v31 = vld [vmem:[%s14285_s1 + $0x860] sm:$0xff]  }
  0xe8   :  { %v9761_v33 = vpop.f32.mrf.mxu1  ;;  %v9740_v36 = vpop.f32.mrf.mxu0  ;;  %10032 = vmatprep.subr.bf16.mxu0 %v11052_v41  ;;  %v11086_v26 = vld [vmem:[%s14285_s1 + $0x8b0] sm:$0xff]   ;;  %v11092_v32 = vld [vmem:[%s14285_s1 + $0x820] sm:$0xff]  }
  0xe9   :  { %v12434_v39 = vadd.f32 %v9760_v29, %v6968_v34  ;;  %10053 = vmatpush3.bf16.msra.mxu1 %v11051_v37  ;;  %v11089_v29 = vld [vmem:[%s14285_s1 + $0x8e8] sm:$0xff]   ;;  %v11093_v33 = vld [vmem:[%s14285_s1 + $0x8e0] sm:$0xff]   ;;  %v11096_v36 = vld [vmem:[%s14285_s1 + $0x818] sm:$0xff]  }
  0xea   :  { %v9762_v38 = vpop.f32.mrf.mxu1  ;;  %10054 = vmatprep.subr.bf16.mxu1 %v11054_v43  ;;  %v11094_v34 = vld [vmem:[%s14285_s1 + $0x8a0] sm:$0xff]   ;;  %v11097_v37 = vld [vmem:[%s14285_s1 + $0x8d8] sm:$0xff]   ;;  %v11100_v41 = vld [vmem:[%s14285_s1 + $0x810] sm:$0xff]  }
  0xeb   :  { %10033 = vmatpush3.bf16.msra.mxu0 %v11053_v42  ;;  %v11098_v38 = vld [vmem:[%s14285_s1 + $0x898] sm:$0xff]   ;;  %v11101_v42 = vld [vmem:[%s14285_s1 + $0x8d0] sm:$0xff]  }
  0xec   :  { %10034 = vmatprep.subr.bf16.mxu0 %v11056_v45  ;;  %v11102_v43 = vld [vmem:[%s14285_s1 + $0x890] sm:$0xff]   ;;  %v11104_v45 = vld [vmem:[%s14285_s1 + $0x808] sm:$0xff]  }
  0xed   :  { %10055 = vmatpush3.bf16.msra.mxu1 %v11055_v44  ;;  %v11103_v44 = vld [vmem:[%s14285_s1 + $0x848] sm:$0xff]  }
  0xee   :  { %10056 = vmatprep.subr.bf16.mxu1 %v11058_v47  ;;  %v11106_v47 = vld [vmem:[%s14285_s1 + $0x888] sm:$0xff]  }
  0xef   :  { %10035 = vmatpush3.bf16.msra.mxu0 %v11057_v46  ;;  %v11105_v46 = vld [vmem:[%s14285_s1 + $0x8c8] sm:$0xff]  }
  0xf0   :  { %10036 = vmatprep.subr.bf16.mxu0 %v11060_v49  ;;  %v11108_v49 = vld [vmem:[%s14285_s1 + $0x800] sm:$0xff]  }
  0xf1   :  { %10057 = vmatpush3.bf16.msra.mxu1 %v11059_v48  ;;  %v11107_v48 = vld [vmem:[%s14285_s1 + $0x840] sm:$0xff]  }
  0xf2   :  { %10058 = vmatprep.subr.bf16.mxu1 %v11062_v51  ;;  %v11110_v51 = vld [vmem:[%s14284_s0 + $0x40] ss:$196 sps:$4 sm:$0xff]  }
  0xf3   :  { %10037 = vmatpush3.bf16.msra.mxu0 %v11061_v50  ;;  %v11109_v50 = vld [vmem:[%s14285_s1 + $0x8c0] sm:$0xff]  }
  0xf4   :  { %10038 = vmatprep.subr.bf16.mxu0 %v11064_v53 }
  0xf5   :  { %10059 = vmatpush3.bf16.msra.mxu1 %v11063_v52  ;;  %v11112_v52 = vld [vmem:[%s14285_s1 + $0x880] sm:$0xff]  }
  0xf6   :  { %10060 = vmatprep.subr.bf16.mxu1 %v11066_v55  ;;  %v11113_v55 = vld [vmem:[%s14285_s1 + $0x978] sm:$0xff]  }
  0xf7   :  { %10039 = vmatpush3.bf16.msra.mxu0 %v11065_v54  ;;  %v1842_v54 = vrot.slane %v11110_v51, %v11782_v40 }
  0xf8   :  { %10040 = vmatprep.subr.bf16.mxu0 %v11068_v57  ;;  %v11114_v57 = vld [vmem:[%s14284_s0 + $0x44] ss:$196 sps:$4 sm:$0xff]  }
  0xf9   :  { %10061 = vmatpush3.bf16.msra.mxu1 %v11067_v56 }
  0xfa   :  { %10062 = vmatprep.subr.bf16.mxu1 %v11070_v59  ;;  %v1850_v59 = vcombine.high %v1842_v54, %v1842_v54 }
  0xfb   :  { %10041 = vmatpush3.bf16.msra.mxu0 %v11069_v58 }
  0xfc   :  { %10042 = vmatprep.subr.bf16.mxu0 %v11072_v61 }
  0xfd   :  { %10063 = vmatpush3.bf16.msra.mxu1 %v11071_v60  ;;  %v11115_v60 = vld [vmem:[%s14285_s1 + $0x938] sm:$0xff]  }
  0xfe   :  { %10064 = vmatprep.subr.bf16.mxu1 %v11074_v63  ;;  %v1849_v63 = vrot.slane %v11114_v57, %v11782_v40 }
  0xff   :  { %10043 = vmatpush3.bf16.msra.mxu0 %v11073_v62 }
 0x100   :  { %10072 = vmatprep.subr.bf16.mxu0 %v11078_v4  ;;  %v11117_v4 = vld [vmem:[%s14285_s1 + $0x9b8] sm:$0xff]  }
 0x101   :  { %10065 = vmatpush3.bf16.msra.mxu1 %v11077_v1 }
 0x102   :  { %v9780_v3 = vpop.f32.mrf.mxu0  ;;  %10094 = vmatprep.subr.bf16.mxu1 %v11081_v11  ;;  %7526 = vmatmul.mubr.bf16.vlgmr.msra.gmra.mxu0 %v1824_v2 }
 0x103   :  { %10073 = vmatpush3.bf16.msra.mxu0 %v11080_v7  ;;  %7605 = vmatprep.mubr.bf16.mxu0 %v1850_v59  ;;  %v11118_v7 = vld [vmem:[%s14285_s1 + $0x970] sm:$0xff]  }
 0x104   :  { %v9802_v6 = vpop.f32.mrf.mxu1  ;;  %v9781_v10 = vpop.f32.mrf.mxu0  ;;  %7566 = vmatmul.mubr.bf16.vlgmr.msra.gmra.mxu1 %v1831_v9  ;;  %10074 = vmatprep.subr.bf16.mxu0 %v11083_v18  ;;  %v11126_v18 = vld [vmem:[%s14285_s1 + $0x960] sm:$0xff]  }
 0x105   :  { %v9782_v13 = vadd.f32 %v9781_v10, %v9780_v3  ;;  %10095 = vmatpush3.bf16.msra.mxu1 %v11082_v14  ;;  %v11119_v10 = vld [vmem:[%s14285_s1 + $0x930] sm:$0xff]   ;;  %v11122_v14 = vld [vmem:[%s14285_s1 + $0x968] sm:$0xff]  }
 0x106   :  { %v9803_v12 = vpop.f32.mrf.mxu1  ;;  %v9783_v17 = vpop.f32.mrf.mxu0  ;;  %10096 = vmatprep.subr.bf16.mxu1 %v11085_v23  ;;  %v11131_v23 = vld [vmem:[%s14285_s1 + $0x918] sm:$0xff]  }
 0x107   :  { %v9804_v15 = vadd.f32 %v9803_v12, %v9802_v6  ;;  %v7048_v20 = vadd.f32 %v9782_v13, %v12434_v39  ;;  %10075 = vmatpush3.bf16.msra.mxu0 %v11084_v21  ;;  %v11099_v39 = vld [vmem:[%s14285_s1 + $0x850] sm:$0xff]   ;;  %v1851_v6 = vcombine.high %v1849_v63, %v1849_v63  ;;  %v11125_v17 = vld [vmem:[%s14285_s1 + $0x9a8] sm:$0xff]   ;;  %v11129_v21 = vld [vmem:[%s14285_s1 + $0x9a0] sm:$0xff]  }
 0x108   :  { %v9805_v19 = vpop.f32.mrf.mxu1  ;;  %v9784_v22 = vpop.f32.mrf.mxu0  ;;  %10076 = vmatprep.subr.bf16.mxu0 %v11087_v27  ;;  %v11120_v12 = vld [vmem:[%s14285_s1 + $0x9f0] sm:$0xff]  }
 0x109   :  { %v12538_v25 = vadd.f32 %v9804_v15, %v7048_v20  ;;  %10097 = vmatpush3.bf16.msra.mxu1 %v11086_v26  ;;  %7645 = vmatprep.mubr.bf16.mxu1 %v1851_v6  ;;  %v11121_v13 = vld [vmem:[%s14285_s1 + $0x9b0] sm:$0xff]   ;;  %v11123_v15 = vld [vmem:[%s14285_s1 + $0x928] sm:$0xff]   ;;  %v11127_v19 = vld [vmem:[%s14285_s1 + $0x920] sm:$0xff]  }
 0x10a   :  { %v9806_v24 = vpop.f32.mrf.mxu1  ;;  %10098 = vmatprep.subr.bf16.mxu1 %v11089_v29  ;;  %v11128_v20 = vld [vmem:[%s14285_s1 + $0x9e0] sm:$0xff]   ;;  %v11130_v22 = vld [vmem:[%s14285_s1 + $0x958] sm:$0xff]   ;;  %v11134_v26 = vld [vmem:[%s14285_s1 + $0x950] sm:$0xff]  }
 0x10b   :  { %10077 = vmatpush3.bf16.msra.mxu0 %v11088_v28  ;;  %v11132_v24 = vld [vmem:[%s14285_s1 + $0x9d8] sm:$0xff]   ;;  %v11135_v27 = vld [vmem:[%s14285_s1 + $0x910] sm:$0xff]   ;;  %v11162_v6 = vld [vmem:[%s14285_s1 + $0xa20] sm:$0xff]  }
 0x10c   :  { %10078 = vmatprep.subr.bf16.mxu0 %v11091_v31  ;;  %v11136_v28 = vld [vmem:[%s14285_s1 + $0x9d0] sm:$0xff]   ;;  %v11139_v31 = vld [vmem:[%s14285_s1 + $0x908] sm:$0xff]  }
 0x10d   :  { %10099 = vmatpush3.bf16.msra.mxu1 %v11090_v30  ;;  %v11137_v29 = vld [vmem:[%s14285_s1 + $0x990] sm:$0xff]   ;;  %v11138_v30 = vld [vmem:[%s14285_s1 + $0x948] sm:$0xff]  }
 0x10e   :  { %10100 = vmatprep.subr.bf16.mxu1 %v11093_v33  ;;  %v11141_v33 = vld [vmem:[%s14285_s1 + $0x988] sm:$0xff]  }
 0x10f   :  { %10079 = vmatpush3.bf16.msra.mxu0 %v11092_v32  ;;  %v11140_v32 = vld [vmem:[%s14285_s1 + $0x9c8] sm:$0xff]  }
 0x110   :  { %10080 = vmatprep.subr.bf16.mxu0 %v11095_v35  ;;  %v11143_v35 = vld [vmem:[%s14285_s1 + $0x900] sm:$0xff]  }
 0x111   :  { %10101 = vmatpush3.bf16.msra.mxu1 %v11094_v34  ;;  %v11142_v34 = vld [vmem:[%s14285_s1 + $0x940] sm:$0xff]  }
 0x112   :  { %10102 = vmatprep.subr.bf16.mxu1 %v11097_v37 }
 0x113   :  { %10081 = vmatpush3.bf16.msra.mxu0 %v11096_v36  ;;  %v11144_v36 = vld [vmem:[%s14285_s1 + $0x9c0] sm:$0xff]  }
 0x114   :  { %10082 = vmatprep.subr.bf16.mxu0 %v11099_v39  ;;  %v11147_v39 = vld [vmem:[%s14285_s1 + $0x980] sm:$0xff]  }
 0x115   :  { %10103 = vmatpush3.bf16.msra.mxu1 %v11098_v38  ;;  %v11145_v38 = vld [vmem:[%s14284_s0 + $0x48] ss:$196 sps:$4 sm:$0xff]  }
 0x116   :  { %10104 = vmatprep.subr.bf16.mxu1 %v11101_v42 }
 0x117   :  { %10083 = vmatpush3.bf16.msra.mxu0 %v11100_v41 }
 0x118   :  { %10084 = vmatprep.subr.bf16.mxu0 %v11103_v44  ;;  %v11148_v44 = vld [vmem:[%s14285_s1 + $0xa78] sm:$0xff]  }
 0x119   :  { %10105 = vmatpush3.bf16.msra.mxu1 %v11102_v43  ;;  %v1860_v43 = vrot.slane %v11145_v38, %v11782_v40 }
 0x11a   :  { %10106 = vmatprep.subr.bf16.mxu1 %v11105_v46 }
 0x11b   :  { %10085 = vmatpush3.bf16.msra.mxu0 %v11104_v45  ;;  %v11149_v45 = vld [vmem:[%s14284_s0 + $0x4c] ss:$196 sps:$4 sm:$0xff]  }
 0x11c   :  { %10086 = vmatprep.subr.bf16.mxu0 %v11107_v48  ;;  %v1867_v51 = vrot.slane %v11149_v45, %v11782_v40 }
 0x11d   :  { %10107 = vmatpush3.bf16.msra.mxu1 %v11106_v47  ;;  %v11150_v47 = vld [vmem:[%s14285_s1 + $0xa38] sm:$0xff]  }
 0x11e   :  { %10108 = vmatprep.subr.bf16.mxu1 %v11109_v50  ;;  %v1868_v50 = vcombine.high %v1860_v43, %v1860_v43 }
 0x11f   :  { %10087 = vmatpush3.bf16.msra.mxu0 %v11108_v49 }
 0x120   :  { %10116 = vmatprep.subr.bf16.mxu0 %v11113_v55  ;;  %v11152_v55 = vld [vmem:[%s14285_s1 + $0xab8] sm:$0xff]  }
 0x121   :  { %10109 = vmatpush3.bf16.msra.mxu1 %v11112_v52 }
 0x122   :  { %v9824_v53 = vpop.f32.mrf.mxu0  ;;  %7606 = vmatmul.mubr.bf16.vlgmr.msra.gmra.mxu0 %v1842_v54  ;;  %10138 = vmatprep.subr.bf16.mxu1 %v11116_v0  ;;  %v11156_v0 = vld [vmem:[%s14285_s1 + $0xab0] sm:$0xff]  }
 0x123   :  { %10117 = vmatpush3.bf16.msra.mxu0 %v11115_v60  ;;  %7685 = vmatprep.mubr.bf16.mxu0 %v1868_v50  ;;  %v11153_v60 = vld [vmem:[%s14285_s1 + $0xa70] sm:$0xff]  }
 0x124   :  { %v9846_v56 = vpop.f32.mrf.mxu1  ;;  %v9825_v58 = vpop.f32.mrf.mxu0  ;;  %10118 = vmatprep.subr.bf16.mxu0 %v11118_v7  ;;  %7646 = vmatmul.mubr.bf16.vlgmr.msra.gmra.mxu1 %v1849_v63  ;;  %v11155_v63 = vld [vmem:[%s14285_s1 + $0xaf0] sm:$0xff]   ;;  %v11163_v7 = vld [vmem:[%s14285_s1 + $0xae0] sm:$0xff]  }
 0x125   :  { %v9826_v61 = vadd.f32 %v9825_v58, %v9824_v53  ;;  %10139 = vmatpush3.bf16.msra.mxu1 %v11117_v4  ;;  %v11151_v53 = vld [vmem:[%s14285_s1 + $0xaf8] sm:$0xff]   ;;  %v1869_v58 = vcombine.high %v1867_v51, %v1867_v51  ;;  %v11160_v4 = vld [vmem:[%s14285_s1 + $0xaa8] sm:$0xff]   ;;  %v11190_v50 = vld [vmem:[%s14285_s1 + $0xbf0] sm:$0xff]  }
 0x126   :  { %v9847_v62 = vpop.f32.mrf.mxu1  ;;  %v9827_v1 = vpop.f32.mrf.mxu0  ;;  %10140 = vmatprep.subr.bf16.mxu1 %v11120_v12  ;;  %v11168_v12 = vld [vmem:[%s14285_s1 + $0xa98] sm:$0xff]  }
 0x127   :  { %v9848_v2 = vadd.f32 %v9847_v62, %v9846_v56  ;;  %v7128_v3 = vadd.f32 %v9826_v61, %v12538_v25  ;;  %10119 = vmatpush3.bf16.msra.mxu0 %v11119_v10  ;;  %v11133_v25 = vld [vmem:[%s14285_s1 + $0x998] sm:$0xff]   ;;  %v11154_v61 = vld [vmem:[%s14285_s1 + $0xa30] sm:$0xff]   ;;  %7725 = vmatprep.mubr.bf16.mxu1 %v1869_v58  ;;  %v11157_v1 = vld [vmem:[%s14285_s1 + $0xa68] sm:$0xff]  }
 0x128   :  { %v9849_v5 = vpop.f32.mrf.mxu1  ;;  %v9828_v8 = vpop.f32.mrf.mxu0  ;;  %10120 = vmatprep.subr.bf16.mxu0 %v11122_v14  ;;  %v11166_v10 = vld [vmem:[%s14285_s1 + $0xa18] sm:$0xff]   ;;  %v11170_v14 = vld [vmem:[%s14285_s1 + $0xa10] sm:$0xff]   ;;  %v11198_v58 = vld [vmem:[%s14285_s1 + $0xbe0] sm:$0xff]  }
 0x129   :  { %v12639_v9 = vadd.f32 %v9848_v2, %v7128_v3  ;;  %10141 = vmatpush3.bf16.msra.mxu1 %v11121_v13  ;;  %v11158_v2 = vld [vmem:[%s14285_s1 + $0xa28] sm:$0xff]   ;;  %v11161_v5 = vld [vmem:[%s14285_s1 + $0xa60] sm:$0xff]   ;;  %v11169_v13 = vld [vmem:[%s14285_s1 + $0xa50] sm:$0xff]  }
 0x12a   :  { %v9850_v11 = vpop.f32.mrf.mxu1  ;;  %10142 = vmatprep.subr.bf16.mxu1 %v11124_v16  ;;  %v11159_v3 = vld [vmem:[%s14285_s1 + $0xae8] sm:$0xff]   ;;  %v11164_v8 = vld [vmem:[%s14285_s1 + $0xaa0] sm:$0xff]   ;;  %v11172_v16 = vld [vmem:[%s14285_s1 + $0xa90] sm:$0xff]  }
 0x12b   :  { %10121 = vmatpush3.bf16.msra.mxu0 %v11123_v15  ;;  %v11167_v11 = vld [vmem:[%s14285_s1 + $0xad8] sm:$0xff]   ;;  %v11171_v15 = vld [vmem:[%s14285_s1 + $0xad0] sm:$0xff]  }
 0x12c   :  { %10122 = vmatprep.subr.bf16.mxu0 %v11126_v18  ;;  %v11174_v18 = vld [vmem:[%s14285_s1 + $0xa08] sm:$0xff]  }
 0x12d   :  { %10143 = vmatpush3.bf16.msra.mxu1 %v11125_v17  ;;  %v11173_v17 = vld [vmem:[%s14285_s1 + $0xa48] sm:$0xff]  }
 0x12e   :  { %10144 = vmatprep.subr.bf16.mxu1 %v11128_v20  ;;  %v11176_v20 = vld [vmem:[%s14285_s1 + $0xa88] sm:$0xff]  }
 0x12f   :  { %10123 = vmatpush3.bf16.msra.mxu0 %v11127_v19  ;;  %v11175_v19 = vld [vmem:[%s14285_s1 + $0xac8] sm:$0xff]  }
 0x130   :  { %10124 = vmatprep.subr.bf16.mxu0 %v11130_v22  ;;  %v11178_v22 = vld [vmem:[%s14285_s1 + $0xa00] sm:$0xff]  }
 0x131   :  { %10145 = vmatpush3.bf16.msra.mxu1 %v11129_v21  ;;  %v11177_v21 = vld [vmem:[%s14285_s1 + $0xa40] sm:$0xff]  }
 0x132   :  { %10146 = vmatprep.subr.bf16.mxu1 %v11132_v24 }
 0x133   :  { %10125 = vmatpush3.bf16.msra.mxu0 %v11131_v23  ;;  %v11179_v23 = vld [vmem:[%s14285_s1 + $0xac0] sm:$0xff]  }
 0x134   :  { %10126 = vmatprep.subr.bf16.mxu0 %v11134_v26  ;;  %v11182_v26 = vld [vmem:[%s14285_s1 + $0xa80] sm:$0xff]  }
 0x135   :  { %10147 = vmatpush3.bf16.msra.mxu1 %v11133_v25  ;;  %v11180_v25 = vld [vmem:[%s14284_s0 + $0x50] ss:$196 sps:$4 sm:$0xff]  }
 0x136   :  { %10148 = vmatprep.subr.bf16.mxu1 %v11136_v28 }
 0x137   :  { %10127 = vmatpush3.bf16.msra.mxu0 %v11135_v27 }
 0x138   :  { %10128 = vmatprep.subr.bf16.mxu0 %v11138_v30  ;;  %v11183_v30 = vld [vmem:[%s14285_s1 + $0xb78] sm:$0xff]  }
 0x139   :  { %10149 = vmatpush3.bf16.msra.mxu1 %v11137_v29  ;;  %v1878_v29 = vrot.slane %v11180_v25, %v11782_v40 }
 0x13a   :  { %10150 = vmatprep.subr.bf16.mxu1 %v11140_v32 }
 0x13b   :  { %10129 = vmatpush3.bf16.msra.mxu0 %v11139_v31  ;;  %v11184_v31 = vld [vmem:[%s14284_s0 + $0x54] ss:$196 sps:$4 sm:$0xff]  }
 0x13c   :  { %10130 = vmatprep.subr.bf16.mxu0 %v11142_v34 }
 0x13d   :  { %10151 = vmatpush3.bf16.msra.mxu1 %v11141_v33  ;;  %v11185_v33 = vld [vmem:[%s14285_s1 + $0xb38] sm:$0xff]  }
 0x13e   :  { %10152 = vmatprep.subr.bf16.mxu1 %v11144_v36  ;;  %v1886_v36 = vcombine.high %v1878_v29, %v1878_v29 }
 0x13f   :  { %10131 = vmatpush3.bf16.msra.mxu0 %v11143_v35 }
 0x140   :  { %10160 = vmatprep.subr.bf16.mxu0 %v11148_v44 }
 0x141   :  { %10153 = vmatpush3.bf16.msra.mxu1 %v11147_v39  ;;  %v11186_v39 = vld [vmem:[%s14285_s1 + $0xbf8] sm:$0xff]  }
 0x142   :  { %v9868_v37 = vpop.f32.mrf.mxu0  ;;  %10182 = vmatprep.subr.bf16.mxu1 %v11151_v53  ;;  %7686 = vmatmul.mubr.bf16.vlgmr.msra.gmra.mxu0 %v1860_v43  ;;  %v11193_v53 = vld [vmem:[%s14285_s1 + $0xb28] sm:$0xff]  }
 0x143   :  { %10161 = vmatpush3.bf16.msra.mxu0 %v11150_v47  ;;  %7765 = vmatprep.mubr.bf16.mxu0 %v1886_v36  ;;  %v11188_v47 = vld [vmem:[%s14285_s1 + $0xb70] sm:$0xff]  }
 0x144   :  { %v9869_v41 = vpop.f32.mrf.mxu0  ;;  %v9890_v42 = vpop.f32.mrf.mxu1  ;;  %7726 = vmatmul.mubr.bf16.vlgmr.msra.gmra.mxu1 %v1867_v51  ;;  %10162 = vmatprep.subr.bf16.mxu0 %v11153_v60  ;;  %v11191_v51 = vld [vmem:[%s14285_s1 + $0xbb0] sm:$0xff]   ;;  %v11200_v60 = vld [vmem:[%s14285_s1 + $0xb58] sm:$0xff]  }
 0x145   :  { %v9870_v46 = vadd.f32 %v9869_v41, %v9868_v37  ;;  %10183 = vmatpush3.bf16.msra.mxu1 %v11152_v55  ;;  %v1885_v37 = vrot.slane %v11184_v31, %v11782_v40  ;;  %v11195_v55 = vld [vmem:[%s14285_s1 + $0xba8] sm:$0xff]   ;;  %v11225_v36 = vld [vmem:[%s14285_s1 + $0xcf0] sm:$0xff]  }
 0x146   :  { %v9871_v48 = vpop.f32.mrf.mxu0  ;;  %v9891_v49 = vpop.f32.mrf.mxu1  ;;  %10184 = vmatprep.subr.bf16.mxu1 %v11155_v63  ;;  %v11203_v63 = vld [vmem:[%s14285_s1 + $0xb98] sm:$0xff]  }
 0x147   :  { %v7208_v52 = vadd.f32 %v9870_v46, %v12639_v9  ;;  %v9892_v54 = vadd.f32 %v9891_v49, %v9890_v42  ;;  %10163 = vmatpush3.bf16.msra.mxu0 %v11154_v61  ;;  %v11165_v9 = vld [vmem:[%s14285_s1 + $0xa58] sm:$0xff]   ;;  %v1887_v45 = vcombine.high %v1885_v37, %v1885_v37  ;;  %v11189_v48 = vld [vmem:[%s14285_s1 + $0xb30] sm:$0xff]  }
 0x148   :  { %v9872_v56 = vpop.f32.mrf.mxu0  ;;  %v9893_v57 = vpop.f32.mrf.mxu1  ;;  %10164 = vmatprep.subr.bf16.mxu0 %v11157_v1  ;;  %v11187_v42 = vld [vmem:[%s14285_s1 + $0xbb8] sm:$0xff]   ;;  %v11205_v1 = vld [vmem:[%s14285_s1 + $0xb10] sm:$0xff]  }
 0x149   :  { %v12743_v59 = vadd.f32 %v9892_v54, %v7208_v52  ;;  %10185 = vmatpush3.bf16.msra.mxu1 %v11156_v0  ;;  %7805 = vmatprep.mubr.bf16.mxu1 %v1887_v45  ;;  %v11192_v52 = vld [vmem:[%s14285_s1 + $0xb68] sm:$0xff]   ;;  %v11196_v56 = vld [vmem:[%s14285_s1 + $0xb60] sm:$0xff]   ;;  %v11201_v61 = vld [vmem:[%s14285_s1 + $0xb18] sm:$0xff]  }
 0x14a   :  { %v9894_v62 = vpop.f32.mrf.mxu1  ;;  %10186 = vmatprep.subr.bf16.mxu1 %v11159_v3  ;;  %v11194_v54 = vld [vmem:[%s14285_s1 + $0xbe8] sm:$0xff]   ;;  %v11197_v57 = vld [vmem:[%s14285_s1 + $0xb20] sm:$0xff]   ;;  %v11204_v0 = vld [vmem:[%s14285_s1 + $0xb50] sm:$0xff]  }
 0x14b   :  { %10165 = vmatpush3.bf16.msra.mxu0 %v11158_v2  ;;  %v11202_v62 = vld [vmem:[%s14285_s1 + $0xbd8] sm:$0xff]   ;;  %v11206_v2 = vld [vmem:[%s14285_s1 + $0xbd0] sm:$0xff]   ;;  %v11233_v45 = vld [vmem:[%s14285_s1 + $0xce0] sm:$0xff]  }
 0x14c   :  { %10166 = vmatprep.subr.bf16.mxu0 %v11161_v5  ;;  %v11207_v3 = vld [vmem:[%s14285_s1 + $0xb90] sm:$0xff]   ;;  %v11209_v5 = vld [vmem:[%s14285_s1 + $0xb08] sm:$0xff]  }
 0x14d   :  { %10187 = vmatpush3.bf16.msra.mxu1 %v11160_v4  ;;  %v11208_v4 = vld [vmem:[%s14285_s1 + $0xb48] sm:$0xff]  }
 0x14e   :  { %10188 = vmatprep.subr.bf16.mxu1 %v11163_v7  ;;  %v11211_v7 = vld [vmem:[%s14285_s1 + $0xb88] sm:$0xff]  }
 0x14f   :  { %10167 = vmatpush3.bf16.msra.mxu0 %v11162_v6  ;;  %v11210_v6 = vld [vmem:[%s14285_s1 + $0xbc8] sm:$0xff]  }
 0x150   :  { %10168 = vmatprep.subr.bf16.mxu0 %v11165_v9  ;;  %v11213_v9 = vld [vmem:[%s14285_s1 + $0xb00] sm:$0xff]  }
 0x151   :  { %10189 = vmatpush3.bf16.msra.mxu1 %v11164_v8  ;;  %v11212_v8 = vld [vmem:[%s14285_s1 + $0xb40] sm:$0xff]  }
 0x152   :  { %10190 = vmatprep.subr.bf16.mxu1 %v11167_v11 }
 0x153   :  { %10169 = vmatpush3.bf16.msra.mxu0 %v11166_v10  ;;  %v11214_v10 = vld [vmem:[%s14285_s1 + $0xbc0] sm:$0xff]  }
 0x154   :  { %10170 = vmatprep.subr.bf16.mxu0 %v11169_v13  ;;  %v11217_v13 = vld [vmem:[%s14285_s1 + $0xb80] sm:$0xff]  }
 0x155   :  { %10191 = vmatpush3.bf16.msra.mxu1 %v11168_v12  ;;  %v11215_v12 = vld [vmem:[%s14284_s0 + $0x58] ss:$196 sps:$4 sm:$0xff]  }
 0x156   :  { %10192 = vmatprep.subr.bf16.mxu1 %v11171_v15 }
 0x157   :  { %10171 = vmatpush3.bf16.msra.mxu0 %v11170_v14 }
 0x158   :  { %10172 = vmatprep.subr.bf16.mxu0 %v11173_v17  ;;  %v11218_v17 = vld [vmem:[%s14285_s1 + $0xc78] sm:$0xff]  }
 0x159   :  { %10193 = vmatpush3.bf16.msra.mxu1 %v11172_v16  ;;  %v1896_v16 = vrot.slane %v11215_v12, %v11782_v40 }
 0x15a   :  { %10194 = vmatprep.subr.bf16.mxu1 %v11175_v19  ;;  %v11219_v19 = vld [vmem:[%s14284_s0 + $0x5c] ss:$196 sps:$4 sm:$0xff]  }
 0x15b   :  { %10173 = vmatpush3.bf16.msra.mxu0 %v11174_v18 }
 0x15c   :  { %10174 = vmatprep.subr.bf16.mxu0 %v11177_v21 }
 0x15d   :  { %10195 = vmatpush3.bf16.msra.mxu1 %v11176_v20 }
 0x15e   :  { %10196 = vmatprep.subr.bf16.mxu1 %v11179_v23  ;;  %v11220_v23 = vld [vmem:[%s14285_s1 + $0xc38] sm:$0xff]  }
 0x15f   :  { %10175 = vmatpush3.bf16.msra.mxu0 %v11178_v22  ;;  %v1904_v22 = vcombine.high %v1896_v16, %v1896_v16 }
 0x160   :  { %10204 = vmatprep.subr.bf16.mxu0 %v11183_v30  ;;  %v11222_v30 = vld [vmem:[%s14285_s1 + $0xcb8] sm:$0xff]  }
 0x161   :  { %10197 = vmatpush3.bf16.msra.mxu1 %v11182_v26  ;;  %v1903_v26 = vrot.slane %v11219_v19, %v11782_v40 }
 0x162   :  { %v9912_v24 = vpop.f32.mrf.mxu0  ;;  %10226 = vmatprep.subr.bf16.mxu1 %v11186_v39  ;;  %7766 = vmatmul.mubr.bf16.vlgmr.msra.gmra.mxu0 %v1878_v29  ;;  %v11228_v39 = vld [vmem:[%s14285_s1 + $0xc28] sm:$0xff]  }
 0x163   :  { %10205 = vmatpush3.bf16.msra.mxu0 %v11185_v33  ;;  %7845 = vmatprep.mubr.bf16.mxu0 %v1904_v22  ;;  %v11223_v33 = vld [vmem:[%s14285_s1 + $0xc70] sm:$0xff]  }
 0x164   :  { %v9913_v27 = vpop.f32.mrf.mxu0  ;;  %v9934_v28 = vpop.f32.mrf.mxu1  ;;  %7806 = vmatmul.mubr.bf16.vlgmr.msra.gmra.mxu1 %v1885_v37  ;;  %10206 = vmatprep.subr.bf16.mxu0 %v11188_v47  ;;  %v11226_v37 = vld [vmem:[%s14285_s1 + $0xcb0] sm:$0xff]   ;;  %v11235_v47 = vld [vmem:[%s14285_s1 + $0xc58] sm:$0xff]  }
 0x165   :  { %v9914_v32 = vadd.f32 %v9913_v27, %v9912_v24  ;;  %10227 = vmatpush3.bf16.msra.mxu1 %v11187_v42  ;;  %v11221_v27 = vld [vmem:[%s14285_s1 + $0xcf8] sm:$0xff]   ;;  %v11230_v42 = vld [vmem:[%s14285_s1 + $0xca8] sm:$0xff]  }
 0x166   :  { %v9915_v34 = vpop.f32.mrf.mxu0  ;;  %v9935_v35 = vpop.f32.mrf.mxu1  ;;  %10228 = vmatprep.subr.bf16.mxu1 %v11190_v50  ;;  %v11238_v50 = vld [vmem:[%s14285_s1 + $0xc98] sm:$0xff]  }
 0x167   :  { %v7288_v38 = vadd.f32 %v9914_v32, %v12743_v59  ;;  %v9936_v41 = vadd.f32 %v9935_v35, %v9934_v28  ;;  %10207 = vmatpush3.bf16.msra.mxu0 %v11189_v48  ;;  %v11199_v59 = vld [vmem:[%s14285_s1 + $0xba0] sm:$0xff]   ;;  %v1905_v32 = vcombine.high %v1903_v26, %v1903_v26  ;;  %v11224_v35 = vld [vmem:[%s14285_s1 + $0xc30] sm:$0xff]   ;;  %v11236_v48 = vld [vmem:[%s14285_s1 + $0xc18] sm:$0xff]  }
 0x168   :  { %v9916_v43 = vpop.f32.mrf.mxu0  ;;  %v9937_v44 = vpop.f32.mrf.mxu1  ;;  %10208 = vmatprep.subr.bf16.mxu0 %v11192_v52  ;;  %v11240_v52 = vld [vmem:[%s14285_s1 + $0xc10] sm:$0xff]  }
 0x169   :  { %v12850_v46 = vadd.f32 %v9936_v41, %v7288_v38  ;;  %10229 = vmatpush3.bf16.msra.mxu1 %v11191_v51  ;;  %7885 = vmatprep.mubr.bf16.mxu1 %v1905_v32  ;;  %v11227_v38 = vld [vmem:[%s14285_s1 + $0xc68] sm:$0xff]   ;;  %v11231_v43 = vld [vmem:[%s14285_s1 + $0xc60] sm:$0xff]   ;;  %v11239_v51 = vld [vmem:[%s14285_s1 + $0xc50] sm:$0xff]  }
 0x16a   :  { %v9938_v49 = vpop.f32.mrf.mxu1  ;;  %10230 = vmatprep.subr.bf16.mxu1 %v11194_v54  ;;  %v11229_v41 = vld [vmem:[%s14285_s1 + $0xce8] sm:$0xff]   ;;  %v11232_v44 = vld [vmem:[%s14285_s1 + $0xc20] sm:$0xff]   ;;  %v11242_v54 = vld [vmem:[%s14285_s1 + $0xc90] sm:$0xff]  }
 0x16b   :  { %10209 = vmatpush3.bf16.msra.mxu0 %v11193_v53  ;;  %v11237_v49 = vld [vmem:[%s14285_s1 + $0xcd8] sm:$0xff]   ;;  %v11241_v53 = vld [vmem:[%s14285_s1 + $0xcd0] sm:$0xff]   ;;  %v11269_v32 = vld [vmem:[%s14285_s1 + $0xda0] sm:$0xff]  }
 0x16c   :  { %10210 = vmatprep.subr.bf16.mxu0 %v11196_v56  ;;  %v11244_v56 = vld [vmem:[%s14285_s1 + $0xc08] sm:$0xff]  }
 0x16d   :  { %10231 = vmatpush3.bf16.msra.mxu1 %v11195_v55  ;;  %v11243_v55 = vld [vmem:[%s14285_s1 + $0xc48] sm:$0xff]  }
 0x16e   :  { %10232 = vmatprep.subr.bf16.mxu1 %v11198_v58  ;;  %v11246_v58 = vld [vmem:[%s14285_s1 + $0xc88] sm:$0xff]  }
 0x16f   :  { %10211 = vmatpush3.bf16.msra.mxu0 %v11197_v57  ;;  %v11245_v57 = vld [vmem:[%s14285_s1 + $0xcc8] sm:$0xff]  }
 0x170   :  { %10212 = vmatprep.subr.bf16.mxu0 %v11200_v60  ;;  %v11248_v60 = vld [vmem:[%s14285_s1 + $0xc00] sm:$0xff]  }
 0x171   :  { %10233 = vmatpush3.bf16.msra.mxu1 %v11199_v59  ;;  %v11247_v59 = vld [vmem:[%s14285_s1 + $0xc40] sm:$0xff]  }
 0x172   :  { %10234 = vmatprep.subr.bf16.mxu1 %v11202_v62  ;;  %v11249_v62 = vld [vmem:[%s14285_s1 + $0xcc0] sm:$0xff]  }
 0x173   :  { %10213 = vmatpush3.bf16.msra.mxu0 %v11201_v61 }
 0x174   :  { %10214 = vmatprep.subr.bf16.mxu0 %v11204_v0 }
 0x175   :  { %10235 = vmatpush3.bf16.msra.mxu1 %v11203_v63  ;;  %v11250_v63 = vld [vmem:[%s14284_s0 + $0x60] ss:$196 sps:$4 sm:$0xff]  }
 0x176   :  { %10236 = vmatprep.subr.bf16.mxu1 %v11206_v2 }
 0x177   :  { %10215 = vmatpush3.bf16.msra.mxu0 %v11205_v1  ;;  %v11252_v1 = vld [vmem:[%s14285_s1 + $0xc80] sm:$0xff]  }
 0x178   :  { %10216 = vmatprep.subr.bf16.mxu0 %v11208_v4  ;;  %v1914_v4 = vrot.slane %v11250_v63, %v11782_v40 }
 0x179   :  { %10237 = vmatpush3.bf16.msra.mxu1 %v11207_v3 }
 0x17a   :  { %10238 = vmatprep.subr.bf16.mxu1 %v11210_v6  ;;  %v11254_v6 = vld [vmem:[%s14284_s0 + $0x64] ss:$196 sps:$4 sm:$0xff]  }
 0x17b   :  { %10217 = vmatpush3.bf16.msra.mxu0 %v11209_v5  ;;  %v11253_v5 = vld [vmem:[%s14285_s1 + $0xd78] sm:$0xff]   ;;  %v1921_v12 = vrot.slane %v11254_v6, %v11782_v40 }
 0x17c   :  { %10218 = vmatprep.subr.bf16.mxu0 %v11212_v8  ;;  %v11255_v8 = vld [vmem:[%s14285_s1 + $0xd38] sm:$0xff]  }
 0x17d   :  { %10239 = vmatpush3.bf16.msra.mxu1 %v11211_v7 }
 0x17e   :  { %10240 = vmatprep.subr.bf16.mxu1 %v11214_v10 }
 0x17f   :  { %10219 = vmatpush3.bf16.msra.mxu0 %v11213_v9 }
 0x180   :  { %10248 = vmatprep.subr.bf16.mxu0 %v11218_v17 }
 0x181   :  { %10241 = vmatpush3.bf16.msra.mxu1 %v11217_v13  ;;  %v11256_v13 = vld [vmem:[%s14285_s1 + $0xdf8] sm:$0xff]  }
 0x182   :  { %v9956_v11 = vpop.f32.mrf.mxu0  ;;  %7846 = vmatmul.mubr.bf16.vlgmr.msra.gmra.mxu0 %v1896_v16  ;;  %10270 = vmatprep.subr.bf16.mxu1 %v11221_v27  ;;  %v11257_v16 = vld [vmem:[%s14285_s1 + $0xdb8] sm:$0xff]   ;;  %v11264_v27 = vld [vmem:[%s14285_s1 + $0xde8] sm:$0xff]  }
 0x183   :  { %10249 = vmatpush3.bf16.msra.mxu0 %v11220_v23  ;;  %v11260_v23 = vld [vmem:[%s14285_s1 + $0xdf0] sm:$0xff]  }
 0x184   :  { %v9957_v14 = vpop.f32.mrf.mxu0  ;;  %v9978_v15 = vpop.f32.mrf.mxu1  ;;  %10250 = vmatprep.subr.bf16.mxu0 %v11223_v33  ;;  %7886 = vmatmul.mubr.bf16.vlgmr.msra.gmra.mxu1 %v1903_v26  ;;  %v11263_v26 = vld [vmem:[%s14285_s1 + $0xd28] sm:$0xff]   ;;  %v11270_v33 = vld [vmem:[%s14285_s1 + $0xd58] sm:$0xff]  }
 0x185   :  { %v9958_v18 = vadd.f32 %v9957_v14, %v9956_v11  ;;  %10271 = vmatpush3.bf16.msra.mxu1 %v11222_v30  ;;  %v1922_v11 = vcombine.high %v1914_v4, %v1914_v4  ;;  %v11267_v30 = vld [vmem:[%s14285_s1 + $0xd20] sm:$0xff]  }
 0x186   :  { %v9959_v20 = vpop.f32.mrf.mxu0  ;;  %v9979_v21 = vpop.f32.mrf.mxu1  ;;  %10272 = vmatprep.subr.bf16.mxu1 %v11225_v36  ;;  %v11273_v36 = vld [vmem:[%s14285_s1 + $0xd98] sm:$0xff]  }
 0x187   :  { %v7368_v24 = vadd.f32 %v9958_v18, %v12850_v46  ;;  %v9980_v25 = vadd.f32 %v9979_v21, %v9978_v15  ;;  %10251 = vmatpush3.bf16.msra.mxu0 %v11224_v35  ;;  %v11234_v46 = vld [vmem:[%s14285_s1 + $0xca0] sm:$0xff]   ;;  %7925 = vmatprep.mubr.bf16.mxu0 %v1922_v11  ;;  %v1923_v18 = vcombine.high %v1921_v12, %v1921_v12  ;;  %v11258_v20 = vld [vmem:[%s14285_s1 + $0xd70] sm:$0xff]   ;;  %v11272_v35 = vld [vmem:[%s14285_s1 + $0xdd8] sm:$0xff]  }
 0x188   :  { %v9960_v28 = vpop.f32.mrf.mxu0  ;;  %v9981_v29 = vpop.f32.mrf.mxu1  ;;  %10252 = vmatprep.subr.bf16.mxu0 %v11227_v38  ;;  %v11259_v21 = vld [vmem:[%s14285_s1 + $0xd30] sm:$0xff]  }
 0x189   :  { %v12957_v31 = vadd.f32 %v9980_v25, %v7368_v24  ;;  %10273 = vmatpush3.bf16.msra.mxu1 %v11226_v37  ;;  %7965 = vmatprep.mubr.bf16.mxu1 %v1923_v18  ;;  %v11261_v24 = vld [vmem:[%s14285_s1 + $0xdb0] sm:$0xff]   ;;  %v11262_v25 = vld [vmem:[%s14285_s1 + $0xd68] sm:$0xff]   ;;  %v11266_v29 = vld [vmem:[%s14285_s1 + $0xd60] sm:$0xff]  }
 0x18a   :  { %v9982_v34 = vpop.f32.mrf.mxu1  ;;  %10274 = vmatprep.subr.bf16.mxu1 %v11229_v41  ;;  %v11265_v28 = vld [vmem:[%s14285_s1 + $0xda8] sm:$0xff]   ;;  %v11274_v37 = vld [vmem:[%s14285_s1 + $0xd50] sm:$0xff]   ;;  %v11303_v18 = vld [vmem:[%s14285_s1 + $0xee0] sm:$0xff]  }
 0x18b   :  { %10253 = vmatpush3.bf16.msra.mxu0 %v11228_v39  ;;  %v11271_v34 = vld [vmem:[%s14285_s1 + $0xd18] sm:$0xff]   ;;  %v11275_v38 = vld [vmem:[%s14285_s1 + $0xd10] sm:$0xff]  }
 0x18c   :  { %10254 = vmatprep.subr.bf16.mxu0 %v11231_v43  ;;  %v11276_v39 = vld [vmem:[%s14285_s1 + $0xdd0] sm:$0xff]   ;;  %v11279_v43 = vld [vmem:[%s14285_s1 + $0xd08] sm:$0xff]  }
 0x18d   :  { %10275 = vmatpush3.bf16.msra.mxu1 %v11230_v42  ;;  %v11277_v41 = vld [vmem:[%s14285_s1 + $0xd90] sm:$0xff]   ;;  %v11278_v42 = vld [vmem:[%s14285_s1 + $0xd48] sm:$0xff]  }
 0x18e   :  { %10276 = vmatprep.subr.bf16.mxu1 %v11233_v45  ;;  %v11281_v45 = vld [vmem:[%s14285_s1 + $0xd88] sm:$0xff]   ;;  %v11296_v11 = vld [vmem:[%s14285_s1 + $0xeb0] sm:$0xff]  }
 0x18f   :  { %10255 = vmatpush3.bf16.msra.mxu0 %v11232_v44  ;;  %v11280_v44 = vld [vmem:[%s14285_s1 + $0xdc8] sm:$0xff]  }
 0x190   :  { %10256 = vmatprep.subr.bf16.mxu0 %v11235_v47  ;;  %v11283_v47 = vld [vmem:[%s14285_s1 + $0xd00] sm:$0xff]  }
 0x191   :  { %10277 = vmatpush3.bf16.msra.mxu1 %v11234_v46  ;;  %v11282_v46 = vld [vmem:[%s14285_s1 + $0xd40] sm:$0xff]  }
 0x192   :  { %10278 = vmatprep.subr.bf16.mxu1 %v11237_v49 }
 0x193   :  { %10257 = vmatpush3.bf16.msra.mxu0 %v11236_v48  ;;  %v11284_v48 = vld [vmem:[%s14285_s1 + $0xdc0] sm:$0xff]  }
 0x194   :  { %10258 = vmatprep.subr.bf16.mxu0 %v11239_v51  ;;  %v11287_v51 = vld [vmem:[%s14285_s1 + $0xd80] sm:$0xff]  }
 0x195   :  { %10279 = vmatpush3.bf16.msra.mxu1 %v11238_v50  ;;  %v11285_v50 = vld [vmem:[%s14284_s0 + $0x68] ss:$196 sps:$4 sm:$0xff]  }
 0x196   :  { %10280 = vmatprep.subr.bf16.mxu1 %v11241_v53 }
 0x197   :  { %10259 = vmatpush3.bf16.msra.mxu0 %v11240_v52 }
 0x198   :  { %10260 = vmatprep.subr.bf16.mxu0 %v11243_v55  ;;  %v11288_v55 = vld [vmem:[%s14285_s1 + $0xe78] sm:$0xff]  }
 0x199   :  { %10281 = vmatpush3.bf16.msra.mxu1 %v11242_v54  ;;  %v1932_v54 = vrot.slane %v11285_v50, %v11782_v40 }
 0x19a   :  { %10282 = vmatprep.subr.bf16.mxu1 %v11245_v57 }
 0x19b   :  { %10261 = vmatpush3.bf16.msra.mxu0 %v11244_v56  ;;  %v11289_v56 = vld [vmem:[%s14284_s0 + $0x6c] ss:$196 sps:$4 sm:$0xff]  }
 0x19c   :  { %10262 = vmatprep.subr.bf16.mxu0 %v11247_v59 }
 0x19d   :  { %10283 = vmatpush3.bf16.msra.mxu1 %v11246_v58  ;;  %v11290_v58 = vld [vmem:[%s14285_s1 + $0xe38] sm:$0xff]  }
 0x19e   :  { %10284 = vmatprep.subr.bf16.mxu1 %v11249_v62  ;;  %v1939_v62 = vrot.slane %v11289_v56, %v11782_v40 }
 0x19f   :  { %10263 = vmatpush3.bf16.msra.mxu0 %v11248_v60 }
 0x1a0   :  { %10292 = vmatprep.subr.bf16.mxu0 %v11253_v5  ;;  %v1941_v5 = vcombine.high %v1939_v62, %v1939_v62 }
 0x1a1   :  { %10285 = vmatpush3.bf16.msra.mxu1 %v11252_v1 }
 0x1a2   :  { %v10000_v61 = vpop.f32.mrf.mxu0  ;;  %10314 = vmatprep.subr.bf16.mxu1 %v11256_v13  ;;  %7926 = vmatmul.mubr.bf16.vlgmr.msra.gmra.mxu0 %v1914_v4  ;;  %v11298_v13 = vld [vmem:[%s14285_s1 + $0xe28] sm:$0xff]  }
 0x1a3   :  { %10293 = vmatpush3.bf16.msra.mxu0 %v11255_v8  ;;  %v11294_v8 = vld [vmem:[%s14285_s1 + $0xe30] sm:$0xff]  }
 0x1a4   :  { %v10001_v0 = vpop.f32.mrf.mxu0  ;;  %v10022_v3 = vpop.f32.mrf.mxu1  ;;  %7966 = vmatmul.mubr.bf16.vlgmr.msra.gmra.mxu1 %v1921_v12  ;;  %10294 = vmatprep.subr.bf16.mxu0 %v11258_v20  ;;  %v11297_v12 = vld [vmem:[%s14285_s1 + $0xe68] sm:$0xff]   ;;  %v11305_v20 = vld [vmem:[%s14285_s1 + $0xe58] sm:$0xff]  }
 0x1a5   :  { %v10002_v2 = vadd.f32 %v10001_v0, %v10000_v61  ;;  %10315 = vmatpush3.bf16.msra.mxu1 %v11257_v16  ;;  %v1940_v61 = vcombine.high %v1932_v54, %v1932_v54  ;;  %v11291_v0 = vld [vmem:[%s14285_s1 + $0xef8] sm:$0xff]   ;;  %8045 = vmatprep.mubr.bf16.mxu1 %v1941_v5  ;;  %v11301_v16 = vld [vmem:[%s14285_s1 + $0xe60] sm:$0xff]  }
 0x1a6   :  { %v10003_v7 = vpop.f32.mrf.mxu0  ;;  %v10023_v10 = vpop.f32.mrf.mxu1  ;;  %10316 = vmatprep.subr.bf16.mxu1 %v11260_v23  ;;  %v11308_v23 = vld [vmem:[%s14285_s1 + $0xe98] sm:$0xff]   ;;  %v11338_v5 = vld [vmem:[%s14285_s1 + $0xfe0] sm:$0xff]  }
 0x1a7   :  { %v7448_v9 = vadd.f32 %v10002_v2, %v12957_v31  ;;  %v10024_v14 = vadd.f32 %v10023_v10, %v10022_v3  ;;  %10295 = vmatpush3.bf16.msra.mxu0 %v11259_v21  ;;  %v11268_v31 = vld [vmem:[%s14285_s1 + $0xde0] sm:$0xff]   ;;  %v11292_v2 = vld [vmem:[%s14285_s1 + $0xeb8] sm:$0xff]   ;;  %8005 = vmatprep.mubr.bf16.mxu0 %v1940_v61  ;;  %v11293_v7 = vld [vmem:[%s14285_s1 + $0xe70] sm:$0xff]  }
 0x1a8   :  { %v10004_v15 = vpop.f32.mrf.mxu0  ;;  %v10025_v17 = vpop.f32.mrf.mxu1  ;;  %10296 = vmatprep.subr.bf16.mxu0 %v11262_v25  ;;  %v11295_v10 = vld [vmem:[%s14285_s1 + $0xef0] sm:$0xff]   ;;  %v11306_v21 = vld [vmem:[%s14285_s1 + $0xe18] sm:$0xff]  }
 0x1a9   :  { %v13064_v19 = vadd.f32 %v10024_v14, %v7448_v9  ;;  %10317 = vmatpush3.bf16.msra.mxu1 %v11261_v24  ;;  %v11299_v14 = vld [vmem:[%s14285_s1 + $0xee8] sm:$0xff]   ;;  %v11302_v17 = vld [vmem:[%s14285_s1 + $0xe20] sm:$0xff]   ;;  %v11309_v24 = vld [vmem:[%s14285_s1 + $0xe50] sm:$0xff]  }
 0x1aa   :  { %v10026_v22 = vpop.f32.mrf.mxu1  ;;  %10318 = vmatprep.subr.bf16.mxu1 %v11264_v27  ;;  %v11300_v15 = vld [vmem:[%s14285_s1 + $0xea8] sm:$0xff]   ;;  %v11310_v25 = vld [vmem:[%s14285_s1 + $0xe10] sm:$0xff]  }
 0x1ab   :  { %10297 = vmatpush3.bf16.msra.mxu0 %v11263_v26  ;;  %v11307_v22 = vld [vmem:[%s14285_s1 + $0xed8] sm:$0xff]   ;;  %v11311_v26 = vld [vmem:[%s14285_s1 + $0xed0] sm:$0xff]  }
 0x1ac   :  { %10298 = vmatprep.subr.bf16.mxu0 %v11266_v29  ;;  %v11312_v27 = vld [vmem:[%s14285_s1 + $0xe90] sm:$0xff]   ;;  %v11314_v29 = vld [vmem:[%s14285_s1 + $0xe08] sm:$0xff]  }
 0x1ad   :  { %10319 = vmatpush3.bf16.msra.mxu1 %v11265_v28  ;;  %v11313_v28 = vld [vmem:[%s14285_s1 + $0xe48] sm:$0xff]   ;;  %v11330_v61 = vld [vmem:[%s14285_s1 + $0xff0] sm:$0xff]  }
 0x1ae   :  { %10320 = vmatprep.subr.bf16.mxu1 %v11268_v31  ;;  %v11316_v31 = vld [vmem:[%s14285_s1 + $0xe88] sm:$0xff]  }
 0x1af   :  { %10299 = vmatpush3.bf16.msra.mxu0 %v11267_v30  ;;  %v11315_v30 = vld [vmem:[%s14285_s1 + $0xec8] sm:$0xff]  }
 0x1b0   :  { %10300 = vmatprep.subr.bf16.mxu0 %v11270_v33  ;;  %v11318_v33 = vld [vmem:[%s14285_s1 + $0xe00] sm:$0xff]  }
 0x1b1   :  { %10321 = vmatpush3.bf16.msra.mxu1 %v11269_v32  ;;  %v11317_v32 = vld [vmem:[%s14285_s1 + $0xe40] sm:$0xff]  }
 0x1b2   :  { %10322 = vmatprep.subr.bf16.mxu1 %v11272_v35 }
 0x1b3   :  { %10301 = vmatpush3.bf16.msra.mxu0 %v11271_v34  ;;  %v11319_v34 = vld [vmem:[%s14285_s1 + $0xec0] sm:$0xff]  }
 0x1b4   :  { %10302 = vmatprep.subr.bf16.mxu0 %v11274_v37  ;;  %v11322_v37 = vld [vmem:[%s14285_s1 + $0xe80] sm:$0xff]  }
 0x1b5   :  { %10323 = vmatpush3.bf16.msra.mxu1 %v11273_v36  ;;  %v11320_v36 = vld [vmem:[%s14284_s0 + $0x70] ss:$196 sps:$4 sm:$0xff]  }
 0x1b6   :  { %10324 = vmatprep.subr.bf16.mxu1 %v11276_v39  ;;  %v1950_v39 = vrot.slane %v11320_v36, %v11782_v40 }
 0x1b7   :  { %10303 = vmatpush3.bf16.msra.mxu0 %v11275_v38 }
 0x1b8   :  { %10304 = vmatprep.subr.bf16.mxu0 %v11278_v42 }
 0x1b9   :  { %10325 = vmatpush3.bf16.msra.mxu1 %v11277_v41  ;;  %v11323_v41 = vld [vmem:[%s14285_s1 + $0xf78] sm:$0xff]  }
 0x1ba   :  { %10326 = vmatprep.subr.bf16.mxu1 %v11280_v44  ;;  %v11324_v44 = vld [vmem:[%s14284_s0 + $0x74] ss:$196 sps:$4 sm:$0xff]  }
 0x1bb   :  { %10305 = vmatpush3.bf16.msra.mxu0 %v11279_v43  ;;  %v1957_v50 = vrot.slane %v11324_v44, %v11782_v40 }
 0x1bc   :  { %10306 = vmatprep.subr.bf16.mxu0 %v11282_v46  ;;  %v1958_v46 = vcombine.high %v1950_v39, %v1950_v39 }
 0x1bd   :  { %10327 = vmatpush3.bf16.msra.mxu1 %v11281_v45  ;;  %v1959_v56 = vcombine.high %v1957_v50, %v1957_v50 }
 0x1be   :  { %10328 = vmatprep.subr.bf16.mxu1 %v11284_v48 }
 0x1bf   :  { %10307 = vmatpush3.bf16.msra.mxu0 %v11283_v47  ;;  %v11325_v47 = vld [vmem:[%s14285_s1 + $0xf38] sm:$0xff]  }
 0x1c0   :  { %10336 = vmatprep.subr.bf16.mxu0 %v11288_v55 }
 0x1c1   :  { %10329 = vmatpush3.bf16.msra.mxu1 %v11287_v51  ;;  %v11326_v51 = vld [vmem:[%s14285_s1 + $0xff8] sm:$0xff]  }
 0x1c2   :  { %v10044_v49 = vpop.f32.mrf.mxu0  ;;  %10358 = vmatprep.subr.bf16.mxu1 %v11291_v0  ;;  %8006 = vmatmul.mubr.bf16.vlgmr.msra.gmra.mxu0 %v1932_v54  ;;  %v11327_v54 = vld [vmem:[%s14285_s1 + $0xfb8] sm:$0xff]   ;;  %v11333_v0 = vld [vmem:[%s14285_s1 + $0xf28] sm:$0xff]  }
 0x1c3   :  { %10337 = vmatpush3.bf16.msra.mxu0 %v11290_v58  ;;  %8085 = vmatprep.mubr.bf16.mxu0 %v1958_v46  ;;  %v11328_v58 = vld [vmem:[%s14285_s1 + $0xf70] sm:$0xff]  }
 0x1c4   :  { %v10045_v52 = vpop.f32.mrf.mxu0  ;;  %v10066_v53 = vpop.f32.mrf.mxu1  ;;  %8046 = vmatmul.mubr.bf16.vlgmr.msra.gmra.mxu1 %v1939_v62  ;;  %10338 = vmatprep.subr.bf16.mxu0 %v11293_v7  ;;  %v11331_v62 = vld [vmem:[%s14285_s1 + $0xfb0] sm:$0xff]   ;;  %v11340_v7 = vld [vmem:[%s14285_s1 + $0xf58] sm:$0xff]  }
 0x1c5   :  { %v10046_v57 = vadd.f32 %v10045_v52, %v10044_v49  ;;  %10359 = vmatpush3.bf16.msra.mxu1 %v11292_v2  ;;  %8125 = vmatprep.mubr.bf16.mxu1 %v1959_v56  ;;  %v11335_v2 = vld [vmem:[%s14285_s1 + $0xfa8] sm:$0xff]   ;;  %v11364_v46 = vld [vmem:[%s14285_s1 + $0x1030] sm:$0xff]   ;;  %v11373_v56 = vld [vmem:[%s14285_s1 + $0x10e0] sm:$0xff]  }
 0x1c6   :  { %v10047_v59 = vpop.f32.mrf.mxu0  ;;  %v10067_v60 = vpop.f32.mrf.mxu1  ;;  %10360 = vmatprep.subr.bf16.mxu1 %v11295_v10  ;;  %v11343_v10 = vld [vmem:[%s14285_s1 + $0xf98] sm:$0xff]  }
 0x1c7   :  { %v7528_v63 = vadd.f32 %v10046_v57, %v13064_v19  ;;  %v10068_v1 = vadd.f32 %v10067_v60, %v10066_v53  ;;  %10339 = vmatpush3.bf16.msra.mxu0 %v11294_v8  ;;  %v11304_v19 = vld [vmem:[%s14285_s1 + $0xea0] sm:$0xff]   ;;  %v11329_v59 = vld [vmem:[%s14285_s1 + $0xf30] sm:$0xff]   ;;  %v11341_v8 = vld [vmem:[%s14285_s1 + $0xf18] sm:$0xff]  }
 0x1c8   :  { %v10048_v3 = vpop.f32.mrf.mxu0  ;;  %v10069_v4 = vpop.f32.mrf.mxu1  ;;  %10340 = vmatprep.subr.bf16.mxu0 %v11297_v12  ;;  %v11345_v12 = vld [vmem:[%s14285_s1 + $0xf10] sm:$0xff]  }
 0x1c9   :  { %v13171_v6 = vadd.f32 %v10068_v1, %v7528_v63  ;;  %10361 = vmatpush3.bf16.msra.mxu1 %v11296_v11  ;;  %v11332_v63 = vld [vmem:[%s14285_s1 + $0xf68] sm:$0xff]   ;;  %v11336_v3 = vld [vmem:[%s14285_s1 + $0xf60] sm:$0xff]   ;;  %v11344_v11 = vld [vmem:[%s14285_s1 + $0xf50] sm:$0xff]  }
 0x1ca   :  { %v10070_v9 = vpop.f32.mrf.mxu1  ;;  %10362 = vmatprep.subr.bf16.mxu1 %v11299_v14  ;;  %v11334_v1 = vld [vmem:[%s14285_s1 + $0xfe8] sm:$0xff]   ;;  %v11337_v4 = vld [vmem:[%s14285_s1 + $0xf20] sm:$0xff]   ;;  %v11347_v14 = vld [vmem:[%s14285_s1 + $0xf90] sm:$0xff]  }
 0x1cb   :  { %10341 = vmatpush3.bf16.msra.mxu0 %v11298_v13  ;;  %v11342_v9 = vld [vmem:[%s14285_s1 + $0xfd8] sm:$0xff]   ;;  %v11346_v13 = vld [vmem:[%s14285_s1 + $0xfd0] sm:$0xff]  }
 0x1cc   :  { %10342 = vmatprep.subr.bf16.mxu0 %v11301_v16  ;;  %v11349_v16 = vld [vmem:[%s14285_s1 + $0xf08] sm:$0xff]  }
 0x1cd   :  { %10363 = vmatpush3.bf16.msra.mxu1 %v11300_v15  ;;  %v11348_v15 = vld [vmem:[%s14285_s1 + $0xf48] sm:$0xff]  }
 0x1ce   :  { %10364 = vmatprep.subr.bf16.mxu1 %v11303_v18  ;;  %v11351_v18 = vld [vmem:[%s14285_s1 + $0xf88] sm:$0xff]  }
 0x1cf   :  { %10343 = vmatpush3.bf16.msra.mxu0 %v11302_v17  ;;  %v11350_v17 = vld [vmem:[%s14285_s1 + $0xfc8] sm:$0xff]  }
 0x1d0   :  { %10344 = vmatprep.subr.bf16.mxu0 %v11305_v20  ;;  %v11353_v20 = vld [vmem:[%s14285_s1 + $0xf00] sm:$0xff]  }
 0x1d1   :  { %10365 = vmatpush3.bf16.msra.mxu1 %v11304_v19  ;;  %v11352_v19 = vld [vmem:[%s14285_s1 + $0xf40] sm:$0xff]  }
 0x1d2   :  { %10366 = vmatprep.subr.bf16.mxu1 %v11307_v22 }
 0x1d3   :  { %10345 = vmatpush3.bf16.msra.mxu0 %v11306_v21  ;;  %v11354_v21 = vld [vmem:[%s14285_s1 + $0xfc0] sm:$0xff]  }
 0x1d4   :  { %10346 = vmatprep.subr.bf16.mxu0 %v11309_v24  ;;  %v11357_v24 = vld [vmem:[%s14285_s1 + $0xf80] sm:$0xff]  }
 0x1d5   :  { %10367 = vmatpush3.bf16.msra.mxu1 %v11308_v23  ;;  %v11355_v23 = vld [vmem:[%s14284_s0 + $0x78] ss:$196 sps:$4 sm:$0xff]  }
 0x1d6   :  { %10368 = vmatprep.subr.bf16.mxu1 %v11311_v26 }
 0x1d7   :  { %10347 = vmatpush3.bf16.msra.mxu0 %v11310_v25 }
 0x1d8   :  { %10348 = vmatprep.subr.bf16.mxu0 %v11313_v28  ;;  %v11358_v28 = vld [vmem:[%s14285_s1 + $0x1078] sm:$0xff]  }
 0x1d9   :  { %10369 = vmatpush3.bf16.msra.mxu1 %v11312_v27  ;;  %v1968_v27 = vrot.slane %v11355_v23, %v11782_v40 }
 0x1da   :  { %10370 = vmatprep.subr.bf16.mxu1 %v11315_v30 }
 0x1db   :  { %10349 = vmatpush3.bf16.msra.mxu0 %v11314_v29  ;;  %v11359_v29 = vld [vmem:[%s14284_s0 + $0x7c] ss:$196 sps:$4 sm:$0xff]  }
 0x1dc   :  { %10350 = vmatprep.subr.bf16.mxu0 %v11317_v32 }
 0x1dd   :  { %10371 = vmatpush3.bf16.msra.mxu1 %v11316_v31  ;;  %v11360_v31 = vld [vmem:[%s14285_s1 + $0x1038] sm:$0xff]  }
 0x1de   :  { %10372 = vmatprep.subr.bf16.mxu1 %v11319_v34  ;;  %v1976_v34 = vcombine.high %v1968_v27, %v1968_v27 }
 0x1df   :  { %10351 = vmatpush3.bf16.msra.mxu0 %v11318_v33 }
 0x1e0   :  { %10380 = vmatprep.subr.bf16.mxu0 %v11323_v41 }
 0x1e1   :  { %10373 = vmatpush3.bf16.msra.mxu1 %v11322_v37  ;;  %v11361_v37 = vld [vmem:[%s14285_s1 + $0x10f8] sm:$0xff]  }
 0x1e2   :  { %v10088_v35 = vpop.f32.mrf.mxu0  ;;  %8086 = vmatmul.mubr.bf16.vlgmr.msra.gmra.mxu0 %v1950_v39  ;;  %10402 = vmatprep.subr.bf16.mxu1 %v11326_v51  ;;  %v11362_v39 = vld [vmem:[%s14285_s1 + $0x10b8] sm:$0xff]   ;;  %v11368_v51 = vld [vmem:[%s14285_s1 + $0x1028] sm:$0xff]  }
 0x1e3   :  { %10381 = vmatpush3.bf16.msra.mxu0 %v11325_v47  ;;  %8165 = vmatprep.mubr.bf16.mxu0 %v1976_v34  ;;  %v11400_v34 = vld [vmem:[%s14285_s1 + $0x11f0] sm:$0xff]  }
 0x1e4   :  { %v10089_v38 = vpop.f32.mrf.mxu0  ;;  %v10110_v43 = vpop.f32.mrf.mxu1  ;;  %10382 = vmatprep.subr.bf16.mxu0 %v11328_v58  ;;  %8126 = vmatmul.mubr.bf16.vlgmr.msra.gmra.mxu1 %v1957_v50  ;;  %v11367_v50 = vld [vmem:[%s14285_s1 + $0x1068] sm:$0xff]   ;;  %v11375_v58 = vld [vmem:[%s14285_s1 + $0x1058] sm:$0xff]  }
 0x1e5   :  { %v10090_v42 = vadd.f32 %v10089_v38, %v10088_v35  ;;  %10403 = vmatpush3.bf16.msra.mxu1 %v11327_v54  ;;  %v1975_v35 = vrot.slane %v11359_v29, %v11782_v40  ;;  %v11371_v54 = vld [vmem:[%s14285_s1 + $0x1060] sm:$0xff]  }
 0x1e6   :  { %v10091_v45 = vpop.f32.mrf.mxu0  ;;  %v10111_v49 = vpop.f32.mrf.mxu1  ;;  %10404 = vmatprep.subr.bf16.mxu1 %v11330_v61  ;;  %v11378_v61 = vld [vmem:[%s14285_s1 + $0x1098] sm:$0xff]  }
 0x1e7   :  { %v7608_v48 = vadd.f32 %v10090_v42, %v13171_v6  ;;  %v10112_v52 = vadd.f32 %v10111_v49, %v10110_v43  ;;  %10383 = vmatpush3.bf16.msra.mxu0 %v11329_v59  ;;  %v11339_v6 = vld [vmem:[%s14285_s1 + $0xfa0] sm:$0xff]   ;;  %v1977_v43 = vcombine.high %v1975_v35, %v1975_v35  ;;  %v11363_v45 = vld [vmem:[%s14285_s1 + $0x1070] sm:$0xff]   ;;  %v11376_v59 = vld [vmem:[%s14285_s1 + $0x1018] sm:$0xff]  }
 0x1e8   :  { %v10092_v53 = vpop.f32.mrf.mxu0  ;;  %v10113_v55 = vpop.f32.mrf.mxu1  ;;  %10384 = vmatprep.subr.bf16.mxu0 %v11332_v63  ;;  %v11366_v49 = vld [vmem:[%s14285_s1 + $0x10b0] sm:$0xff]  }
 0x1e9   :  { %v13278_v57 = vadd.f32 %v10112_v52, %v7608_v48  ;;  %10405 = vmatpush3.bf16.msra.mxu1 %v11331_v62  ;;  %8205 = vmatprep.mubr.bf16.mxu1 %v1977_v43  ;;  %v11365_v48 = vld [vmem:[%s14285_s1 + $0x10f0] sm:$0xff]   ;;  %v11369_v52 = vld [vmem:[%s14285_s1 + $0x10e8] sm:$0xff]   ;;  %v11372_v55 = vld [vmem:[%s14285_s1 + $0x1020] sm:$0xff]  }
 0x1ea   :  { %v10114_v60 = vpop.f32.mrf.mxu1  ;;  %10406 = vmatprep.subr.bf16.mxu1 %v11334_v1  ;;  %v11370_v53 = vld [vmem:[%s14285_s1 + $0x10a8] sm:$0xff]   ;;  %v11379_v62 = vld [vmem:[%s14285_s1 + $0x1050] sm:$0xff]   ;;  %v11408_v43 = vld [vmem:[%s14285_s1 + $0x11e0] sm:$0xff]  }
 0x1eb   :  { %10385 = vmatpush3.bf16.msra.mxu0 %v11333_v0  ;;  %v11377_v60 = vld [vmem:[%s14285_s1 + $0x10d8] sm:$0xff]   ;;  %v11380_v63 = vld [vmem:[%s14285_s1 + $0x1010] sm:$0xff]  }
 0x1ec   :  { %10386 = vmatprep.subr.bf16.mxu0 %v11336_v3  ;;  %v11381_v0 = vld [vmem:[%s14285_s1 + $0x10d0] sm:$0xff]   ;;  %v11384_v3 = vld [vmem:[%s14285_s1 + $0x1008] sm:$0xff]  }
 0x1ed   :  { %10407 = vmatpush3.bf16.msra.mxu1 %v11335_v2  ;;  %v11382_v1 = vld [vmem:[%s14285_s1 + $0x1090] sm:$0xff]   ;;  %v11383_v2 = vld [vmem:[%s14285_s1 + $0x1048] sm:$0xff]  }
 0x1ee   :  { %10408 = vmatprep.subr.bf16.mxu1 %v11338_v5  ;;  %v11386_v5 = vld [vmem:[%s14285_s1 + $0x1088] sm:$0xff]  }
 0x1ef   :  { %10387 = vmatpush3.bf16.msra.mxu0 %v11337_v4  ;;  %v11385_v4 = vld [vmem:[%s14285_s1 + $0x10c8] sm:$0xff]  }
 0x1f0   :  { %10388 = vmatprep.subr.bf16.mxu0 %v11340_v7  ;;  %v11388_v7 = vld [vmem:[%s14285_s1 + $0x1000] sm:$0xff]  }
 0x1f1   :  { %10409 = vmatpush3.bf16.msra.mxu1 %v11339_v6  ;;  %v11387_v6 = vld [vmem:[%s14285_s1 + $0x1040] sm:$0xff]  }
 0x1f2   :  { %10410 = vmatprep.subr.bf16.mxu1 %v11342_v9 }
 0x1f3   :  { %10389 = vmatpush3.bf16.msra.mxu0 %v11341_v8  ;;  %v11389_v8 = vld [vmem:[%s14285_s1 + $0x10c0] sm:$0xff]  }
 0x1f4   :  { %10390 = vmatprep.subr.bf16.mxu0 %v11344_v11  ;;  %v11392_v11 = vld [vmem:[%s14285_s1 + $0x1080] sm:$0xff]  }
 0x1f5   :  { %10411 = vmatpush3.bf16.msra.mxu1 %v11343_v10  ;;  %v11390_v10 = vld [vmem:[%s14284_s0 + $0x80] ss:$196 sps:$4 sm:$0xff]  }
 0x1f6   :  { %10412 = vmatprep.subr.bf16.mxu1 %v11346_v13 }
 0x1f7   :  { %10391 = vmatpush3.bf16.msra.mxu0 %v11345_v12 }
 0x1f8   :  { %10392 = vmatprep.subr.bf16.mxu0 %v11348_v15  ;;  %v11393_v15 = vld [vmem:[%s14285_s1 + $0x1178] sm:$0xff]  }
 0x1f9   :  { %10413 = vmatpush3.bf16.msra.mxu1 %v11347_v14  ;;  %v1986_v14 = vrot.slane %v11390_v10, %v11782_v40 }
 0x1fa   :  { %10414 = vmatprep.subr.bf16.mxu1 %v11350_v17 }
 0x1fb   :  { %10393 = vmatpush3.bf16.msra.mxu0 %v11349_v16  ;;  %v11394_v16 = vld [vmem:[%s14284_s0 + $0x84] ss:$196 sps:$4 sm:$0xff]  }
 0x1fc   :  { %10394 = vmatprep.subr.bf16.mxu0 %v11352_v19 }
 0x1fd   :  { %10415 = vmatpush3.bf16.msra.mxu1 %v11351_v18  ;;  %v11395_v18 = vld [vmem:[%s14285_s1 + $0x1138] sm:$0xff]  }
 0x1fe   :  { %10416 = vmatprep.subr.bf16.mxu1 %v11354_v21  ;;  %v1994_v21 = vcombine.high %v1986_v14, %v1986_v14 }
 0x1ff   :  { %10395 = vmatpush3.bf16.msra.mxu0 %v11353_v20 }
 0x200   :  { %10424 = vmatprep.subr.bf16.mxu0 %v11358_v28 }
 0x201   :  { %10417 = vmatpush3.bf16.msra.mxu1 %v11357_v24  ;;  %v11396_v24 = vld [vmem:[%s14285_s1 + $0x11f8] sm:$0xff]  }
 0x202   :  { %v10132_v22 = vpop.f32.mrf.mxu0  ;;  %10446 = vmatprep.subr.bf16.mxu1 %v11361_v37  ;;  %8166 = vmatmul.mubr.bf16.vlgmr.msra.gmra.mxu0 %v1968_v27  ;;  %v11403_v37 = vld [vmem:[%s14285_s1 + $0x1128] sm:$0xff]  }
 0x203   :  { %10425 = vmatpush3.bf16.msra.mxu0 %v11360_v31  ;;  %8245 = vmatprep.mubr.bf16.mxu0 %v1994_v21  ;;  %v11398_v31 = vld [vmem:[%s14285_s1 + $0x1170] sm:$0xff]  }
 0x204   :  { %v10133_v25 = vpop.f32.mrf.mxu0  ;;  %v10154_v26 = vpop.f32.mrf.mxu1  ;;  %8206 = vmatmul.mubr.bf16.vlgmr.msra.gmra.mxu1 %v1975_v35  ;;  %10426 = vmatprep.subr.bf16.mxu0 %v11363_v45  ;;  %v11401_v35 = vld [vmem:[%s14285_s1 + $0x11b0] sm:$0xff]   ;;  %v11410_v45 = vld [vmem:[%s14285_s1 + $0x1158] sm:$0xff]  }
 0x205   :  { %v10134_v30 = vadd.f32 %v10133_v25, %v10132_v22  ;;  %10447 = vmatpush3.bf16.msra.mxu1 %v11362_v39  ;;  %v1993_v22 = vrot.slane %v11394_v16, %v11782_v40  ;;  %v11405_v39 = vld [vmem:[%s14285_s1 + $0x11a8] sm:$0xff]   ;;  %v11435_v21 = vld [vmem:[%s14285_s1 + $0x12f0] sm:$0xff]  }
 0x206   :  { %v10135_v32 = vpop.f32.mrf.mxu0  ;;  %v10155_v33 = vpop.f32.mrf.mxu1  ;;  %10448 = vmatprep.subr.bf16.mxu1 %v11365_v48  ;;  %v11413_v48 = vld [vmem:[%s14285_s1 + $0x1198] sm:$0xff]  }
 0x207   :  { %v7688_v36 = vadd.f32 %v10134_v30, %v13278_v57  ;;  %v10156_v38 = vadd.f32 %v10155_v33, %v10154_v26  ;;  %10427 = vmatpush3.bf16.msra.mxu0 %v11364_v46  ;;  %v11374_v57 = vld [vmem:[%s14285_s1 + $0x10a0] sm:$0xff]   ;;  %v11397_v26 = vld [vmem:[%s14285_s1 + $0x11b8] sm:$0xff]   ;;  %v1995_v29 = vcombine.high %v1993_v22, %v1993_v22  ;;  %v11399_v32 = vld [vmem:[%s14285_s1 + $0x1130] sm:$0xff]  }
 0x208   :  { %v10136_v41 = vpop.f32.mrf.mxu0  ;;  %v10157_v42 = vpop.f32.mrf.mxu1  ;;  %10428 = vmatprep.subr.bf16.mxu0 %v11367_v50  ;;  %v11411_v46 = vld [vmem:[%s14285_s1 + $0x1118] sm:$0xff]   ;;  %v11415_v50 = vld [vmem:[%s14285_s1 + $0x1110] sm:$0xff]  }
 0x209   :  { %v13385_v44 = vadd.f32 %v10156_v38, %v7688_v36  ;;  %10449 = vmatpush3.bf16.msra.mxu1 %v11366_v49  ;;  %8285 = vmatprep.mubr.bf16.mxu1 %v1995_v29  ;;  %v11402_v36 = vld [vmem:[%s14285_s1 + $0x1168] sm:$0xff]   ;;  %v11406_v41 = vld [vmem:[%s14285_s1 + $0x1160] sm:$0xff]   ;;  %v11414_v49 = vld [vmem:[%s14285_s1 + $0x1150] sm:$0xff]  }
 0x20a   :  { %v10158_v47 = vpop.f32.mrf.mxu1  ;;  %10450 = vmatprep.subr.bf16.mxu1 %v11369_v52  ;;  %v11404_v38 = vld [vmem:[%s14285_s1 + $0x11e8] sm:$0xff]   ;;  %v11407_v42 = vld [vmem:[%s14285_s1 + $0x1120] sm:$0xff]   ;;  %v11417_v52 = vld [vmem:[%s14285_s1 + $0x1190] sm:$0xff]  }
 0x20b   :  { %10429 = vmatpush3.bf16.msra.mxu0 %v11368_v51  ;;  %v11412_v47 = vld [vmem:[%s14285_s1 + $0x11d8] sm:$0xff]   ;;  %v11416_v51 = vld [vmem:[%s14285_s1 + $0x11d0] sm:$0xff]   ;;  %v11443_v29 = vld [vmem:[%s14285_s1 + $0x12e0] sm:$0xff]  }
 0x20c   :  { %10430 = vmatprep.subr.bf16.mxu0 %v11371_v54  ;;  %v11419_v54 = vld [vmem:[%s14285_s1 + $0x1108] sm:$0xff]  }
 0x20d   :  { %10451 = vmatpush3.bf16.msra.mxu1 %v11370_v53  ;;  %v11418_v53 = vld [vmem:[%s14285_s1 + $0x1148] sm:$0xff]  }
 0x20e   :  { %10452 = vmatprep.subr.bf16.mxu1 %v11373_v56  ;;  %v11421_v56 = vld [vmem:[%s14285_s1 + $0x1188] sm:$0xff]  }
 0x20f   :  { %10431 = vmatpush3.bf16.msra.mxu0 %v11372_v55  ;;  %v11420_v55 = vld [vmem:[%s14285_s1 + $0x11c8] sm:$0xff]  }
 0x210   :  { %10432 = vmatprep.subr.bf16.mxu0 %v11375_v58  ;;  %v11423_v58 = vld [vmem:[%s14285_s1 + $0x1100] sm:$0xff]  }
 0x211   :  { %10453 = vmatpush3.bf16.msra.mxu1 %v11374_v57  ;;  %v11422_v57 = vld [vmem:[%s14285_s1 + $0x1140] sm:$0xff]  }
 0x212   :  { %10454 = vmatprep.subr.bf16.mxu1 %v11377_v60 }
 0x213   :  { %10433 = vmatpush3.bf16.msra.mxu0 %v11376_v59  ;;  %v11424_v59 = vld [vmem:[%s14285_s1 + $0x11c0] sm:$0xff]  }
 0x214   :  { %10434 = vmatprep.subr.bf16.mxu0 %v11379_v62  ;;  %v11427_v62 = vld [vmem:[%s14285_s1 + $0x1180] sm:$0xff]  }
 0x215   :  { %10455 = vmatpush3.bf16.msra.mxu1 %v11378_v61  ;;  %v11425_v61 = vld [vmem:[%s14284_s0 + $0x88] ss:$196 sps:$4 sm:$0xff]  }
 0x216   :  { %10456 = vmatprep.subr.bf16.mxu1 %v11381_v0  ;;  %v2004_v0 = vrot.slane %v11425_v61, %v11782_v40 }
 0x217   :  { %10435 = vmatpush3.bf16.msra.mxu0 %v11380_v63 }
 0x218   :  { %10436 = vmatprep.subr.bf16.mxu0 %v11383_v2 }
 0x219   :  { %10457 = vmatpush3.bf16.msra.mxu1 %v11382_v1  ;;  %v11428_v1 = vld [vmem:[%s14285_s1 + $0x1278] sm:$0xff]  }
 0x21a   :  { %10458 = vmatprep.subr.bf16.mxu1 %v11385_v4  ;;  %v11429_v4 = vld [vmem:[%s14284_s0 + $0x8c] ss:$196 sps:$4 sm:$0xff]  }
 0x21b   :  { %10437 = vmatpush3.bf16.msra.mxu0 %v11384_v3  ;;  %v2011_v10 = vrot.slane %v11429_v4, %v11782_v40 }
 0x21c   :  { %10438 = vmatprep.subr.bf16.mxu0 %v11387_v6  ;;  %v2012_v6 = vcombine.high %v2004_v0, %v2004_v0 }
 0x21d   :  { %10459 = vmatpush3.bf16.msra.mxu1 %v11386_v5  ;;  %v2013_v16 = vcombine.high %v2011_v10, %v2011_v10 }
 0x21e   :  { %10460 = vmatprep.subr.bf16.mxu1 %v11389_v8 }
 0x21f   :  { %10439 = vmatpush3.bf16.msra.mxu0 %v11388_v7  ;;  %v11430_v7 = vld [vmem:[%s14285_s1 + $0x1238] sm:$0xff]  }
 0x220   :  { %10468 = vmatprep.subr.bf16.mxu0 %v11393_v15 }
 0x221   :  { %10461 = vmatpush3.bf16.msra.mxu1 %v11392_v11  ;;  %v11431_v11 = vld [vmem:[%s14285_s1 + $0x12f8] sm:$0xff]  }
 0x222   :  { %v10176_v9 = vpop.f32.mrf.mxu0  ;;  %10490 = vmatprep.subr.bf16.mxu1 %v11396_v24  ;;  %8246 = vmatmul.mubr.bf16.vlgmr.msra.gmra.mxu0 %v1986_v14  ;;  %v11432_v14 = vld [vmem:[%s14285_s1 + $0x12b8] sm:$0xff]   ;;  %v11438_v24 = vld [vmem:[%s14285_s1 + $0x1228] sm:$0xff]  }
 0x223   :  { %10469 = vmatpush3.bf16.msra.mxu0 %v11395_v18  ;;  %8325 = vmatprep.mubr.bf16.mxu0 %v2012_v6  ;;  %v11433_v18 = vld [vmem:[%s14285_s1 + $0x1270] sm:$0xff]  }
 0x224   :  { %v10177_v12 = vpop.f32.mrf.mxu0  ;;  %v10198_v13 = vpop.f32.mrf.mxu1  ;;  %8286 = vmatmul.mubr.bf16.vlgmr.msra.gmra.mxu1 %v1993_v22  ;;  %10470 = vmatprep.subr.bf16.mxu0 %v11398_v31  ;;  %v11436_v22 = vld [vmem:[%s14285_s1 + $0x12b0] sm:$0xff]   ;;  %v11445_v31 = vld [vmem:[%s14285_s1 + $0x1258] sm:$0xff]  }
 0x225   :  { %v10178_v17 = vadd.f32 %v10177_v12, %v10176_v9  ;;  %10491 = vmatpush3.bf16.msra.mxu1 %v11397_v26  ;;  %8365 = vmatprep.mubr.bf16.mxu1 %v2013_v16  ;;  %v11440_v26 = vld [vmem:[%s14285_s1 + $0x12a8] sm:$0xff]   ;;  %v11469_v6 = vld [vmem:[%s14285_s1 + $0x1330] sm:$0xff]   ;;  %v11478_v16 = vld [vmem:[%s14285_s1 + $0x13e0] sm:$0xff]  }
 0x226   :  { %v10179_v19 = vpop.f32.mrf.mxu0  ;;  %v10199_v20 = vpop.f32.mrf.mxu1  ;;  %10492 = vmatprep.subr.bf16.mxu1 %v11400_v34  ;;  %v11448_v34 = vld [vmem:[%s14285_s1 + $0x1298] sm:$0xff]  }
 0x227   :  { %v7768_v23 = vadd.f32 %v10178_v17, %v13385_v44  ;;  %v10200_v25 = vadd.f32 %v10199_v20, %v10198_v13  ;;  %10471 = vmatpush3.bf16.msra.mxu0 %v11399_v32  ;;  %v11409_v44 = vld [vmem:[%s14285_s1 + $0x11a0] sm:$0xff]   ;;  %v11434_v19 = vld [vmem:[%s14285_s1 + $0x1230] sm:$0xff]   ;;  %v11446_v32 = vld [vmem:[%s14285_s1 + $0x1218] sm:$0xff]  }
 0x228   :  { %v10180_v27 = vpop.f32.mrf.mxu0  ;;  %v10201_v28 = vpop.f32.mrf.mxu1  ;;  %10472 = vmatprep.subr.bf16.mxu0 %v11402_v36  ;;  %v11450_v36 = vld [vmem:[%s14285_s1 + $0x1210] sm:$0xff]  }
 0x229   :  { %v13492_v30 = vadd.f32 %v10200_v25, %v7768_v23  ;;  %10493 = vmatpush3.bf16.msra.mxu1 %v11401_v35  ;;  %v11437_v23 = vld [vmem:[%s14285_s1 + $0x1268] sm:$0xff]   ;;  %v11441_v27 = vld [vmem:[%s14285_s1 + $0x1260] sm:$0xff]   ;;  %v11449_v35 = vld [vmem:[%s14285_s1 + $0x1250] sm:$0xff]  }
 0x22a   :  { %v10202_v33 = vpop.f32.mrf.mxu1  ;;  %10494 = vmatprep.subr.bf16.mxu1 %v11404_v38  ;;  %v11439_v25 = vld [vmem:[%s14285_s1 + $0x12e8] sm:$0xff]   ;;  %v11442_v28 = vld [vmem:[%s14285_s1 + $0x1220] sm:$0xff]   ;;  %v11452_v38 = vld [vmem:[%s14285_s1 + $0x1290] sm:$0xff]  }
 0x22b   :  { %10473 = vmatpush3.bf16.msra.mxu0 %v11403_v37  ;;  %v11447_v33 = vld [vmem:[%s14285_s1 + $0x12d8] sm:$0xff]   ;;  %v11451_v37 = vld [vmem:[%s14285_s1 + $0x12d0] sm:$0xff]  }
 0x22c   :  { %10474 = vmatprep.subr.bf16.mxu0 %v11406_v41  ;;  %v11454_v41 = vld [vmem:[%s14285_s1 + $0x1208] sm:$0xff]  }
 0x22d   :  { %10495 = vmatpush3.bf16.msra.mxu1 %v11405_v39  ;;  %v11453_v39 = vld [vmem:[%s14285_s1 + $0x1248] sm:$0xff]  }
 0x22e   :  { %10496 = vmatprep.subr.bf16.mxu1 %v11408_v43  ;;  %v11456_v43 = vld [vmem:[%s14285_s1 + $0x1288] sm:$0xff]  }
 0x22f   :  { %10475 = vmatpush3.bf16.msra.mxu0 %v11407_v42  ;;  %v11455_v42 = vld [vmem:[%s14285_s1 + $0x12c8] sm:$0xff]  }
 0x230   :  { %10476 = vmatprep.subr.bf16.mxu0 %v11410_v45  ;;  %v11458_v45 = vld [vmem:[%s14285_s1 + $0x1200] sm:$0xff]  }
 0x231   :  { %10497 = vmatpush3.bf16.msra.mxu1 %v11409_v44  ;;  %v11457_v44 = vld [vmem:[%s14285_s1 + $0x1240] sm:$0xff]  }
 0x232   :  { %10498 = vmatprep.subr.bf16.mxu1 %v11412_v47 }
 0x233   :  { %10477 = vmatpush3.bf16.msra.mxu0 %v11411_v46  ;;  %v11459_v46 = vld [vmem:[%s14285_s1 + $0x12c0] sm:$0xff]  }
 0x234   :  { %10478 = vmatprep.subr.bf16.mxu0 %v11414_v49  ;;  %v11462_v49 = vld [vmem:[%s14285_s1 + $0x1280] sm:$0xff]  }
 0x235   :  { %10499 = vmatpush3.bf16.msra.mxu1 %v11413_v48  ;;  %v11460_v48 = vld [vmem:[%s14284_s0 + $0x90] ss:$196 sps:$4 sm:$0xff]  }
 0x236   :  { %10500 = vmatprep.subr.bf16.mxu1 %v11416_v51 }
 0x237   :  { %10479 = vmatpush3.bf16.msra.mxu0 %v11415_v50 }
 0x238   :  { %10480 = vmatprep.subr.bf16.mxu0 %v11418_v53  ;;  %v11463_v53 = vld [vmem:[%s14285_s1 + $0x1378] sm:$0xff]  }
 0x239   :  { %10501 = vmatpush3.bf16.msra.mxu1 %v11417_v52  ;;  %v2022_v52 = vrot.slane %v11460_v48, %v11782_v40 }
 0x23a   :  { %10502 = vmatprep.subr.bf16.mxu1 %v11420_v55 }
 0x23b   :  { %10481 = vmatpush3.bf16.msra.mxu0 %v11419_v54  ;;  %v11464_v54 = vld [vmem:[%s14284_s0 + $0x94] ss:$196 sps:$4 sm:$0xff]  }
 0x23c   :  { %10482 = vmatprep.subr.bf16.mxu0 %v11422_v57 }
 0x23d   :  { %10503 = vmatpush3.bf16.msra.mxu1 %v11421_v56  ;;  %v11465_v56 = vld [vmem:[%s14285_s1 + $0x1338] sm:$0xff]  }
 0x23e   :  { %10504 = vmatprep.subr.bf16.mxu1 %v11424_v59  ;;  %v2030_v59 = vcombine.high %v2022_v52, %v2022_v52 }
 0x23f   :  { %10483 = vmatpush3.bf16.msra.mxu0 %v11423_v58 }
 0x240   :  { %10512 = vmatprep.subr.bf16.mxu0 %v11428_v1 }
 0x241   :  { %10505 = vmatpush3.bf16.msra.mxu1 %v11427_v62  ;;  %v11466_v62 = vld [vmem:[%s14285_s1 + $0x13f8] sm:$0xff]  }
 0x242   :  { %v10220_v60 = vpop.f32.mrf.mxu0  ;;  %8326 = vmatmul.mubr.bf16.vlgmr.msra.gmra.mxu0 %v2004_v0  ;;  %10534 = vmatprep.subr.bf16.mxu1 %v11431_v11  ;;  %v11467_v0 = vld [vmem:[%s14285_s1 + $0x13b8] sm:$0xff]   ;;  %v11473_v11 = vld [vmem:[%s14285_s1 + $0x1328] sm:$0xff]  }
 0x243   :  { %10513 = vmatpush3.bf16.msra.mxu0 %v11430_v7  ;;  %8405 = vmatprep.mubr.bf16.mxu0 %v2030_v59  ;;  %v11505_v59 = vld [vmem:[%s14285_s1 + $0x14f0] sm:$0xff]  }
 0x244   :  { %v10221_v63 = vpop.f32.mrf.mxu0  ;;  %v10242_v3 = vpop.f32.mrf.mxu1  ;;  %10514 = vmatprep.subr.bf16.mxu0 %v11433_v18  ;;  %8366 = vmatmul.mubr.bf16.vlgmr.msra.gmra.mxu1 %v2011_v10  ;;  %v11472_v10 = vld [vmem:[%s14285_s1 + $0x1368] sm:$0xff]   ;;  %v11480_v18 = vld [vmem:[%s14285_s1 + $0x1358] sm:$0xff]  }
 0x245   :  { %v10222_v2 = vadd.f32 %v10221_v63, %v10220_v60  ;;  %10535 = vmatpush3.bf16.msra.mxu1 %v11432_v14  ;;  %v2029_v60 = vrot.slane %v11464_v54, %v11782_v40  ;;  %v11476_v14 = vld [vmem:[%s14285_s1 + $0x1360] sm:$0xff]  }
 0x246   :  { %v10223_v5 = vpop.f32.mrf.mxu0  ;;  %v10243_v9 = vpop.f32.mrf.mxu1  ;;  %10536 = vmatprep.subr.bf16.mxu1 %v11435_v21  ;;  %v11483_v21 = vld [vmem:[%s14285_s1 + $0x1398] sm:$0xff]  }
 0x247   :  { %v7848_v8 = vadd.f32 %v10222_v2, %v13492_v30  ;;  %v10244_v12 = vadd.f32 %v10243_v9, %v10242_v3  ;;  %10515 = vmatpush3.bf16.msra.mxu0 %v11434_v19  ;;  %v11444_v30 = vld [vmem:[%s14285_s1 + $0x12a0] sm:$0xff]   ;;  %v2031_v3 = vcombine.high %v2029_v60, %v2029_v60  ;;  %v11468_v5 = vld [vmem:[%s14285_s1 + $0x1370] sm:$0xff]   ;;  %v11481_v19 = vld [vmem:[%s14285_s1 + $0x1318] sm:$0xff]  }
 0x248   :  { %v10224_v13 = vpop.f32.mrf.mxu0  ;;  %v10245_v15 = vpop.f32.mrf.mxu1  ;;  %10516 = vmatprep.subr.bf16.mxu0 %v11437_v23  ;;  %v11471_v9 = vld [vmem:[%s14285_s1 + $0x13b0] sm:$0xff]  }
 0x249   :  { %v13599_v17 = vadd.f32 %v10244_v12, %v7848_v8  ;;  %10537 = vmatpush3.bf16.msra.mxu1 %v11436_v22  ;;  %8445 = vmatprep.mubr.bf16.mxu1 %v2031_v3  ;;  %v11470_v8 = vld [vmem:[%s14285_s1 + $0x13f0] sm:$0xff]   ;;  %v11474_v12 = vld [vmem:[%s14285_s1 + $0x13e8] sm:$0xff]   ;;  %v11477_v15 = vld [vmem:[%s14285_s1 + $0x1320] sm:$0xff]  }
 0x24a   :  { %v10246_v20 = vpop.f32.mrf.mxu1  ;;  %10538 = vmatprep.subr.bf16.mxu1 %v11439_v25  ;;  %v11475_v13 = vld [vmem:[%s14285_s1 + $0x13a8] sm:$0xff]   ;;  %v11484_v22 = vld [vmem:[%s14285_s1 + $0x1350] sm:$0xff]   ;;  %v11513_v3 = vld [vmem:[%s14285_s1 + $0x14e0] sm:$0xff]  }
 0x24b   :  { %10517 = vmatpush3.bf16.msra.mxu0 %v11438_v24  ;;  %v11482_v20 = vld [vmem:[%s14285_s1 + $0x13d8] sm:$0xff]   ;;  %v11485_v23 = vld [vmem:[%s14285_s1 + $0x1310] sm:$0xff]  }
 0x24c   :  { %10518 = vmatprep.subr.bf16.mxu0 %v11441_v27  ;;  %v11486_v24 = vld [vmem:[%s14285_s1 + $0x13d0] sm:$0xff]   ;;  %v11489_v27 = vld [vmem:[%s14285_s1 + $0x1308] sm:$0xff]  }
 0x24d   :  { %10539 = vmatpush3.bf16.msra.mxu1 %v11440_v26  ;;  %v11487_v25 = vld [vmem:[%s14285_s1 + $0x1390] sm:$0xff]   ;;  %v11488_v26 = vld [vmem:[%s14285_s1 + $0x1348] sm:$0xff]  }
 0x24e   :  { %10540 = vmatprep.subr.bf16.mxu1 %v11443_v29  ;;  %v11491_v29 = vld [vmem:[%s14285_s1 + $0x1388] sm:$0xff]  }
 0x24f   :  { %10519 = vmatpush3.bf16.msra.mxu0 %v11442_v28  ;;  %v11490_v28 = vld [vmem:[%s14285_s1 + $0x13c8] sm:$0xff]  }
 0x250   :  { %10520 = vmatprep.subr.bf16.mxu0 %v11445_v31  ;;  %v11493_v31 = vld [vmem:[%s14285_s1 + $0x1300] sm:$0xff]  }
 0x251   :  { %10541 = vmatpush3.bf16.msra.mxu1 %v11444_v30  ;;  %v11492_v30 = vld [vmem:[%s14285_s1 + $0x1340] sm:$0xff]  }
 0x252   :  { %10542 = vmatprep.subr.bf16.mxu1 %v11447_v33 }
 0x253   :  { %10521 = vmatpush3.bf16.msra.mxu0 %v11446_v32  ;;  %v11494_v32 = vld [vmem:[%s14285_s1 + $0x13c0] sm:$0xff]  }
 0x254   :  { %10522 = vmatprep.subr.bf16.mxu0 %v11449_v35  ;;  %v11497_v35 = vld [vmem:[%s14285_s1 + $0x1380] sm:$0xff]  }
 0x255   :  { %10543 = vmatpush3.bf16.msra.mxu1 %v11448_v34  ;;  %v11495_v34 = vld [vmem:[%s14284_s0 + $0x98] ss:$196 sps:$4 sm:$0xff]  }
 0x256   :  { %10544 = vmatprep.subr.bf16.mxu1 %v11451_v37 }
 0x257   :  { %10523 = vmatpush3.bf16.msra.mxu0 %v11450_v36 }
 0x258   :  { %10524 = vmatprep.subr.bf16.mxu0 %v11453_v39  ;;  %v11498_v39 = vld [vmem:[%s14285_s1 + $0x1478] sm:$0xff]  }
 0x259   :  { %10545 = vmatpush3.bf16.msra.mxu1 %v11452_v38  ;;  %v2040_v38 = vrot.slane %v11495_v34, %v11782_v40 }
 0x25a   :  { %10546 = vmatprep.subr.bf16.mxu1 %v11455_v42 }
 0x25b   :  { %10525 = vmatpush3.bf16.msra.mxu0 %v11454_v41  ;;  %v11499_v41 = vld [vmem:[%s14284_s0 + $0x9c] ss:$196 sps:$4 sm:$0xff]  }
 0x25c   :  { %10526 = vmatprep.subr.bf16.mxu0 %v11457_v44 }
 0x25d   :  { %10547 = vmatpush3.bf16.msra.mxu1 %v11456_v43  ;;  %v11500_v43 = vld [vmem:[%s14285_s1 + $0x1438] sm:$0xff]  }
 0x25e   :  { %10548 = vmatprep.subr.bf16.mxu1 %v11459_v46  ;;  %v2048_v46 = vcombine.high %v2040_v38, %v2040_v38 }
 0x25f   :  { %10527 = vmatpush3.bf16.msra.mxu0 %v11458_v45 }
 0x260   :  { %10556 = vmatprep.subr.bf16.mxu0 %v11463_v53 }
 0x261   :  { %10549 = vmatpush3.bf16.msra.mxu1 %v11462_v49  ;;  %v11501_v49 = vld [vmem:[%s14285_s1 + $0x14f8] sm:$0xff]  }
 0x262   :  { %v10264_v47 = vpop.f32.mrf.mxu0  ;;  %10578 = vmatprep.subr.bf16.mxu1 %v11466_v62  ;;  %8406 = vmatmul.mubr.bf16.vlgmr.msra.gmra.mxu0 %v2022_v52  ;;  %v11508_v62 = vld [vmem:[%s14285_s1 + $0x1428] sm:$0xff]  }
 0x263   :  { %10557 = vmatpush3.bf16.msra.mxu0 %v11465_v56  ;;  %8485 = vmatprep.mubr.bf16.mxu0 %v2048_v46  ;;  %v11503_v56 = vld [vmem:[%s14285_s1 + $0x1470] sm:$0xff]  }
 0x264   :  { %v10265_v50 = vpop.f32.mrf.mxu0  ;;  %v10286_v51 = vpop.f32.mrf.mxu1  ;;  %8446 = vmatmul.mubr.bf16.vlgmr.msra.gmra.mxu1 %v2029_v60  ;;  %10558 = vmatprep.subr.bf16.mxu0 %v11468_v5  ;;  %v11506_v60 = vld [vmem:[%s14285_s1 + $0x14b0] sm:$0xff]   ;;  %v11515_v5 = vld [vmem:[%s14285_s1 + $0x1458] sm:$0xff]  }
 0x265   :  { %v10266_v55 = vadd.f32 %v10265_v50, %v10264_v47  ;;  %10579 = vmatpush3.bf16.msra.mxu1 %v11467_v0  ;;  %v2047_v47 = vrot.slane %v11499_v41, %v11782_v40  ;;  %v11510_v0 = vld [vmem:[%s14285_s1 + $0x14a8] sm:$0xff]   ;;  %v11540_v46 = vld [vmem:[%s14285_s1 + $0x15f0] sm:$0xff]  }
 0x266   :  { %v10267_v57 = vpop.f32.mrf.mxu0  ;;  %v10287_v58 = vpop.f32.mrf.mxu1  ;;  %10580 = vmatprep.subr.bf16.mxu1 %v11470_v8  ;;  %v11518_v8 = vld [vmem:[%s14285_s1 + $0x1498] sm:$0xff]  }
 0x267   :  { %v7928_v61 = vadd.f32 %v10266_v55, %v13599_v17  ;;  %v10288_v63 = vadd.f32 %v10287_v58, %v10286_v51  ;;  %10559 = vmatpush3.bf16.msra.mxu0 %v11469_v6  ;;  %v11479_v17 = vld [vmem:[%s14285_s1 + $0x13a0] sm:$0xff]   ;;  %v11502_v51 = vld [vmem:[%s14285_s1 + $0x14b8] sm:$0xff]   ;;  %v2049_v54 = vcombine.high %v2047_v47, %v2047_v47  ;;  %v11504_v57 = vld [vmem:[%s14285_s1 + $0x1430] sm:$0xff]  }
 0x268   :  { %v10268_v1 = vpop.f32.mrf.mxu0  ;;  %v10289_v2 = vpop.f32.mrf.mxu1  ;;  %10560 = vmatprep.subr.bf16.mxu0 %v11472_v10  ;;  %v11516_v6 = vld [vmem:[%s14285_s1 + $0x1418] sm:$0xff]   ;;  %v11520_v10 = vld [vmem:[%s14285_s1 + $0x1410] sm:$0xff]  }
 0x269   :  { %v13706_v4 = vadd.f32 %v10288_v63, %v7928_v61  ;;  %10581 = vmatpush3.bf16.msra.mxu1 %v11471_v9  ;;  %8525 = vmatprep.mubr.bf16.mxu1 %v2049_v54  ;;  %v11507_v61 = vld [vmem:[%s14285_s1 + $0x1468] sm:$0xff]   ;;  %v11511_v1 = vld [vmem:[%s14285_s1 + $0x1460] sm:$0xff]   ;;  %v11519_v9 = vld [vmem:[%s14285_s1 + $0x1450] sm:$0xff]  }
 0x26a   :  { %v10290_v7 = vpop.f32.mrf.mxu1  ;;  %10582 = vmatprep.subr.bf16.mxu1 %v11474_v12  ;;  %v11509_v63 = vld [vmem:[%s14285_s1 + $0x14e8] sm:$0xff]   ;;  %v11512_v2 = vld [vmem:[%s14285_s1 + $0x1420] sm:$0xff]   ;;  %v11522_v12 = vld [vmem:[%s14285_s1 + $0x1490] sm:$0xff]  }
 0x26b   :  { %10561 = vmatpush3.bf16.msra.mxu0 %v11473_v11  ;;  %v11517_v7 = vld [vmem:[%s14285_s1 + $0x14d8] sm:$0xff]   ;;  %v11521_v11 = vld [vmem:[%s14285_s1 + $0x14d0] sm:$0xff]   ;;  %v11548_v54 = vld [vmem:[%s14285_s1 + $0x15e0] sm:$0xff]  }
 0x26c   :  { %10562 = vmatprep.subr.bf16.mxu0 %v11476_v14  ;;  %v11524_v14 = vld [vmem:[%s14285_s1 + $0x1408] sm:$0xff]  }
 0x26d   :  { %10583 = vmatpush3.bf16.msra.mxu1 %v11475_v13  ;;  %v11523_v13 = vld [vmem:[%s14285_s1 + $0x1448] sm:$0xff]  }
 0x26e   :  { %10584 = vmatprep.subr.bf16.mxu1 %v11478_v16  ;;  %v11526_v16 = vld [vmem:[%s14285_s1 + $0x1488] sm:$0xff]  }
 0x26f   :  { %10563 = vmatpush3.bf16.msra.mxu0 %v11477_v15  ;;  %v11525_v15 = vld [vmem:[%s14285_s1 + $0x14c8] sm:$0xff]  }
 0x270   :  { %10564 = vmatprep.subr.bf16.mxu0 %v11480_v18  ;;  %v11528_v18 = vld [vmem:[%s14285_s1 + $0x1400] sm:$0xff]  }
 0x271   :  { %10585 = vmatpush3.bf16.msra.mxu1 %v11479_v17  ;;  %v11527_v17 = vld [vmem:[%s14285_s1 + $0x1440] sm:$0xff]  }
 0x272   :  { %10586 = vmatprep.subr.bf16.mxu1 %v11482_v20 }
 0x273   :  { %10565 = vmatpush3.bf16.msra.mxu0 %v11481_v19  ;;  %v11529_v19 = vld [vmem:[%s14285_s1 + $0x14c0] sm:$0xff]  }
 0x274   :  { %10566 = vmatprep.subr.bf16.mxu0 %v11484_v22  ;;  %v11532_v22 = vld [vmem:[%s14285_s1 + $0x1480] sm:$0xff]  }
 0x275   :  { %10587 = vmatpush3.bf16.msra.mxu1 %v11483_v21  ;;  %v11530_v21 = vld [vmem:[%s14284_s0 + $0xa0] ss:$196 sps:$4 sm:$0xff]  }
 0x276   :  { %10588 = vmatprep.subr.bf16.mxu1 %v11486_v24  ;;  %v2058_v24 = vrot.slane %v11530_v21, %v11782_v40 }
 0x277   :  { %10567 = vmatpush3.bf16.msra.mxu0 %v11485_v23 }
 0x278   :  { %10568 = vmatprep.subr.bf16.mxu0 %v11488_v26 }
 0x279   :  { %10589 = vmatpush3.bf16.msra.mxu1 %v11487_v25  ;;  %v11533_v25 = vld [vmem:[%s14285_s1 + $0x1578] sm:$0xff]  }
 0x27a   :  { %10590 = vmatprep.subr.bf16.mxu1 %v11490_v28  ;;  %v11534_v28 = vld [vmem:[%s14284_s0 + $0xa4] ss:$196 sps:$4 sm:$0xff]  }
 0x27b   :  { %10569 = vmatpush3.bf16.msra.mxu0 %v11489_v27  ;;  %v2065_v34 = vrot.slane %v11534_v28, %v11782_v40 }
 0x27c   :  { %10570 = vmatprep.subr.bf16.mxu0 %v11492_v30  ;;  %v2066_v30 = vcombine.high %v2058_v24, %v2058_v24 }
 0x27d   :  { %10591 = vmatpush3.bf16.msra.mxu1 %v11491_v29  ;;  %v2067_v41 = vcombine.high %v2065_v34, %v2065_v34 }
 0x27e   :  { %10592 = vmatprep.subr.bf16.mxu1 %v11494_v32 }
 0x27f   :  { %10571 = vmatpush3.bf16.msra.mxu0 %v11493_v31  ;;  %v11535_v31 = vld [vmem:[%s14285_s1 + $0x1538] sm:$0xff]  }
 0x280   :  { %10600 = vmatprep.subr.bf16.mxu0 %v11498_v39 }
 0x281   :  { %10593 = vmatpush3.bf16.msra.mxu1 %v11497_v35  ;;  %v11536_v35 = vld [vmem:[%s14285_s1 + $0x15f8] sm:$0xff]  }
 0x282   :  { %v10308_v33 = vpop.f32.mrf.mxu0  ;;  %10622 = vmatprep.subr.bf16.mxu1 %v11501_v49  ;;  %8486 = vmatmul.mubr.bf16.vlgmr.msra.gmra.mxu0 %v2040_v38  ;;  %v11537_v38 = vld [vmem:[%s14285_s1 + $0x15b8] sm:$0xff]   ;;  %v11543_v49 = vld [vmem:[%s14285_s1 + $0x1528] sm:$0xff]  }
 0x283   :  { %10601 = vmatpush3.bf16.msra.mxu0 %v11500_v43  ;;  %8565 = vmatprep.mubr.bf16.mxu0 %v2066_v30  ;;  %v11538_v43 = vld [vmem:[%s14285_s1 + $0x1570] sm:$0xff]  }
 0x284   :  { %v10309_v36 = vpop.f32.mrf.mxu0  ;;  %v10330_v37 = vpop.f32.mrf.mxu1  ;;  %8526 = vmatmul.mubr.bf16.vlgmr.msra.gmra.mxu1 %v2047_v47  ;;  %10602 = vmatprep.subr.bf16.mxu0 %v11503_v56  ;;  %v11541_v47 = vld [vmem:[%s14285_s1 + $0x15b0] sm:$0xff]   ;;  %v11550_v56 = vld [vmem:[%s14285_s1 + $0x1558] sm:$0xff]  }
 0x285   :  { %v10310_v42 = vadd.f32 %v10309_v36, %v10308_v33  ;;  %10623 = vmatpush3.bf16.msra.mxu1 %v11502_v51  ;;  %8605 = vmatprep.mubr.bf16.mxu1 %v2067_v41  ;;  %v11545_v51 = vld [vmem:[%s14285_s1 + $0x15a8] sm:$0xff]   ;;  %v11574_v30 = vld [vmem:[%s14285_s1 + $0x1630] sm:$0xff]   ;;  %v11583_v41 = vld [vmem:[%s14285_s1 + $0x16e0] sm:$0xff]  }
 0x286   :  { %v10311_v44 = vpop.f32.mrf.mxu0  ;;  %v10331_v45 = vpop.f32.mrf.mxu1  ;;  %10624 = vmatprep.subr.bf16.mxu1 %v11505_v59  ;;  %v11553_v59 = vld [vmem:[%s14285_s1 + $0x1598] sm:$0xff]  }
 0x287   :  { %v8008_v48 = vadd.f32 %v10310_v42, %v13706_v4  ;;  %v10332_v50 = vadd.f32 %v10331_v45, %v10330_v37  ;;  %10603 = vmatpush3.bf16.msra.mxu0 %v11504_v57  ;;  %v11514_v4 = vld [vmem:[%s14285_s1 + $0x14a0] sm:$0xff]   ;;  %v11539_v44 = vld [vmem:[%s14285_s1 + $0x1530] sm:$0xff]   ;;  %v11551_v57 = vld [vmem:[%s14285_s1 + $0x1518] sm:$0xff]  }
 0x288   :  { %v10312_v52 = vpop.f32.mrf.mxu0  ;;  %v10333_v53 = vpop.f32.mrf.mxu1  ;;  %10604 = vmatprep.subr.bf16.mxu0 %v11507_v61  ;;  %v11555_v61 = vld [vmem:[%s14285_s1 + $0x1510] sm:$0xff]  }
 0x289   :  { %v13813_v55 = vadd.f32 %v10332_v50, %v8008_v48  ;;  %10625 = vmatpush3.bf16.msra.mxu1 %v11506_v60  ;;  %v11542_v48 = vld [vmem:[%s14285_s1 + $0x1568] sm:$0xff]   ;;  %v11546_v52 = vld [vmem:[%s14285_s1 + $0x1560] sm:$0xff]   ;;  %v11554_v60 = vld [vmem:[%s14285_s1 + $0x1550] sm:$0xff]  }
 0x28a   :  { %v10334_v58 = vpop.f32.mrf.mxu1  ;;  %10626 = vmatprep.subr.bf16.mxu1 %v11509_v63  ;;  %v11544_v50 = vld [vmem:[%s14285_s1 + $0x15e8] sm:$0xff]   ;;  %v11547_v53 = vld [vmem:[%s14285_s1 + $0x1520] sm:$0xff]   ;;  %v11557_v63 = vld [vmem:[%s14285_s1 + $0x1590] sm:$0xff]  }
 0x28b   :  { %10605 = vmatpush3.bf16.msra.mxu0 %v11508_v62  ;;  %v11552_v58 = vld [vmem:[%s14285_s1 + $0x15d8] sm:$0xff]   ;;  %v11556_v62 = vld [vmem:[%s14285_s1 + $0x15d0] sm:$0xff]  }
 0x28c   :  { %10606 = vmatprep.subr.bf16.mxu0 %v11511_v1  ;;  %v11559_v1 = vld [vmem:[%s14285_s1 + $0x1508] sm:$0xff]  }
 0x28d   :  { %10627 = vmatpush3.bf16.msra.mxu1 %v11510_v0  ;;  %v11558_v0 = vld [vmem:[%s14285_s1 + $0x1548] sm:$0xff]  }
 0x28e   :  { %10628 = vmatprep.subr.bf16.mxu1 %v11513_v3  ;;  %v11561_v3 = vld [vmem:[%s14285_s1 + $0x1588] sm:$0xff]  }
 0x28f   :  { %10607 = vmatpush3.bf16.msra.mxu0 %v11512_v2  ;;  %v11560_v2 = vld [vmem:[%s14285_s1 + $0x15c8] sm:$0xff]  }
 0x290   :  { %10608 = vmatprep.subr.bf16.mxu0 %v11515_v5  ;;  %v11563_v5 = vld [vmem:[%s14285_s1 + $0x1500] sm:$0xff]  }
 0x291   :  { %10629 = vmatpush3.bf16.msra.mxu1 %v11514_v4  ;;  %v11562_v4 = vld [vmem:[%s14285_s1 + $0x1540] sm:$0xff]  }
 0x292   :  { %10630 = vmatprep.subr.bf16.mxu1 %v11517_v7 }
 0x293   :  { %10609 = vmatpush3.bf16.msra.mxu0 %v11516_v6  ;;  %v11564_v6 = vld [vmem:[%s14285_s1 + $0x15c0] sm:$0xff]  }
 0x294   :  { %10610 = vmatprep.subr.bf16.mxu0 %v11519_v9  ;;  %v11567_v9 = vld [vmem:[%s14285_s1 + $0x1580] sm:$0xff]  }
 0x295   :  { %10631 = vmatpush3.bf16.msra.mxu1 %v11518_v8  ;;  %v11565_v8 = vld [vmem:[%s14284_s0 + $0xa8] ss:$196 sps:$4 sm:$0xff]  }
 0x296   :  { %10632 = vmatprep.subr.bf16.mxu1 %v11521_v11 }
 0x297   :  { %10611 = vmatpush3.bf16.msra.mxu0 %v11520_v10 }
 0x298   :  { %10612 = vmatprep.subr.bf16.mxu0 %v11523_v13  ;;  %v11568_v13 = vld [vmem:[%s14285_s1 + $0x1678] sm:$0xff]  }
 0x299   :  { %10633 = vmatpush3.bf16.msra.mxu1 %v11522_v12  ;;  %v2076_v12 = vrot.slane %v11565_v8, %v11782_v40 }
 0x29a   :  { %10634 = vmatprep.subr.bf16.mxu1 %v11525_v15 }
 0x29b   :  { %10613 = vmatpush3.bf16.msra.mxu0 %v11524_v14  ;;  %v11569_v14 = vld [vmem:[%s14284_s0 + $0xac] ss:$196 sps:$4 sm:$0xff]  }
 0x29c   :  { %10614 = vmatprep.subr.bf16.mxu0 %v11527_v17 }
 0x29d   :  { %10635 = vmatpush3.bf16.msra.mxu1 %v11526_v16  ;;  %v11570_v16 = vld [vmem:[%s14285_s1 + $0x1638] sm:$0xff]  }
 0x29e   :  { %10636 = vmatprep.subr.bf16.mxu1 %v11529_v19  ;;  %v2084_v19 = vcombine.high %v2076_v12, %v2076_v12 }
 0x29f   :  { %10615 = vmatpush3.bf16.msra.mxu0 %v11528_v18 }
 0x2a0   :  { %10644 = vmatprep.subr.bf16.mxu0 %v11533_v25 }
 0x2a1   :  { %10637 = vmatpush3.bf16.msra.mxu1 %v11532_v22  ;;  %v11571_v22 = vld [vmem:[%s14285_s1 + $0x16f8] sm:$0xff]  }
 0x2a2   :  { %v10352_v20 = vpop.f32.mrf.mxu0  ;;  %8566 = vmatmul.mubr.bf16.vlgmr.msra.gmra.mxu0 %v2058_v24  ;;  %10666 = vmatprep.subr.bf16.mxu1 %v11536_v35  ;;  %v11572_v24 = vld [vmem:[%s14285_s1 + $0x16b8] sm:$0xff]   ;;  %v11578_v35 = vld [vmem:[%s14285_s1 + $0x1628] sm:$0xff]  }
 0x2a3   :  { %10645 = vmatpush3.bf16.msra.mxu0 %v11535_v31  ;;  %8645 = vmatprep.mubr.bf16.mxu0 %v2084_v19  ;;  %v11610_v19 = vld [vmem:[%s14285_s1 + $0x17f0] sm:$0xff]  }
 0x2a4   :  { %v10353_v23 = vpop.f32.mrf.mxu0  ;;  %v10374_v27 = vpop.f32.mrf.mxu1  ;;  %10646 = vmatprep.subr.bf16.mxu0 %v11538_v43  ;;  %8606 = vmatmul.mubr.bf16.vlgmr.msra.gmra.mxu1 %v2065_v34  ;;  %v11577_v34 = vld [vmem:[%s14285_s1 + $0x1668] sm:$0xff]   ;;  %v11585_v43 = vld [vmem:[%s14285_s1 + $0x1658] sm:$0xff]  }
 0x2a5   :  { %v10354_v26 = vadd.f32 %v10353_v23, %v10352_v20  ;;  %10667 = vmatpush3.bf16.msra.mxu1 %v11537_v38  ;;  %v2083_v20 = vrot.slane %v11569_v14, %v11782_v40  ;;  %v11581_v38 = vld [vmem:[%s14285_s1 + $0x1660] sm:$0xff]  }
 0x2a6   :  { %v10355_v29 = vpop.f32.mrf.mxu0  ;;  %v10375_v33 = vpop.f32.mrf.mxu1  ;;  %10668 = vmatprep.subr.bf16.mxu1 %v11540_v46  ;;  %v11588_v46 = vld [vmem:[%s14285_s1 + $0x1698] sm:$0xff]  }
 0x2a7   :  { %v8088_v32 = vadd.f32 %v10354_v26, %v13813_v55  ;;  %v10376_v36 = vadd.f32 %v10375_v33, %v10374_v27  ;;  %10647 = vmatpush3.bf16.msra.mxu0 %v11539_v44  ;;  %v11549_v55 = vld [vmem:[%s14285_s1 + $0x15a0] sm:$0xff]   ;;  %v2085_v27 = vcombine.high %v2083_v20, %v2083_v20  ;;  %v11573_v29 = vld [vmem:[%s14285_s1 + $0x1670] sm:$0xff]   ;;  %v11586_v44 = vld [vmem:[%s14285_s1 + $0x1618] sm:$0xff]  }
 0x2a8   :  { %v10356_v37 = vpop.f32.mrf.mxu0  ;;  %v10377_v39 = vpop.f32.mrf.mxu1  ;;  %10648 = vmatprep.subr.bf16.mxu0 %v11542_v48  ;;  %v11576_v33 = vld [vmem:[%s14285_s1 + $0x16b0] sm:$0xff]  }
 0x2a9   :  { %v13920_v42 = vadd.f32 %v10376_v36, %v8088_v32  ;;  %10669 = vmatpush3.bf16.msra.mxu1 %v11541_v47  ;;  %8685 = vmatprep.mubr.bf16.mxu1 %v2085_v27  ;;  %v11575_v32 = vld [vmem:[%s14285_s1 + $0x16f0] sm:$0xff]   ;;  %v11579_v36 = vld [vmem:[%s14285_s1 + $0x16e8] sm:$0xff]   ;;  %v11582_v39 = vld [vmem:[%s14285_s1 + $0x1620] sm:$0xff]  }
 0x2aa   :  { %v10378_v45 = vpop.f32.mrf.mxu1  ;;  %10670 = vmatprep.subr.bf16.mxu1 %v11544_v50  ;;  %v11580_v37 = vld [vmem:[%s14285_s1 + $0x16a8] sm:$0xff]   ;;  %v11589_v47 = vld [vmem:[%s14285_s1 + $0x1650] sm:$0xff]   ;;  %v11618_v27 = vld [vmem:[%s14285_s1 + $0x17e0] sm:$0xff]  }
 0x2ab   :  { %10649 = vmatpush3.bf16.msra.mxu0 %v11543_v49  ;;  %v11587_v45 = vld [vmem:[%s14285_s1 + $0x16d8] sm:$0xff]   ;;  %v11590_v48 = vld [vmem:[%s14285_s1 + $0x1610] sm:$0xff]  }
 0x2ac   :  { %10650 = vmatprep.subr.bf16.mxu0 %v11546_v52  ;;  %v11591_v49 = vld [vmem:[%s14285_s1 + $0x16d0] sm:$0xff]   ;;  %v11594_v52 = vld [vmem:[%s14285_s1 + $0x1608] sm:$0xff]  }
 0x2ad   :  { %10671 = vmatpush3.bf16.msra.mxu1 %v11545_v51  ;;  %v11592_v50 = vld [vmem:[%s14285_s1 + $0x1690] sm:$0xff]   ;;  %v11593_v51 = vld [vmem:[%s14285_s1 + $0x1648] sm:$0xff]  }
 0x2ae   :  { %10672 = vmatprep.subr.bf16.mxu1 %v11548_v54  ;;  %v11596_v54 = vld [vmem:[%s14285_s1 + $0x1688] sm:$0xff]  }
 0x2af   :  { %10651 = vmatpush3.bf16.msra.mxu0 %v11547_v53  ;;  %v11595_v53 = vld [vmem:[%s14285_s1 + $0x16c8] sm:$0xff]  }
 0x2b0   :  { %10652 = vmatprep.subr.bf16.mxu0 %v11550_v56  ;;  %v11598_v56 = vld [vmem:[%s14285_s1 + $0x1600] sm:$0xff]  }
 0x2b1   :  { %10673 = vmatpush3.bf16.msra.mxu1 %v11549_v55  ;;  %v11597_v55 = vld [vmem:[%s14285_s1 + $0x1640] sm:$0xff]  }
 0x2b2   :  { %10674 = vmatprep.subr.bf16.mxu1 %v11552_v58 }
 0x2b3   :  { %10653 = vmatpush3.bf16.msra.mxu0 %v11551_v57  ;;  %v11599_v57 = vld [vmem:[%s14285_s1 + $0x16c0] sm:$0xff]  }
 0x2b4   :  { %10654 = vmatprep.subr.bf16.mxu0 %v11554_v60  ;;  %v11602_v60 = vld [vmem:[%s14285_s1 + $0x1680] sm:$0xff]  }
 0x2b5   :  { %10675 = vmatpush3.bf16.msra.mxu1 %v11553_v59  ;;  %v11600_v59 = vld [vmem:[%s14284_s0 + $0xb0] ss:$196 sps:$4 sm:$0xff]  }
 0x2b6   :  { %10676 = vmatprep.subr.bf16.mxu1 %v11556_v62 }
 0x2b7   :  { %10655 = vmatpush3.bf16.msra.mxu0 %v11555_v61 }
 0x2b8   :  { %10656 = vmatprep.subr.bf16.mxu0 %v11558_v0  ;;  %v11603_v0 = vld [vmem:[%s14285_s1 + $0x1778] sm:$0xff]  }
 0x2b9   :  { %10677 = vmatpush3.bf16.msra.mxu1 %v11557_v63  ;;  %v2094_v63 = vrot.slane %v11600_v59, %v11782_v40 }
 0x2ba   :  { %10678 = vmatprep.subr.bf16.mxu1 %v11560_v2 }
 0x2bb   :  { %10657 = vmatpush3.bf16.msra.mxu0 %v11559_v1  ;;  %v11604_v1 = vld [vmem:[%s14284_s0 + $0xb4] ss:$196 sps:$4 sm:$0xff]  }
 0x2bc   :  { %10658 = vmatprep.subr.bf16.mxu0 %v11562_v4 }
 0x2bd   :  { %10679 = vmatpush3.bf16.msra.mxu1 %v11561_v3  ;;  %v11605_v3 = vld [vmem:[%s14285_s1 + $0x1738] sm:$0xff]  }
 0x2be   :  { %10680 = vmatprep.subr.bf16.mxu1 %v11564_v6  ;;  %v2102_v6 = vcombine.high %v2094_v63, %v2094_v63 }
 0x2bf   :  { %10659 = vmatpush3.bf16.msra.mxu0 %v11563_v5 }
 0x2c0   :  { %10688 = vmatprep.subr.bf16.mxu0 %v11568_v13 }
 0x2c1   :  { %10681 = vmatpush3.bf16.msra.mxu1 %v11567_v9  ;;  %v11606_v9 = vld [vmem:[%s14285_s1 + $0x17f8] sm:$0xff]  }
 0x2c2   :  { %v10396_v7 = vpop.f32.mrf.mxu0  ;;  %10710 = vmatprep.subr.bf16.mxu1 %v11571_v22  ;;  %8646 = vmatmul.mubr.bf16.vlgmr.msra.gmra.mxu0 %v2076_v12  ;;  %v11613_v22 = vld [vmem:[%s14285_s1 + $0x1728] sm:$0xff]  }
 0x2c3   :  { %10689 = vmatpush3.bf16.msra.mxu0 %v11570_v16  ;;  %8725 = vmatprep.mubr.bf16.mxu0 %v2102_v6  ;;  %v11608_v16 = vld [vmem:[%s14285_s1 + $0x1770] sm:$0xff]   ;;  %v11645_v6 = vld [vmem:[%s14285_s1 + $0x1860] sm:$0xff]  }
 0x2c4   :  { %v10397_v10 = vpop.f32.mrf.mxu0  ;;  %v10418_v11 = vpop.f32.mrf.mxu1  ;;  %8686 = vmatmul.mubr.bf16.vlgmr.msra.gmra.mxu1 %v2083_v20  ;;  %10690 = vmatprep.subr.bf16.mxu0 %v11573_v29  ;;  %v11611_v20 = vld [vmem:[%s14285_s1 + $0x17b0] sm:$0xff]   ;;  %v11620_v29 = vld [vmem:[%s14285_s1 + $0x1758] sm:$0xff]  }
 0x2c5   :  { %v10398_v15 = vadd.f32 %v10397_v10, %v10396_v7  ;;  %10711 = vmatpush3.bf16.msra.mxu1 %v11572_v24  ;;  %v2101_v7 = vrot.slane %v11604_v1, %v11782_v40  ;;  %v11615_v24 = vld [vmem:[%s14285_s1 + $0x17a8] sm:$0xff]  }
 0x2c6   :  { %v10399_v17 = vpop.f32.mrf.mxu0  ;;  %v10419_v18 = vpop.f32.mrf.mxu1  ;;  %10712 = vmatprep.subr.bf16.mxu1 %v11575_v32  ;;  %v11623_v32 = vld [vmem:[%s14285_s1 + $0x1798] sm:$0xff]  }
 0x2c7   :  { %v8168_v21 = vadd.f32 %v10398_v15, %v13920_v42  ;;  %v10420_v23 = vadd.f32 %v10419_v18, %v10418_v11  ;;  %10691 = vmatpush3.bf16.msra.mxu0 %v11574_v30  ;;  %v11584_v42 = vld [vmem:[%s14285_s1 + $0x16a0] sm:$0xff]   ;;  %v11607_v11 = vld [vmem:[%s14285_s1 + $0x17b8] sm:$0xff]   ;;  %v2103_v14 = vcombine.high %v2101_v7, %v2101_v7  ;;  %v11609_v17 = vld [vmem:[%s14285_s1 + $0x1730] sm:$0xff]  }
 0x2c8   :  { %v10400_v25 = vpop.f32.mrf.mxu0  ;;  %v10421_v26 = vpop.f32.mrf.mxu1  ;;  %10692 = vmatprep.subr.bf16.mxu0 %v11577_v34  ;;  %v11621_v30 = vld [vmem:[%s14285_s1 + $0x1718] sm:$0xff]   ;;  %v11625_v34 = vld [vmem:[%s14285_s1 + $0x1710] sm:$0xff]  }
 0x2c9   :  { %v14027_v28 = vadd.f32 %v10420_v23, %v8168_v21  ;;  %10713 = vmatpush3.bf16.msra.mxu1 %v11576_v33  ;;  %8765 = vmatprep.mubr.bf16.mxu1 %v2103_v14  ;;  %v11612_v21 = vld [vmem:[%s14285_s1 + $0x1768] sm:$0xff]   ;;  %v11616_v25 = vld [vmem:[%s14285_s1 + $0x1760] sm:$0xff]   ;;  %v11624_v33 = vld [vmem:[%s14285_s1 + $0x1750] sm:$0xff]  }
 0x2ca   :  { %v10422_v31 = vpop.f32.mrf.mxu1  ;;  %10714 = vmatprep.subr.bf16.mxu1 %v11579_v36  ;;  %v11614_v23 = vld [vmem:[%s14285_s1 + $0x17e8] sm:$0xff]   ;;  %v11617_v26 = vld [vmem:[%s14285_s1 + $0x1720] sm:$0xff]   ;;  %v11627_v36 = vld [vmem:[%s14285_s1 + $0x1790] sm:$0xff]  }
 0x2cb   :  { %10693 = vmatpush3.bf16.msra.mxu0 %v11578_v35  ;;  %v11622_v31 = vld [vmem:[%s14285_s1 + $0x17d8] sm:$0xff]   ;;  %v11626_v35 = vld [vmem:[%s14285_s1 + $0x17d0] sm:$0xff]  }
 0x2cc   :  { %10694 = vmatprep.subr.bf16.mxu0 %v11581_v38  ;;  %v11629_v38 = vld [vmem:[%s14285_s1 + $0x1708] sm:$0xff]   ;;  %v11650_v14 = vld [vmem:[%s14285_s1 + $0x1810] sm:$0xff]  }
 0x2cd   :  { %10715 = vmatpush3.bf16.msra.mxu1 %v11580_v37  ;;  %v11628_v37 = vld [vmem:[%s14285_s1 + $0x1748] sm:$0xff]  }
 0x2ce   :  { %10716 = vmatprep.subr.bf16.mxu1 %v11583_v41  ;;  %v11631_v41 = vld [vmem:[%s14285_s1 + $0x1788] sm:$0xff]  }
 0x2cf   :  { %10695 = vmatpush3.bf16.msra.mxu0 %v11582_v39  ;;  %v11630_v39 = vld [vmem:[%s14285_s1 + $0x17c8] sm:$0xff]  }
 0x2d0   :  { %10696 = vmatprep.subr.bf16.mxu0 %v11585_v43  ;;  %v11633_v43 = vld [vmem:[%s14285_s1 + $0x1700] sm:$0xff]  }
 0x2d1   :  { %10717 = vmatpush3.bf16.msra.mxu1 %v11584_v42  ;;  %v11632_v42 = vld [vmem:[%s14285_s1 + $0x1740] sm:$0xff]  }
 0x2d2   :  { %10718 = vmatprep.subr.bf16.mxu1 %v11587_v45 }
 0x2d3   :  { %10697 = vmatpush3.bf16.msra.mxu0 %v11586_v44  ;;  %v11634_v44 = vld [vmem:[%s14285_s1 + $0x17c0] sm:$0xff]  }
 0x2d4   :  { %10698 = vmatprep.subr.bf16.mxu0 %v11589_v47  ;;  %v11637_v47 = vld [vmem:[%s14285_s1 + $0x1780] sm:$0xff]  }
 0x2d5   :  { %10719 = vmatpush3.bf16.msra.mxu1 %v11588_v46  ;;  %v11635_v46 = vld [vmem:[%s14284_s0 + $0xb8] ss:$196 sps:$4 sm:$0xff]  }
 0x2d6   :  { %10720 = vmatprep.subr.bf16.mxu1 %v11591_v49  ;;  %v2112_v49 = vrot.slane %v11635_v46, %v11782_v40 }
 0x2d7   :  { %10699 = vmatpush3.bf16.msra.mxu0 %v11590_v48 }
 0x2d8   :  { %10700 = vmatprep.subr.bf16.mxu0 %v11593_v51 }
 0x2d9   :  { %10721 = vmatpush3.bf16.msra.mxu1 %v11592_v50  ;;  %v11638_v50 = vld [vmem:[%s14285_s1 + $0x1878] sm:$0xff]  }
 0x2da   :  { %10722 = vmatprep.subr.bf16.mxu1 %v11595_v53  ;;  %v11639_v53 = vld [vmem:[%s14284_s0 + $0xbc] ss:$196 sps:$4 sm:$0xff]  }
 0x2db   :  { %10701 = vmatpush3.bf16.msra.mxu0 %v11594_v52  ;;  %v2119_v59 = vrot.slane %v11639_v53, %v11782_v40 }
 0x2dc   :  { %10702 = vmatprep.subr.bf16.mxu0 %v11597_v55  ;;  %v2120_v55 = vcombine.high %v2112_v49, %v2112_v49 }
 0x2dd   :  { %10723 = vmatpush3.bf16.msra.mxu1 %v11596_v54 }
 0x2de   :  { %10724 = vmatprep.subr.bf16.mxu1 %v11599_v57 }
 0x2df   :  { %10703 = vmatpush3.bf16.msra.mxu0 %v11598_v56  ;;  %v11640_v56 = vld [vmem:[%s14285_s1 + $0x1838] sm:$0xff]  }
 0x2e0   :  { %10732 = vmatprep.subr.bf16.mxu0 %v11603_v0  ;;  %v2121_v0 = vcombine.high %v2119_v59, %v2119_v59 }
 0x2e1   :  { %10725 = vmatpush3.bf16.msra.mxu1 %v11602_v60 }
 0x2e2   :  { %v10440_v58 = vpop.f32.mrf.mxu0  ;;  %10754 = vmatprep.subr.bf16.mxu1 %v11606_v9  ;;  %8726 = vmatmul.mubr.bf16.vlgmr.msra.gmra.mxu0 %v2094_v63  ;;  %v11655_v9 = vld [vmem:[%s14284_s0 + $0xc0] ss:$196 sps:$4 sm:$0xff]  }
 0x2e3   :  { %10733 = vmatpush3.bf16.msra.mxu0 %v11605_v3  ;;  %8805 = vmatprep.mubr.bf16.mxu0 %v2120_v55 }
 0x2e4   :  { %v10441_v61 = vpop.f32.mrf.mxu0  ;;  %v10462_v62 = vpop.f32.mrf.mxu1  ;;  %8766 = vmatmul.mubr.bf16.vlgmr.msra.gmra.mxu1 %v2101_v7  ;;  %10734 = vmatprep.subr.bf16.mxu0 %v11608_v16  ;;  %v11646_v7 = vld [vmem:[%s14285_s1 + $0x1820] sm:$0xff]   ;;  %v11652_v16 = vld [vmem:[%s14285_s1 + $0x1808] sm:$0xff]  }
 0x2e5   :  { %v10442_v2 = vadd.f32 %v10441_v61, %v10440_v58  ;;  %10755 = vmatpush3.bf16.msra.mxu1 %v11607_v11  ;;  %v11641_v61 = vld [vmem:[%s14285_s1 + $0x1870] sm:$0xff]   ;;  %8845 = vmatprep.mubr.bf16.mxu1 %v2121_v0 }
 0x2e6   :  { %v10443_v4 = vpop.f32.mrf.mxu0  ;;  %v10463_v5 = vpop.f32.mrf.mxu1  ;;  %10756 = vmatprep.subr.bf16.mxu1 %v11610_v19  ;;  %v11649_v11 = vld [vmem:[%s14285_s1 + $0x1850] sm:$0xff]  }
 0x2e7   :  { %v8248_v8 = vadd.f32 %v10442_v2, %v14027_v28  ;;  %v10464_v10 = vadd.f32 %v10463_v5, %v10462_v62  ;;  %10735 = vmatpush3.bf16.msra.mxu0 %v11609_v17  ;;  %v11619_v28 = vld [vmem:[%s14285_s1 + $0x17a0] sm:$0xff]   ;;  %v11642_v2 = vld [vmem:[%s14285_s1 + $0x1830] sm:$0xff]   ;;  %v11643_v4 = vld [vmem:[%s14285_s1 + $0x1868] sm:$0xff]  }
 0x2e8   :  { %v10444_v12 = vpop.f32.mrf.mxu0  ;;  %v10465_v13 = vpop.f32.mrf.mxu1  ;;  %10736 = vmatprep.subr.bf16.mxu0 %v11612_v21  ;;  %v11644_v5 = vld [vmem:[%s14285_s1 + $0x1828] sm:$0xff]   ;;  %v11654_v17 = vld [vmem:[%s14285_s1 + $0x1800] sm:$0xff]  }
 0x2e9   :  { %v14134_v15 = vadd.f32 %v10464_v10, %v8248_v8  ;;  %10757 = vmatpush3.bf16.msra.mxu1 %v11611_v20  ;;  %v11647_v8 = vld [vmem:[%s14285_s1 + $0x1858] sm:$0xff]   ;;  %v2129_v12 = vrot.slane %v11655_v9, %v11782_v40  ;;  %v11653_v40 = vld [vmem:[%s14285_s1 + $0x1840] sm:$0xff]  }
 0x2ea   :  { %v10466_v18 = vpop.f32.mrf.mxu1  ;;  %10758 = vmatprep.subr.bf16.mxu1 %v11614_v23  ;;  %v11648_v10 = vld [vmem:[%s14285_s1 + $0x1818] sm:$0xff]  }
 0x2eb   :  { %10737 = vmatpush3.bf16.msra.mxu0 %v11613_v22  ;;  %v2130_v13 = vcombine.high %v2129_v12, %v2129_v12 }
 0x2ec   :  { %10738 = vmatprep.subr.bf16.mxu0 %v11616_v25 }
 0x2ed   :  { %10759 = vmatpush3.bf16.msra.mxu1 %v11615_v24 }
 0x2ee   :  { %10760 = vmatprep.subr.bf16.mxu1 %v11618_v27 }
 0x2ef   :  { %10739 = vmatpush3.bf16.msra.mxu0 %v11617_v26 }
 0x2f0   :  { %10740 = vmatprep.subr.bf16.mxu0 %v11620_v29 }
 0x2f1   :  { %10761 = vmatpush3.bf16.msra.mxu1 %v11619_v28 }
 0x2f2   :  { %10762 = vmatprep.subr.bf16.mxu1 %v11622_v31 }
 0x2f3   :  { %10741 = vmatpush3.bf16.msra.mxu0 %v11621_v30 }
 0x2f4   :  { %10742 = vmatprep.subr.bf16.mxu0 %v11624_v33 }
 0x2f5   :  { %10763 = vmatpush3.bf16.msra.mxu1 %v11623_v32 }
 0x2f6   :  { %10764 = vmatprep.subr.bf16.mxu1 %v11626_v35 }
 0x2f7   :  { %10743 = vmatpush3.bf16.msra.mxu0 %v11625_v34 }
 0x2f8   :  { %10744 = vmatprep.subr.bf16.mxu0 %v11628_v37 }
 0x2f9   :  { %10765 = vmatpush3.bf16.msra.mxu1 %v11627_v36 }
 0x2fa   :  { %10766 = vmatprep.subr.bf16.mxu1 %v11630_v39 }
 0x2fb   :  { %10745 = vmatpush3.bf16.msra.mxu0 %v11629_v38 }
 0x2fc   :  { %10746 = vmatprep.subr.bf16.mxu0 %v11632_v42 }
 0x2fd   :  { %10767 = vmatpush3.bf16.msra.mxu1 %v11631_v41 }
 0x2fe   :  { %10768 = vmatprep.subr.bf16.mxu1 %v11634_v44 }
 0x2ff   :  { %10747 = vmatpush3.bf16.msra.mxu0 %v11633_v43 }
 0x300   :  { %10776 = vmatprep.subr.bf16.mxu0 %v11638_v50 }
 0x301   :  { %10769 = vmatpush3.bf16.msra.mxu1 %v11637_v47 }
 0x302   :  { %v10484_v45 = vpop.f32.mrf.mxu0  ;;  %8806 = vmatmul.mubr.bf16.vlgmr.msra.gmra.mxu0 %v2112_v49 }
 0x303   :  { %10777 = vmatpush3.bf16.msra.mxu0 %v11640_v56  ;;  %8885 = vmatprep.mubr.bf16.mxu0 %v2130_v13 }
 0x304   :  { %v10485_v48 = vpop.f32.mrf.mxu0  ;;  %v10506_v52 = vpop.f32.mrf.mxu1  ;;  %10778 = vmatprep.subr.bf16.mxu0 %v11641_v61  ;;  %8846 = vmatmul.mubr.bf16.vlgmr.msra.gmra.mxu1 %v2119_v59 }
 0x305   :  { %v10486_v51 = vadd.f32 %v10485_v48, %v10484_v45 }
 0x306   :  { %v10487_v54 = vpop.f32.mrf.mxu0  ;;  %v10507_v58 = vpop.f32.mrf.mxu1 }
 0x307   :  { %v8328_v57 = vadd.f32 %v10486_v51, %v14134_v15  ;;  %v10508_v60 = vadd.f32 %v10507_v58, %v10506_v52  ;;  %10779 = vmatpush3.bf16.msra.mxu0 %v11642_v2  ;;  %v11651_v15 = vld [vmem:[%s14285_s1 + $0x1848] sm:$0xff]  }
 0x308   :  { %v10488_v62 = vpop.f32.mrf.mxu0  ;;  %v10509_v63 = vpop.f32.mrf.mxu1  ;;  %10780 = vmatprep.subr.bf16.mxu0 %v11643_v4 }
 0x309   :  { %v8368_v1 = vadd.f32 %v10508_v60, %v8328_v57 }
 0x30a   :  { %v10510_v3 = vpop.f32.mrf.mxu1 }
 0x30b   :  { %10781 = vmatpush3.bf16.msra.mxu0 %v11644_v5 }
 0x30c   :  { %10782 = vmatprep.subr.bf16.mxu0 %v11645_v6 }
 0x30f   :  { %10783 = vmatpush3.bf16.msra.mxu0 %v11646_v7 }
 0x310   :  { %10784 = vmatprep.subr.bf16.mxu0 %v11647_v8 }
 0x313   :  { %10785 = vmatpush3.bf16.msra.mxu0 %v11648_v10 }
 0x314   :  { %10786 = vmatprep.subr.bf16.mxu0 %v11649_v11 }
 0x317   :  { %10787 = vmatpush3.bf16.msra.mxu0 %v11650_v14 }
 0x318   :  { %10788 = vmatprep.subr.bf16.mxu0 %v11651_v15 }
 0x31b   :  { %10789 = vmatpush3.bf16.msra.mxu0 %v11652_v16 }
 0x31c   :  { %10790 = vmatprep.subr.bf16.mxu0 %v11653_v40 }
 0x31f   :  { %10791 = vmatpush3.bf16.msra.mxu0 %v11654_v17 }
 0x322   :  { %v10528_v18 = vpop.f32.mrf.mxu0  ;;  %8886 = vmatmul.mubr.bf16.vlgmr.msra.gmra.mxu0 %v2129_v12 }
 0x324   :  { %v10529_v19 = vpop.f32.mrf.mxu0  ;;  %v10550_v20 = vpop.f32.mrf.mxu1 }
 0x325   :  { %v10530_v21 = vadd.f32 %v10529_v19, %v10528_v18 }
 0x326   :  { %v10531_v22 = vpop.f32.mrf.mxu0  ;;  %v10551_v23 = vpop.f32.mrf.mxu1 }
 0x327   :  { %v8408_v24 = vadd.f32 %v10530_v21, %v8368_v1  ;;  %v10552_v25 = vadd.f32 %v10551_v23, %v10550_v20 }
 0x328   :  { %v10532_v26 = vpop.f32.mrf.mxu0  ;;  %v10553_v27 = vpop.f32.mrf.mxu1 }
 0x329   :  { %v8448_v28 = vadd.f32 %v10552_v25, %v8408_v24 }
 0x32a   :  { %v10554_v29 = vpop.f32.mrf.mxu1 }
 0x342   :  { %v10572_v30 = vpop.f32.mrf.mxu0 }
 0x344   :  { %v10573_v31 = vpop.f32.mrf.mxu0  ;;  %v10594_v32 = vpop.f32.mrf.mxu1 }
 0x345   :  { %v10574_v33 = vadd.f32 %v10573_v31, %v10572_v30 }
 0x346   :  { %v10575_v34 = vpop.f32.mrf.mxu0  ;;  %v10595_v35 = vpop.f32.mrf.mxu1 }
 0x347   :  { %v8488_v36 = vadd.f32 %v10574_v33, %v8448_v28  ;;  %v10596_v37 = vadd.f32 %v10595_v35, %v10594_v32 }
 0x348   :  { %v10576_v38 = vpop.f32.mrf.mxu0  ;;  %v10597_v39 = vpop.f32.mrf.mxu1 }
 0x349   :  { %v8528_v41 = vadd.f32 %v10596_v37, %v8488_v36 }
 0x34a   :  { %v10598_v42 = vpop.f32.mrf.mxu1 }
 0x362   :  { %v10616_v43 = vpop.f32.mrf.mxu0 }
 0x364   :  { %v10617_v44 = vpop.f32.mrf.mxu0  ;;  %v10638_v46 = vpop.f32.mrf.mxu1 }
 0x365   :  { %v10618_v45 = vadd.f32 %v10617_v44, %v10616_v43 }
 0x366   :  { %v10619_v47 = vpop.f32.mrf.mxu0  ;;  %v10639_v49 = vpop.f32.mrf.mxu1 }
 0x367   :  { %v8568_v48 = vadd.f32 %v10618_v45, %v8528_v41  ;;  %v10640_v50 = vadd.f32 %v10639_v49, %v10638_v46 }
 0x368   :  { %v10620_v51 = vpop.f32.mrf.mxu0  ;;  %v10641_v52 = vpop.f32.mrf.mxu1 }
 0x369   :  { %v8608_v53 = vadd.f32 %v10640_v50, %v8568_v48 }
 0x36a   :  { %v10642_v54 = vpop.f32.mrf.mxu1 }
 0x382   :  { %v10660_v55 = vpop.f32.mrf.mxu0 }
 0x384   :  { %v10661_v56 = vpop.f32.mrf.mxu0  ;;  %v10682_v57 = vpop.f32.mrf.mxu1 }
 0x385   :  { %v10662_v58 = vadd.f32 %v10661_v56, %v10660_v55 }
 0x386   :  { %v10663_v59 = vpop.f32.mrf.mxu0  ;;  %v10683_v60 = vpop.f32.mrf.mxu1 }
 0x387   :  { %v8648_v61 = vadd.f32 %v10662_v58, %v8608_v53  ;;  %v10684_v62 = vadd.f32 %v10683_v60, %v10682_v57 }
 0x388   :  { %v10664_v63 = vpop.f32.mrf.mxu0  ;;  %v10685_v0 = vpop.f32.mrf.mxu1 }
 0x389   :  { %v8688_v1 = vadd.f32 %v10684_v62, %v8648_v61 }
 0x38a   :  { %v10686_v2 = vpop.f32.mrf.mxu1 }
 0x3a2   :  { %v10704_v3 = vpop.f32.mrf.mxu0 }
 0x3a4   :  { %v10705_v4 = vpop.f32.mrf.mxu0  ;;  %v10726_v5 = vpop.f32.mrf.mxu1 }
 0x3a5   :  { %v10706_v18 = vadd.f32 %v10705_v4, %v10704_v3 }
 0x3a6   :  { %v10707_v6 = vpop.f32.mrf.mxu0  ;;  %v10727_v7 = vpop.f32.mrf.mxu1 }
 0x3a7   :  { %v8728_v19 = vadd.f32 %v10706_v18, %v8688_v1  ;;  %v10728_v20 = vadd.f32 %v10727_v7, %v10726_v5 }
 0x3a8   :  { %v10708_v8 = vpop.f32.mrf.mxu0  ;;  %v10729_v9 = vpop.f32.mrf.mxu1 }
 0x3a9   :  { %v8768_v22 = vadd.f32 %v10728_v20, %v8728_v19 }
 0x3aa   :  { %v10730_v10 = vpop.f32.mrf.mxu1 }
 0x3c2   :  { %v10748_v11 = vpop.f32.mrf.mxu0 }
 0x3c4   :  { %v10749_v12 = vpop.f32.mrf.mxu0  ;;  %v10770_v13 = vpop.f32.mrf.mxu1 }
 0x3c5   :  { %v10750_v21 = vadd.f32 %v10749_v12, %v10748_v11 }
 0x3c6   :  { %v10751_v14 = vpop.f32.mrf.mxu0  ;;  %v10771_v15 = vpop.f32.mrf.mxu1 }
 0x3c7   :  { %v8808_v23 = vadd.f32 %v10750_v21, %v8768_v22  ;;  %v10772_v24 = vadd.f32 %v10771_v15, %v10770_v13 }
 0x3c8   :  { %v10752_v16 = vpop.f32.mrf.mxu0  ;;  %v10773_v40 = vpop.f32.mrf.mxu1 }
 0x3c9   :  { %v8848_v27 = vadd.f32 %v10772_v24, %v8808_v23 }
 0x3ca   :  { %v10774_v17 = vpop.f32.mrf.mxu1 }
 0x3e2   :  { %v10792_v25 = vpop.f32.mrf.mxu0 }
 0x3e4   :  { %v10793_v26 = vpop.f32.mrf.mxu0 }
 0x3e5   :  { %v10794_v28 = vadd.f32 %v10793_v26, %v10792_v25 }
 0x3e6   :  { %v10795_v29 = vpop.f32.mrf.mxu0 }
 0x3e7   :  { %v8888_v30 = vadd.f32 %v10794_v28, %v8848_v27 }
 0x3e8   :  { %v10796_v31 = vpop.f32.mrf.mxu0 }
 0x3e9   :  { %8893 = vst [vmem:[#allocation2] sm:$0xff] %v8888_v30 }
 0x3f0   :  { %v8912_v32 = vld [vmem:[#allocation2] sm:$0xf] }
 0x3f1   :  { %8913 = vst [vmem:[%s14287_s3] sm:$0xf] %v8912_v32 }

</bundles_post_ra>
